<compile_context>
chip_gen: v6e
topology: v6e:2x2x1
jax: 0.10.0
libtpu: 0.0.40
codegen_flags: <defaults>
</compile_context>

<pallas_src>
import functools
import math

import jax
import jax.numpy as jnp
from jax.experimental import pallas as pl
from jax.experimental.pallas import tpu as pltpu

# ---- hyperparams (match the PyTorch module defaults) ----
INPUT_DIM = 6
IN_PAD = 8              # padded input feature dim (lane/sublane friendly)
D_MODEL = 32
NHEAD = 2
D_HID = 128
NLAYERS = 2
HEAD_DIM = D_MODEL // NHEAD
EPS = 1e-5
SCALE = 1.0 / math.sqrt(HEAD_DIM)

MATMUL_DTYPE = jnp.bfloat16   # MXU operand dtype for the big GEMMs; accumulation is f32.


def _ln(x, w, b):
    mu = jnp.mean(x, axis=-1, keepdims=True)
    var = jnp.mean((x - mu) ** 2, axis=-1, keepdims=True)
    return (x - mu) * jax.lax.rsqrt(var + EPS) * w + b


def _mm(a, b):
    # bf16 MXU operands, f32 accumulation; elementwise math around it stays f32.
    return jnp.dot(a.astype(MATMUL_DTYPE), b, preferred_element_type=jnp.float32)


# ------------------------- Pallas kernel -------------------------
def encoder_kernel(
    x_ref,                           # (TB*S, IN_PAD) f32
    proj_w_ref, proj_b_ref,          # (IN_PAD, D) bf16, (1, D) f32
    wqkv_ref, bqkv_ref,              # (L, D, 3D) bf16, (L, 1, 3D) f32  (SCALE folded into Q part)
    wo_ref, bo_ref,                  # (L, D, D) bf16, (L, 1, D) f32
    w1_ref, b1_ref,                  # (L, D, D_HID) bf16, (L, 1, D_HID) f32
    w2_ref, b2_ref,                  # (L, D_HID, D) bf16, (L, 1, D) f32
    n1w_ref, n1b_ref,                # (L, 1, D) f32
    n2w_ref, n2b_ref,                # (L, 1, D) f32
    outp_w_ref, outp_b_ref,          # (D, D) bf16, (1, D) f32
    fnw_ref, fnb_ref,                # (1, D) f32
    o_ref,                           # (TB, D) f32
    *, TB, S,
):
    M = TB * S

    h = _mm(x_ref[...], proj_w_ref[...]) + proj_b_ref[...]               # (M, D) f32

    for l in range(NLAYERS):                                             # static unroll (L=2)
        # ---- self attention: one fused QKV matmul, per-head static lane slices ----
        qkv = _mm(h, wqkv_ref[l]) + bqkv_ref[l]                          # (M, 3D) f32

        heads = []
        for hh in range(NHEAD):                                          # static unroll (H=2)
            q = qkv[:, hh * HEAD_DIM:(hh + 1) * HEAD_DIM].reshape(TB, S, HEAD_DIM)
            k = qkv[:, D_MODEL + hh * HEAD_DIM:D_MODEL + (hh + 1) * HEAD_DIM].reshape(TB, S, HEAD_DIM)
            v = qkv[:, 2 * D_MODEL + hh * HEAD_DIM:2 * D_MODEL + (hh + 1) * HEAD_DIM].reshape(TB, S, HEAD_DIM)

            s = jnp.einsum('bqd,bkd->bqk', q, k,
                           preferred_element_type=jnp.float32)           # (TB, S, S)
            s = s - jnp.max(s, axis=-1, keepdims=True)
            p = jnp.exp(s)
            p = p * pl.reciprocal(jnp.sum(p, axis=-1, keepdims=True), approx=True)
            heads.append(jnp.einsum('bqk,bkd->bqd', p, v,
                                    preferred_element_type=jnp.float32)) # (TB, S, HEAD_DIM)

        # ---- fused output projection: one (M,32)@(32,32) matmul ----
        o_cat = jnp.concatenate(heads, axis=-1).reshape(M, D_MODEL)
        attn = _mm(o_cat, wo_ref[l]) + bo_ref[l]                         # (M, D)
        h = _ln(h + attn, n1w_ref[l], n1b_ref[l])                        # norm1 (post-norm)

        # ---- feed forward: Linear -> ReLU -> Linear ----
        ff = jnp.maximum(_mm(h, w1_ref[l]) + b1_ref[l], 0.0)             # (M, D_HID)
        ff = _mm(ff, w2_ref[l]) + b2_ref[l]                              # (M, D)
        h = _ln(h + ff, n2w_ref[l], n2b_ref[l])                          # norm2

    # ---- mean over seq -> output Linear -> final LayerNorm ----
    pooled = jnp.mean(h.reshape(TB, S, D_MODEL), axis=1)                 # (TB, D)
    y = _mm(pooled, outp_w_ref[...]) + outp_b_ref[...]                   # (TB, D)
    o_ref[...] = _ln(y, fnw_ref[...], fnb_ref[...])


# ------------------------- one-time parameter preparation -------------------------
def prepare_params(p):
    """Transpose / fuse / pad / cast torch-convention params once (hoisted off the call path)."""
    D = D_MODEL

    # Fused QKV weight (L, D, 3D): qkv = h @ in_w.T ; fold 1/sqrt(head_dim) into Q columns
    wqkv = jnp.transpose(p["in_w"], (0, 2, 1))                           # (L, D, 3D)
    bqkv = p["in_b"]                                                     # (L, 1, 3D)
    qscale = jnp.concatenate([jnp.full((D,), SCALE, jnp.float32),
                              jnp.ones((2 * D,), jnp.float32)])          # exact (SCALE = 0.25)
    wqkv = wqkv * qscale
    bqkv = bqkv * qscale

    proj_w = p["proj_w"].T                                               # (INPUT_DIM, D)
    proj_w = jnp.pad(proj_w, ((0, IN_PAD - INPUT_DIM), (0, 0)))          # zero rows for pad cols

    bf16 = lambda a: a.astype(jnp.bfloat16)
    return dict(
        proj_w=bf16(proj_w), proj_b=p["proj_b"],
        wqkv=bf16(wqkv), bqkv=bqkv,
        wo=bf16(jnp.transpose(p["out_w"], (0, 2, 1))), bo=p["out_b"],
        w1=bf16(jnp.transpose(p["w1"], (0, 2, 1))), b1=p["b1"],
        w2=bf16(jnp.transpose(p["w2"], (0, 2, 1))), b2=p["b2"],
        n1_w=p["n1_w"], n1_b=p["n1_b"], n2_w=p["n2_w"], n2_b=p["n2_b"],
        outp_w=bf16(p["outp_w"].T), outp_b=p["outp_b"],
        fn_w=p["fn_w"], fn_b=p["fn_b"],
    )


# ------------------------- wrapper -------------------------
def _round_up(x, m):
    return -(-x // m) * m


def transformer_encoder_forward(x, prep, *, target_rows=2048):
    B, S, F = x.shape
    assert F <= IN_PAD

    # Batch chunk TB: sublane-aligned (mult of 8), sized ~ceil(B/2) so the grid has >= 2
    # "parallel" steps (keeps both v7x TensorCores busy), capped by target_rows//S so the
    # largest intermediate ((TB*S, 128) f32) stays tiny relative to scoped VMEM.
    tb_cap = max(8, _round_up(max(1, target_rows // S), 8))
    TB = min(tb_cap, _round_up(max(1, -(-B // 2)), 8))
    n_blocks = -(-B // TB)
    if B >= 2 and n_blocks < 2:
        n_blocks = 2
    B_pad = n_blocks * TB

    # Pad features to IN_PAD (matching proj_w rows are zero) and batch to B_pad;
    # pre-flatten so the kernel's input block is already (TB*S, IN_PAD).
    x = jnp.pad(x, ((0, B_pad - B), (0, 0), (0, IN_PAD - F)))
    x_flat = x.reshape(B_pad * S, IN_PAD)

    kernel_inputs = [
        x_flat,
        prep["proj_w"], prep["proj_b"],
        prep["wqkv"], prep["bqkv"],
        prep["wo"], prep["bo"],
        prep["w1"], prep["b1"], prep["w2"], prep["b2"],
        prep["n1_w"], prep["n1_b"], prep["n2_w"], prep["n2_b"],
        prep["outp_w"], prep["outp_b"],
        prep["fn_w"], prep["fn_b"],
    ]

    def full_spec(a):
        rank = a.ndim
        return pl.BlockSpec(a.shape, lambda b, _r=rank: (0,) * _r)

    in_specs = [pl.BlockSpec((TB * S, IN_PAD), lambda b: (b, 0))]
    in_specs += [full_spec(a) for a in kernel_inputs[1:]]

    # Advisory cost estimate (helps XLA scheduling when embedded in a larger jit).
    M_total = B_pad * S
    flops = (2 * M_total * (IN_PAD * D_MODEL
                            + NLAYERS * (3 * D_MODEL * D_MODEL + D_MODEL * D_MODEL
                                         + 2 * D_MODEL * D_HID))
             + 4 * B_pad * NLAYERS * NHEAD * S * S * HEAD_DIM
             + 2 * B_pad * D_MODEL * D_MODEL)
    weight_bytes = sum(int(a.size) * a.dtype.itemsize for a in kernel_inputs[1:])
    cost = pl.CostEstimate(
        flops=int(flops),
        transcendentals=int(B_pad * NLAYERS * NHEAD * S * S),
        bytes_accessed=int(x_flat.size * 4 + weight_bytes + B_pad * D_MODEL * 4),
    )

    # TODO(synk): 128-lane-dense packed output store skipped (per-step output <= 16 KiB;
    # the in-kernel relayout would outweigh the masked-store it removes at this size).
    kernel = functools.partial(encoder_kernel, TB=TB, S=S)
    out = pl.pallas_call(
        kernel,
        out_shape=jax.ShapeDtypeStruct((B_pad, D_MODEL), jnp.float32),
        grid_spec=pltpu.PrefetchScalarGridSpec(
            num_scalar_prefetch=0,
            grid=(n_blocks,),
            in_specs=in_specs,
            out_specs=pl.BlockSpec((TB, D_MODEL), lambda b: (b, 0)),
        ),
        compiler_params=pltpu.CompilerParams(dimension_semantics=("parallel",)),
        cost_estimate=cost,
    )(*kernel_inputs)
    return out[:B]                                                        # (B, D_MODEL)


# ------------------------- deterministic params (torch convention) -------------------------
def init_params(key):
    ks = jax.random.split(key, 20)
    n = lambda k, shape, s=0.1: (s * jax.random.normal(k, shape)).astype(jnp.float32)
    L, D, H, I = NLAYERS, D_MODEL, D_HID, INPUT_DIM
    return {
        "proj_w": n(ks[0], (D, I)),          "proj_b": n(ks[1], (1, D)),
        "in_w":   n(ks[2], (L, 3 * D, D)),   "in_b":   n(ks[3], (L, 1, 3 * D)),
        "out_w":  n(ks[4], (L, D, D)),       "out_b":  n(ks[5], (L, 1, D)),
        "w1":     n(ks[6], (L, H, D)),       "b1":     n(ks[7], (L, 1, H)),
        "w2":     n(ks[8], (L, D, H)),       "b2":     n(ks[9], (L, 1, D)),
        "n1_w":   jnp.ones((L, 1, D), jnp.float32),  "n1_b": jnp.zeros((L, 1, D), jnp.float32),
        "n2_w":   jnp.ones((L, 1, D), jnp.float32),  "n2_b": jnp.zeros((L, 1, D), jnp.float32),
        "outp_w": n(ks[10], (D, D)),         "outp_b": n(ks[11], (1, D)),
        "fn_w":   jnp.ones((1, D), jnp.float32),     "fn_b": jnp.zeros((1, D), jnp.float32),
    }


# ------------------------- pure-JAX reference -------------------------
def _ref_single(x, p):
    h = x @ p["proj_w"].T + p["proj_b"][0]
    for l in range(NLAYERS):
        qkv = h @ p["in_w"][l].T + p["in_b"][l, 0]
        q, k, v = qkv[:, :D_MODEL], qkv[:, D_MODEL:2 * D_MODEL], qkv[:, 2 * D_MODEL:]
        heads = []
        for hh in range(NHEAD):
            sl = slice(hh * HEAD_DIM, (hh + 1) * HEAD_DIM)
            s = (q[:, sl] @ k[:, sl].T) * SCALE
            heads.append(jax.nn.softmax(s, axis=-1) @ v[:, sl])
        attn = jnp.concatenate(heads, -1) @ p["out_w"][l].T + p["out_b"][l, 0]
        h = _ln(h + attn, p["n1_w"][l, 0], p["n1_b"][l, 0])
        ff = jax.nn.relu(h @ p["w1"][l].T + p["b1"][l, 0]) @ p["w2"][l].T + p["b2"][l, 0]
        h = _ln(h + ff, p["n2_w"][l, 0], p["n2_b"][l, 0])
    pooled = h.mean(axis=0)
    y = pooled @ p["outp_w"].T + p["outp_b"][0]
    return _ln(y, p["fn_w"][0], p["fn_b"][0])


if __name__ == "__main__":
    key = jax.random.PRNGKey(0)
    k_x, k_p = jax.random.split(key)

    B, S = 2, 8
    x = jax.random.normal(k_x, (B, S, INPUT_DIM), dtype=jnp.float32)
    params = init_params(k_p)

    prepared = prepare_params(params)          # one-time weight layout prep (hoisted)
    out = transformer_encoder_forward(x, prepared)
    out = jax.block_until_ready(out)

    ref = jax.vmap(lambda xi: _ref_single(xi, params))(x)
    assert out.shape == (B, D_MODEL)
    max_err = float(jnp.max(jnp.abs(out - ref)))
    assert jnp.allclose(out, ref, atol=5e-2, rtol=5e-2), max_err

    print("KERNEL_OK")
</pallas_src>

<mosaic_0001>
module attributes {stable_mosaic.version = 11 : i64} {
  func.func @encoder_kernel(%arg0: i32, %arg1: memref<64x8xf32, #tpu.memory_space<vmem>>, %arg2: memref<8x32xbf16, #tpu.memory_space<vmem>>, %arg3: memref<1x32xf32, #tpu.memory_space<vmem>>, %arg4: memref<2x32x96xbf16, #tpu.memory_space<vmem>>, %arg5: memref<2x1x96xf32, #tpu.memory_space<vmem>>, %arg6: memref<2x32x32xbf16, #tpu.memory_space<vmem>>, %arg7: memref<2x1x32xf32, #tpu.memory_space<vmem>>, %arg8: memref<2x32x128xbf16, #tpu.memory_space<vmem>>, %arg9: memref<2x1x128xf32, #tpu.memory_space<vmem>>, %arg10: memref<2x128x32xbf16, #tpu.memory_space<vmem>>, %arg11: memref<2x1x32xf32, #tpu.memory_space<vmem>>, %arg12: memref<2x1x32xf32, #tpu.memory_space<vmem>>, %arg13: memref<2x1x32xf32, #tpu.memory_space<vmem>>, %arg14: memref<2x1x32xf32, #tpu.memory_space<vmem>>, %arg15: memref<2x1x32xf32, #tpu.memory_space<vmem>>, %arg16: memref<32x32xbf16, #tpu.memory_space<vmem>>, %arg17: memref<1x32xf32, #tpu.memory_space<vmem>>, %arg18: memref<1x32xf32, #tpu.memory_space<vmem>>, %arg19: memref<1x32xf32, #tpu.memory_space<vmem>>, %arg20: memref<8x32xf32, #tpu.memory_space<vmem>>) attributes {dimension_semantics = [#tpu.dimension_semantics<parallel>], iteration_bounds = array<i64: 2>, scalar_prefetch = 0 : i64, scratch_operands = 0 : i64, tpu.core_type = #tpu.core_type<tc>, window_params = [{transform_indices = @transform_0, window_bounds = array<i64: 64, 8>}, {pipeline_mode = #tpu.pipeline_mode<synchronous>, transform_indices = @transform_1, window_bounds = array<i64: 8, 32>}, {pipeline_mode = #tpu.pipeline_mode<synchronous>, transform_indices = @transform_2, window_bounds = array<i64: 1, 32>}, {pipeline_mode = #tpu.pipeline_mode<synchronous>, transform_indices = @transform_3, window_bounds = array<i64: 2, 32, 96>}, {pipeline_mode = #tpu.pipeline_mode<synchronous>, transform_indices = @transform_4, window_bounds = array<i64: 2, 1, 96>}, {pipeline_mode = #tpu.pipeline_mode<synchronous>, transform_indices = @transform_5, window_bounds = array<i64: 2, 32, 32>}, {pipeline_mode = #tpu.pipeline_mode<synchronous>, transform_indices = @transform_6, window_bounds = array<i64: 2, 1, 32>}, {pipeline_mode = #tpu.pipeline_mode<synchronous>, transform_indices = @transform_7, window_bounds = array<i64: 2, 32, 128>}, {pipeline_mode = #tpu.pipeline_mode<synchronous>, transform_indices = @transform_8, window_bounds = array<i64: 2, 1, 128>}, {pipeline_mode = #tpu.pipeline_mode<synchronous>, transform_indices = @transform_9, window_bounds = array<i64: 2, 128, 32>}, {pipeline_mode = #tpu.pipeline_mode<synchronous>, transform_indices = @transform_10, window_bounds = array<i64: 2, 1, 32>}, {pipeline_mode = #tpu.pipeline_mode<synchronous>, transform_indices = @transform_11, window_bounds = array<i64: 2, 1, 32>}, {pipeline_mode = #tpu.pipeline_mode<synchronous>, transform_indices = @transform_12, window_bounds = array<i64: 2, 1, 32>}, {pipeline_mode = #tpu.pipeline_mode<synchronous>, transform_indices = @transform_13, window_bounds = array<i64: 2, 1, 32>}, {pipeline_mode = #tpu.pipeline_mode<synchronous>, transform_indices = @transform_14, window_bounds = array<i64: 2, 1, 32>}, {pipeline_mode = #tpu.pipeline_mode<synchronous>, transform_indices = @transform_15, window_bounds = array<i64: 32, 32>}, {pipeline_mode = #tpu.pipeline_mode<synchronous>, transform_indices = @transform_16, window_bounds = array<i64: 1, 32>}, {pipeline_mode = #tpu.pipeline_mode<synchronous>, transform_indices = @transform_17, window_bounds = array<i64: 1, 32>}, {pipeline_mode = #tpu.pipeline_mode<synchronous>, transform_indices = @transform_18, window_bounds = array<i64: 1, 32>}, {transform_indices = @transform_19, window_bounds = array<i64: 8, 32>}]} {
    %c0 = arith.constant 0 : index
    %c0_0 = arith.constant 0 : index
    %0 = vector.load %arg1[%c0, %c0_0] : memref<64x8xf32, #tpu.memory_space<vmem>>, vector<64x8xf32>
    %c0_1 = arith.constant 0 : index
    %c0_2 = arith.constant 0 : index
    %1 = vector.load %arg2[%c0_1, %c0_2] : memref<8x32xbf16, #tpu.memory_space<vmem>>, vector<8x32xbf16>
    %2 = arith.truncf %0 : vector<64x8xf32> to vector<64x8xbf16>
    %cst = arith.constant dense<0.000000e+00> : vector<64x32xf32>
    %3 = tpu.matmul %2, %1, %cst {dimension_numbers = #tpu.dot_dimension_numbers<[1], [0], [0], [1], [0, 0, 1, 1], [], []>} : vector<64x8xbf16>, vector<8x32xbf16>, vector<64x32xf32> -> vector<64x32xf32>
    %c0_3 = arith.constant 0 : index
    %c0_4 = arith.constant 0 : index
    %4 = vector.load %arg3[%c0_3, %c0_4] : memref<1x32xf32, #tpu.memory_space<vmem>>, vector<1x32xf32>
    %5 = vector.broadcast %4 : vector<1x32xf32> to vector<64x32xf32>
    %6 = arith.addf %3, %5 : vector<64x32xf32>
    %c0_5 = arith.constant 0 : index
    %c0_6 = arith.constant 0 : index
    %c0_7 = arith.constant 0 : index
    %7 = vector.load %arg4[%c0_5, %c0_6, %c0_7] : memref<2x32x96xbf16, #tpu.memory_space<vmem>>, vector<1x32x96xbf16>
    %8 = vector.shape_cast %7 : vector<1x32x96xbf16> to vector<32x96xbf16>
    %9 = arith.truncf %6 : vector<64x32xf32> to vector<64x32xbf16>
    %cst_8 = arith.constant dense<0.000000e+00> : vector<64x96xf32>
    %10 = tpu.matmul %9, %8, %cst_8 {dimension_numbers = #tpu.dot_dimension_numbers<[1], [0], [0], [1], [0, 0, 1, 1], [], []>} : vector<64x32xbf16>, vector<32x96xbf16>, vector<64x96xf32> -> vector<64x96xf32>
    %c0_9 = arith.constant 0 : index
    %c0_10 = arith.constant 0 : index
    %c0_11 = arith.constant 0 : index
    %11 = vector.load %arg5[%c0_9, %c0_10, %c0_11] : memref<2x1x96xf32, #tpu.memory_space<vmem>>, vector<1x1x96xf32>
    %12 = vector.shape_cast %11 : vector<1x1x96xf32> to vector<1x96xf32>
    %13 = vector.broadcast %12 : vector<1x96xf32> to vector<64x96xf32>
    %14 = arith.addf %10, %13 : vector<64x96xf32>
    %15 = vector.extract_strided_slice %14 {offsets = [0, 0], sizes = [64, 16], strides = [1, 1]} : vector<64x96xf32> to vector<64x16xf32>
    %16 = vector.shape_cast %15 : vector<64x16xf32> to vector<8x8x16xf32>
    %17 = vector.extract_strided_slice %14 {offsets = [0, 32], sizes = [64, 16], strides = [1, 1]} : vector<64x96xf32> to vector<64x16xf32>
    %18 = vector.shape_cast %17 : vector<64x16xf32> to vector<8x8x16xf32>
    %19 = vector.extract_strided_slice %14 {offsets = [0, 64], sizes = [64, 16], strides = [1, 1]} : vector<64x96xf32> to vector<64x16xf32>
    %20 = vector.shape_cast %19 : vector<64x16xf32> to vector<8x8x16xf32>
    "tpu.trace_start"() <{level = 10 : i32, message = "bqd,bkd->bqk"}> : () -> ()
    %cst_12 = arith.constant dense<0.000000e+00> : vector<8x8x8xf32>
    %21 = tpu.matmul %16, %18, %cst_12 {dimension_numbers = #tpu.dot_dimension_numbers<[2], [2], [1], [1], [0, 0, 0, 1, 1, 1], [0], [0]>} : vector<8x8x16xf32>, vector<8x8x16xf32>, vector<8x8x8xf32> -> vector<8x8x8xf32>
    "tpu.trace_stop"() : () -> ()
    %cst_13 = arith.constant dense<0xFF800000> : vector<8x8xf32>
    %22 = vector.multi_reduction <maximumf>, %21, %cst_13 [2] : vector<8x8x8xf32> to vector<8x8xf32>
    %23 = vector.shape_cast %22 : vector<8x8xf32> to vector<8x8x1xf32>
    %24 = vector.broadcast %23 : vector<8x8x1xf32> to vector<8x8x8xf32>
    %25 = arith.subf %21, %24 : vector<8x8x8xf32>
    %26 = math.exp %25 : vector<8x8x8xf32>
    %cst_14 = arith.constant dense<0.000000e+00> : vector<8x8xf32>
    %27 = vector.multi_reduction <add>, %26, %cst_14 [2] : vector<8x8x8xf32> to vector<8x8xf32>
    %28 = vector.shape_cast %27 : vector<8x8xf32> to vector<8x8x1xf32>
    %29 = tpu.reciprocal %28 {approx = true} : vector<8x8x1xf32> -> vector<8x8x1xf32>
    %30 = vector.broadcast %29 : vector<8x8x1xf32> to vector<8x8x8xf32>
    %31 = arith.mulf %26, %30 : vector<8x8x8xf32>
    "tpu.trace_start"() <{level = 10 : i32, message = "bqk,bkd->bqd"}> : () -> ()
    %cst_15 = arith.constant dense<0.000000e+00> : vector<8x8x16xf32>
    %32 = tpu.matmul %31, %20, %cst_15 {dimension_numbers = #tpu.dot_dimension_numbers<[2], [1], [1], [2], [0, 0, 0, 1, 1, 2], [0], [0]>} : vector<8x8x8xf32>, vector<8x8x16xf32>, vector<8x8x16xf32> -> vector<8x8x16xf32>
    "tpu.trace_stop"() : () -> ()
    %33 = vector.extract_strided_slice %14 {offsets = [0, 16], sizes = [64, 16], strides = [1, 1]} : vector<64x96xf32> to vector<64x16xf32>
    %34 = vector.shape_cast %33 : vector<64x16xf32> to vector<8x8x16xf32>
    %35 = vector.extract_strided_slice %14 {offsets = [0, 48], sizes = [64, 16], strides = [1, 1]} : vector<64x96xf32> to vector<64x16xf32>
    %36 = vector.shape_cast %35 : vector<64x16xf32> to vector<8x8x16xf32>
    %37 = vector.extract_strided_slice %14 {offsets = [0, 80], sizes = [64, 16], strides = [1, 1]} : vector<64x96xf32> to vector<64x16xf32>
    %38 = vector.shape_cast %37 : vector<64x16xf32> to vector<8x8x16xf32>
    "tpu.trace_start"() <{level = 10 : i32, message = "bqd,bkd->bqk"}> : () -> ()
    %cst_16 = arith.constant dense<0.000000e+00> : vector<8x8x8xf32>
    %39 = tpu.matmul %34, %36, %cst_16 {dimension_numbers = #tpu.dot_dimension_numbers<[2], [2], [1], [1], [0, 0, 0, 1, 1, 1], [0], [0]>} : vector<8x8x16xf32>, vector<8x8x16xf32>, vector<8x8x8xf32> -> vector<8x8x8xf32>
    "tpu.trace_stop"() : () -> ()
    %cst_17 = arith.constant dense<0xFF800000> : vector<8x8xf32>
    %40 = vector.multi_reduction <maximumf>, %39, %cst_17 [2] : vector<8x8x8xf32> to vector<8x8xf32>
    %41 = vector.shape_cast %40 : vector<8x8xf32> to vector<8x8x1xf32>
    %42 = vector.broadcast %41 : vector<8x8x1xf32> to vector<8x8x8xf32>
    %43 = arith.subf %39, %42 : vector<8x8x8xf32>
    %44 = math.exp %43 : vector<8x8x8xf32>
    %cst_18 = arith.constant dense<0.000000e+00> : vector<8x8xf32>
    %45 = vector.multi_reduction <add>, %44, %cst_18 [2] : vector<8x8x8xf32> to vector<8x8xf32>
    %46 = vector.shape_cast %45 : vector<8x8xf32> to vector<8x8x1xf32>
    %47 = tpu.reciprocal %46 {approx = true} : vector<8x8x1xf32> -> vector<8x8x1xf32>
    %48 = vector.broadcast %47 : vector<8x8x1xf32> to vector<8x8x8xf32>
    %49 = arith.mulf %44, %48 : vector<8x8x8xf32>
    "tpu.trace_start"() <{level = 10 : i32, message = "bqk,bkd->bqd"}> : () -> ()
    %cst_19 = arith.constant dense<0.000000e+00> : vector<8x8x16xf32>
    %50 = tpu.matmul %49, %38, %cst_19 {dimension_numbers = #tpu.dot_dimension_numbers<[2], [1], [1], [2], [0, 0, 0, 1, 1, 2], [0], [0]>} : vector<8x8x8xf32>, vector<8x8x16xf32>, vector<8x8x16xf32> -> vector<8x8x16xf32>
    "tpu.trace_stop"() : () -> ()
    %51 = tpu.concatenate %32, %50 in 2 : vector<8x8x16xf32>, vector<8x8x16xf32> -> vector<8x8x32xf32>
    %52 = vector.shape_cast %51 : vector<8x8x32xf32> to vector<64x32xf32>
    %c0_20 = arith.constant 0 : index
    %c0_21 = arith.constant 0 : index
    %c0_22 = arith.constant 0 : index
    %53 = vector.load %arg6[%c0_20, %c0_21, %c0_22] : memref<2x32x32xbf16, #tpu.memory_space<vmem>>, vector<1x32x32xbf16>
    %54 = vector.shape_cast %53 : vector<1x32x32xbf16> to vector<32x32xbf16>
    %55 = arith.truncf %52 : vector<64x32xf32> to vector<64x32xbf16>
    %cst_23 = arith.constant dense<0.000000e+00> : vector<64x32xf32>
    %56 = tpu.matmul %55, %54, %cst_23 {dimension_numbers = #tpu.dot_dimension_numbers<[1], [0], [0], [1], [0, 0, 1, 1], [], []>} : vector<64x32xbf16>, vector<32x32xbf16>, vector<64x32xf32> -> vector<64x32xf32>
    %c0_24 = arith.constant 0 : index
    %c0_25 = arith.constant 0 : index
    %c0_26 = arith.constant 0 : index
    %57 = vector.load %arg7[%c0_24, %c0_25, %c0_26] : memref<2x1x32xf32, #tpu.memory_space<vmem>>, vector<1x1x32xf32>
    %58 = vector.shape_cast %57 : vector<1x1x32xf32> to vector<1x32xf32>
    %59 = vector.broadcast %58 : vector<1x32xf32> to vector<64x32xf32>
    %60 = arith.addf %56, %59 : vector<64x32xf32>
    %61 = arith.addf %6, %60 : vector<64x32xf32>
    %c0_27 = arith.constant 0 : index
    %c0_28 = arith.constant 0 : index
    %c0_29 = arith.constant 0 : index
    %62 = vector.load %arg12[%c0_27, %c0_28, %c0_29] : memref<2x1x32xf32, #tpu.memory_space<vmem>>, vector<1x1x32xf32>
    %63 = vector.shape_cast %62 : vector<1x1x32xf32> to vector<1x32xf32>
    %c0_30 = arith.constant 0 : index
    %c0_31 = arith.constant 0 : index
    %c0_32 = arith.constant 0 : index
    %64 = vector.load %arg13[%c0_30, %c0_31, %c0_32] : memref<2x1x32xf32, #tpu.memory_space<vmem>>, vector<1x1x32xf32>
    %65 = vector.shape_cast %64 : vector<1x1x32xf32> to vector<1x32xf32>
    %cst_33 = arith.constant dense<0.000000e+00> : vector<64xf32>
    %66 = vector.multi_reduction <add>, %61, %cst_33 [1] : vector<64x32xf32> to vector<64xf32>
    %67 = vector.shape_cast %66 : vector<64xf32> to vector<64x1xf32>
    %cst_34 = arith.constant 3.200000e+01 : f32
    %68 = vector.broadcast %cst_34 : f32 to vector<64x1xf32>
    %69 = arith.divf %67, %68 : vector<64x1xf32>
    %70 = vector.broadcast %69 : vector<64x1xf32> to vector<64x32xf32>
    %71 = arith.subf %61, %70 : vector<64x32xf32>
    %72 = arith.mulf %71, %71 : vector<64x32xf32>
    %cst_35 = arith.constant dense<0.000000e+00> : vector<64xf32>
    %73 = vector.multi_reduction <add>, %72, %cst_35 [1] : vector<64x32xf32> to vector<64xf32>
    %74 = vector.shape_cast %73 : vector<64xf32> to vector<64x1xf32>
    %cst_36 = arith.constant 3.200000e+01 : f32
    %75 = vector.broadcast %cst_36 : f32 to vector<64x1xf32>
    %76 = arith.divf %74, %75 : vector<64x1xf32>
    %77 = vector.broadcast %69 : vector<64x1xf32> to vector<64x32xf32>
    %78 = arith.subf %61, %77 : vector<64x32xf32>
    %cst_37 = arith.constant 9.99999974E-6 : f32
    %79 = vector.broadcast %cst_37 : f32 to vector<64x1xf32>
    %80 = arith.addf %76, %79 : vector<64x1xf32>
    %81 = math.rsqrt %80 : vector<64x1xf32>
    %82 = vector.broadcast %81 : vector<64x1xf32> to vector<64x32xf32>
    %83 = arith.mulf %78, %82 : vector<64x32xf32>
    %84 = vector.broadcast %63 : vector<1x32xf32> to vector<64x32xf32>
    %85 = arith.mulf %83, %84 : vector<64x32xf32>
    %86 = vector.broadcast %65 : vector<1x32xf32> to vector<64x32xf32>
    %87 = arith.addf %85, %86 : vector<64x32xf32>
    %c0_38 = arith.constant 0 : index
    %c0_39 = arith.constant 0 : index
    %c0_40 = arith.constant 0 : index
    %88 = vector.load %arg8[%c0_38, %c0_39, %c0_40] : memref<2x32x128xbf16, #tpu.memory_space<vmem>>, vector<1x32x128xbf16>
    %89 = vector.shape_cast %88 : vector<1x32x128xbf16> to vector<32x128xbf16>
    %90 = arith.truncf %87 : vector<64x32xf32> to vector<64x32xbf16>
    %cst_41 = arith.constant dense<0.000000e+00> : vector<64x128xf32>
    %91 = tpu.matmul %90, %89, %cst_41 {dimension_numbers = #tpu.dot_dimension_numbers<[1], [0], [0], [1], [0, 0, 1, 1], [], []>} : vector<64x32xbf16>, vector<32x128xbf16>, vector<64x128xf32> -> vector<64x128xf32>
    %c0_42 = arith.constant 0 : index
    %c0_43 = arith.constant 0 : index
    %c0_44 = arith.constant 0 : index
    %92 = vector.load %arg9[%c0_42, %c0_43, %c0_44] : memref<2x1x128xf32, #tpu.memory_space<vmem>>, vector<1x1x128xf32>
    %93 = vector.shape_cast %92 : vector<1x1x128xf32> to vector<1x128xf32>
    %94 = vector.broadcast %93 : vector<1x128xf32> to vector<64x128xf32>
    %95 = arith.addf %91, %94 : vector<64x128xf32>
    %cst_45 = arith.constant 0.000000e+00 : f32
    %96 = vector.broadcast %cst_45 : f32 to vector<64x128xf32>
    %97 = arith.maximumf %95, %96 : vector<64x128xf32>
    %c0_46 = arith.constant 0 : index
    %c0_47 = arith.constant 0 : index
    %c0_48 = arith.constant 0 : index
    %98 = vector.load %arg10[%c0_46, %c0_47, %c0_48] : memref<2x128x32xbf16, #tpu.memory_space<vmem>>, vector<1x128x32xbf16>
    %99 = vector.shape_cast %98 : vector<1x128x32xbf16> to vector<128x32xbf16>
    %100 = arith.truncf %97 : vector<64x128xf32> to vector<64x128xbf16>
    %cst_49 = arith.constant dense<0.000000e+00> : vector<64x32xf32>
    %101 = tpu.matmul %100, %99, %cst_49 {dimension_numbers = #tpu.dot_dimension_numbers<[1], [0], [0], [1], [0, 0, 1, 1], [], []>} : vector<64x128xbf16>, vector<128x32xbf16>, vector<64x32xf32> -> vector<64x32xf32>
    %c0_50 = arith.constant 0 : index
    %c0_51 = arith.constant 0 : index
    %c0_52 = arith.constant 0 : index
    %102 = vector.load %arg11[%c0_50, %c0_51, %c0_52] : memref<2x1x32xf32, #tpu.memory_space<vmem>>, vector<1x1x32xf32>
    %103 = vector.shape_cast %102 : vector<1x1x32xf32> to vector<1x32xf32>
    %104 = vector.broadcast %103 : vector<1x32xf32> to vector<64x32xf32>
    %105 = arith.addf %101, %104 : vector<64x32xf32>
    %106 = arith.addf %87, %105 : vector<64x32xf32>
    %c0_53 = arith.constant 0 : index
    %c0_54 = arith.constant 0 : index
    %c0_55 = arith.constant 0 : index
    %107 = vector.load %arg14[%c0_53, %c0_54, %c0_55] : memref<2x1x32xf32, #tpu.memory_space<vmem>>, vector<1x1x32xf32>
    %108 = vector.shape_cast %107 : vector<1x1x32xf32> to vector<1x32xf32>
    %c0_56 = arith.constant 0 : index
    %c0_57 = arith.constant 0 : index
    %c0_58 = arith.constant 0 : index
    %109 = vector.load %arg15[%c0_56, %c0_57, %c0_58] : memref<2x1x32xf32, #tpu.memory_space<vmem>>, vector<1x1x32xf32>
    %110 = vector.shape_cast %109 : vector<1x1x32xf32> to vector<1x32xf32>
    %cst_59 = arith.constant dense<0.000000e+00> : vector<64xf32>
    %111 = vector.multi_reduction <add>, %106, %cst_59 [1] : vector<64x32xf32> to vector<64xf32>
    %112 = vector.shape_cast %111 : vector<64xf32> to vector<64x1xf32>
    %cst_60 = arith.constant 3.200000e+01 : f32
    %113 = vector.broadcast %cst_60 : f32 to vector<64x1xf32>
    %114 = arith.divf %112, %113 : vector<64x1xf32>
    %115 = vector.broadcast %114 : vector<64x1xf32> to vector<64x32xf32>
    %116 = arith.subf %106, %115 : vector<64x32xf32>
    %117 = arith.mulf %116, %116 : vector<64x32xf32>
    %cst_61 = arith.constant dense<0.000000e+00> : vector<64xf32>
    %118 = vector.multi_reduction <add>, %117, %cst_61 [1] : vector<64x32xf32> to vector<64xf32>
    %119 = vector.shape_cast %118 : vector<64xf32> to vector<64x1xf32>
    %cst_62 = arith.constant 3.200000e+01 : f32
    %120 = vector.broadcast %cst_62 : f32 to vector<64x1xf32>
    %121 = arith.divf %119, %120 : vector<64x1xf32>
    %122 = vector.broadcast %114 : vector<64x1xf32> to vector<64x32xf32>
    %123 = arith.subf %106, %122 : vector<64x32xf32>
    %cst_63 = arith.constant 9.99999974E-6 : f32
    %124 = vector.broadcast %cst_63 : f32 to vector<64x1xf32>
    %125 = arith.addf %121, %124 : vector<64x1xf32>
    %126 = math.rsqrt %125 : vector<64x1xf32>
    %127 = vector.broadcast %126 : vector<64x1xf32> to vector<64x32xf32>
    %128 = arith.mulf %123, %127 : vector<64x32xf32>
    %129 = vector.broadcast %108 : vector<1x32xf32> to vector<64x32xf32>
    %130 = arith.mulf %128, %129 : vector<64x32xf32>
    %131 = vector.broadcast %110 : vector<1x32xf32> to vector<64x32xf32>
    %132 = arith.addf %130, %131 : vector<64x32xf32>
    %c1 = arith.constant 1 : index
    %c0_64 = arith.constant 0 : index
    %c0_65 = arith.constant 0 : index
    %133 = vector.load %arg4[%c1, %c0_64, %c0_65] : memref<2x32x96xbf16, #tpu.memory_space<vmem>>, vector<1x32x96xbf16>
    %134 = vector.shape_cast %133 : vector<1x32x96xbf16> to vector<32x96xbf16>
    %135 = arith.truncf %132 : vector<64x32xf32> to vector<64x32xbf16>
    %cst_66 = arith.constant dense<0.000000e+00> : vector<64x96xf32>
    %136 = tpu.matmul %135, %134, %cst_66 {dimension_numbers = #tpu.dot_dimension_numbers<[1], [0], [0], [1], [0, 0, 1, 1], [], []>} : vector<64x32xbf16>, vector<32x96xbf16>, vector<64x96xf32> -> vector<64x96xf32>
    %c1_67 = arith.constant 1 : index
    %c0_68 = arith.constant 0 : index
    %c0_69 = arith.constant 0 : index
    %137 = vector.load %arg5[%c1_67, %c0_68, %c0_69] : memref<2x1x96xf32, #tpu.memory_space<vmem>>, vector<1x1x96xf32>
    %138 = vector.shape_cast %137 : vector<1x1x96xf32> to vector<1x96xf32>
    %139 = vector.broadcast %138 : vector<1x96xf32> to vector<64x96xf32>
    %140 = arith.addf %136, %139 : vector<64x96xf32>
    %141 = vector.extract_strided_slice %140 {offsets = [0, 0], sizes = [64, 16], strides = [1, 1]} : vector<64x96xf32> to vector<64x16xf32>
    %142 = vector.shape_cast %141 : vector<64x16xf32> to vector<8x8x16xf32>
    %143 = vector.extract_strided_slice %140 {offsets = [0, 32], sizes = [64, 16], strides = [1, 1]} : vector<64x96xf32> to vector<64x16xf32>
    %144 = vector.shape_cast %143 : vector<64x16xf32> to vector<8x8x16xf32>
    %145 = vector.extract_strided_slice %140 {offsets = [0, 64], sizes = [64, 16], strides = [1, 1]} : vector<64x96xf32> to vector<64x16xf32>
    %146 = vector.shape_cast %145 : vector<64x16xf32> to vector<8x8x16xf32>
    "tpu.trace_start"() <{level = 10 : i32, message = "bqd,bkd->bqk"}> : () -> ()
    %cst_70 = arith.constant dense<0.000000e+00> : vector<8x8x8xf32>
    %147 = tpu.matmul %142, %144, %cst_70 {dimension_numbers = #tpu.dot_dimension_numbers<[2], [2], [1], [1], [0, 0, 0, 1, 1, 1], [0], [0]>} : vector<8x8x16xf32>, vector<8x8x16xf32>, vector<8x8x8xf32> -> vector<8x8x8xf32>
    "tpu.trace_stop"() : () -> ()
    %cst_71 = arith.constant dense<0xFF800000> : vector<8x8xf32>
    %148 = vector.multi_reduction <maximumf>, %147, %cst_71 [2] : vector<8x8x8xf32> to vector<8x8xf32>
    %149 = vector.shape_cast %148 : vector<8x8xf32> to vector<8x8x1xf32>
    %150 = vector.broadcast %149 : vector<8x8x1xf32> to vector<8x8x8xf32>
    %151 = arith.subf %147, %150 : vector<8x8x8xf32>
    %152 = math.exp %151 : vector<8x8x8xf32>
    %cst_72 = arith.constant dense<0.000000e+00> : vector<8x8xf32>
    %153 = vector.multi_reduction <add>, %152, %cst_72 [2] : vector<8x8x8xf32> to vector<8x8xf32>
    %154 = vector.shape_cast %153 : vector<8x8xf32> to vector<8x8x1xf32>
    %155 = tpu.reciprocal %154 {approx = true} : vector<8x8x1xf32> -> vector<8x8x1xf32>
    %156 = vector.broadcast %155 : vector<8x8x1xf32> to vector<8x8x8xf32>
    %157 = arith.mulf %152, %156 : vector<8x8x8xf32>
    "tpu.trace_start"() <{level = 10 : i32, message = "bqk,bkd->bqd"}> : () -> ()
    %cst_73 = arith.constant dense<0.000000e+00> : vector<8x8x16xf32>
    %158 = tpu.matmul %157, %146, %cst_73 {dimension_numbers = #tpu.dot_dimension_numbers<[2], [1], [1], [2], [0, 0, 0, 1, 1, 2], [0], [0]>} : vector<8x8x8xf32>, vector<8x8x16xf32>, vector<8x8x16xf32> -> vector<8x8x16xf32>
    "tpu.trace_stop"() : () -> ()
    %159 = vector.extract_strided_slice %140 {offsets = [0, 16], sizes = [64, 16], strides = [1, 1]} : vector<64x96xf32> to vector<64x16xf32>
    %160 = vector.shape_cast %159 : vector<64x16xf32> to vector<8x8x16xf32>
    %161 = vector.extract_strided_slice %140 {offsets = [0, 48], sizes = [64, 16], strides = [1, 1]} : vector<64x96xf32> to vector<64x16xf32>
    %162 = vector.shape_cast %161 : vector<64x16xf32> to vector<8x8x16xf32>
    %163 = vector.extract_strided_slice %140 {offsets = [0, 80], sizes = [64, 16], strides = [1, 1]} : vector<64x96xf32> to vector<64x16xf32>
    %164 = vector.shape_cast %163 : vector<64x16xf32> to vector<8x8x16xf32>
    "tpu.trace_start"() <{level = 10 : i32, message = "bqd,bkd->bqk"}> : () -> ()
    %cst_74 = arith.constant dense<0.000000e+00> : vector<8x8x8xf32>
    %165 = tpu.matmul %160, %162, %cst_74 {dimension_numbers = #tpu.dot_dimension_numbers<[2], [2], [1], [1], [0, 0, 0, 1, 1, 1], [0], [0]>} : vector<8x8x16xf32>, vector<8x8x16xf32>, vector<8x8x8xf32> -> vector<8x8x8xf32>
    "tpu.trace_stop"() : () -> ()
    %cst_75 = arith.constant dense<0xFF800000> : vector<8x8xf32>
    %166 = vector.multi_reduction <maximumf>, %165, %cst_75 [2] : vector<8x8x8xf32> to vector<8x8xf32>
    %167 = vector.shape_cast %166 : vector<8x8xf32> to vector<8x8x1xf32>
    %168 = vector.broadcast %167 : vector<8x8x1xf32> to vector<8x8x8xf32>
    %169 = arith.subf %165, %168 : vector<8x8x8xf32>
    %170 = math.exp %169 : vector<8x8x8xf32>
    %cst_76 = arith.constant dense<0.000000e+00> : vector<8x8xf32>
    %171 = vector.multi_reduction <add>, %170, %cst_76 [2] : vector<8x8x8xf32> to vector<8x8xf32>
    %172 = vector.shape_cast %171 : vector<8x8xf32> to vector<8x8x1xf32>
    %173 = tpu.reciprocal %172 {approx = true} : vector<8x8x1xf32> -> vector<8x8x1xf32>
    %174 = vector.broadcast %173 : vector<8x8x1xf32> to vector<8x8x8xf32>
    %175 = arith.mulf %170, %174 : vector<8x8x8xf32>
    "tpu.trace_start"() <{level = 10 : i32, message = "bqk,bkd->bqd"}> : () -> ()
    %cst_77 = arith.constant dense<0.000000e+00> : vector<8x8x16xf32>
    %176 = tpu.matmul %175, %164, %cst_77 {dimension_numbers = #tpu.dot_dimension_numbers<[2], [1], [1], [2], [0, 0, 0, 1, 1, 2], [0], [0]>} : vector<8x8x8xf32>, vector<8x8x16xf32>, vector<8x8x16xf32> -> vector<8x8x16xf32>
    "tpu.trace_stop"() : () -> ()
    %177 = tpu.concatenate %158, %176 in 2 : vector<8x8x16xf32>, vector<8x8x16xf32> -> vector<8x8x32xf32>
    %178 = vector.shape_cast %177 : vector<8x8x32xf32> to vector<64x32xf32>
    %c1_78 = arith.constant 1 : index
    %c0_79 = arith.constant 0 : index
    %c0_80 = arith.constant 0 : index
    %179 = vector.load %arg6[%c1_78, %c0_79, %c0_80] : memref<2x32x32xbf16, #tpu.memory_space<vmem>>, vector<1x32x32xbf16>
    %180 = vector.shape_cast %179 : vector<1x32x32xbf16> to vector<32x32xbf16>
    %181 = arith.truncf %178 : vector<64x32xf32> to vector<64x32xbf16>
    %cst_81 = arith.constant dense<0.000000e+00> : vector<64x32xf32>
    %182 = tpu.matmul %181, %180, %cst_81 {dimension_numbers = #tpu.dot_dimension_numbers<[1], [0], [0], [1], [0, 0, 1, 1], [], []>} : vector<64x32xbf16>, vector<32x32xbf16>, vector<64x32xf32> -> vector<64x32xf32>
    %c1_82 = arith.constant 1 : index
    %c0_83 = arith.constant 0 : index
    %c0_84 = arith.constant 0 : index
    %183 = vector.load %arg7[%c1_82, %c0_83, %c0_84] : memref<2x1x32xf32, #tpu.memory_space<vmem>>, vector<1x1x32xf32>
    %184 = vector.shape_cast %183 : vector<1x1x32xf32> to vector<1x32xf32>
    %185 = vector.broadcast %184 : vector<1x32xf32> to vector<64x32xf32>
    %186 = arith.addf %182, %185 : vector<64x32xf32>
    %187 = arith.addf %132, %186 : vector<64x32xf32>
    %c1_85 = arith.constant 1 : index
    %c0_86 = arith.constant 0 : index
    %c0_87 = arith.constant 0 : index
    %188 = vector.load %arg12[%c1_85, %c0_86, %c0_87] : memref<2x1x32xf32, #tpu.memory_space<vmem>>, vector<1x1x32xf32>
    %189 = vector.shape_cast %188 : vector<1x1x32xf32> to vector<1x32xf32>
    %c1_88 = arith.constant 1 : index
    %c0_89 = arith.constant 0 : index
    %c0_90 = arith.constant 0 : index
    %190 = vector.load %arg13[%c1_88, %c0_89, %c0_90] : memref<2x1x32xf32, #tpu.memory_space<vmem>>, vector<1x1x32xf32>
    %191 = vector.shape_cast %190 : vector<1x1x32xf32> to vector<1x32xf32>
    %cst_91 = arith.constant dense<0.000000e+00> : vector<64xf32>
    %192 = vector.multi_reduction <add>, %187, %cst_91 [1] : vector<64x32xf32> to vector<64xf32>
    %193 = vector.shape_cast %192 : vector<64xf32> to vector<64x1xf32>
    %cst_92 = arith.constant 3.200000e+01 : f32
    %194 = vector.broadcast %cst_92 : f32 to vector<64x1xf32>
    %195 = arith.divf %193, %194 : vector<64x1xf32>
    %196 = vector.broadcast %195 : vector<64x1xf32> to vector<64x32xf32>
    %197 = arith.subf %187, %196 : vector<64x32xf32>
    %198 = arith.mulf %197, %197 : vector<64x32xf32>
    %cst_93 = arith.constant dense<0.000000e+00> : vector<64xf32>
    %199 = vector.multi_reduction <add>, %198, %cst_93 [1] : vector<64x32xf32> to vector<64xf32>
    %200 = vector.shape_cast %199 : vector<64xf32> to vector<64x1xf32>
    %cst_94 = arith.constant 3.200000e+01 : f32
    %201 = vector.broadcast %cst_94 : f32 to vector<64x1xf32>
    %202 = arith.divf %200, %201 : vector<64x1xf32>
    %203 = vector.broadcast %195 : vector<64x1xf32> to vector<64x32xf32>
    %204 = arith.subf %187, %203 : vector<64x32xf32>
    %cst_95 = arith.constant 9.99999974E-6 : f32
    %205 = vector.broadcast %cst_95 : f32 to vector<64x1xf32>
    %206 = arith.addf %202, %205 : vector<64x1xf32>
    %207 = math.rsqrt %206 : vector<64x1xf32>
    %208 = vector.broadcast %207 : vector<64x1xf32> to vector<64x32xf32>
    %209 = arith.mulf %204, %208 : vector<64x32xf32>
    %210 = vector.broadcast %189 : vector<1x32xf32> to vector<64x32xf32>
    %211 = arith.mulf %209, %210 : vector<64x32xf32>
    %212 = vector.broadcast %191 : vector<1x32xf32> to vector<64x32xf32>
    %213 = arith.addf %211, %212 : vector<64x32xf32>
    %c1_96 = arith.constant 1 : index
    %c0_97 = arith.constant 0 : index
    %c0_98 = arith.constant 0 : index
    %214 = vector.load %arg8[%c1_96, %c0_97, %c0_98] : memref<2x32x128xbf16, #tpu.memory_space<vmem>>, vector<1x32x128xbf16>
    %215 = vector.shape_cast %214 : vector<1x32x128xbf16> to vector<32x128xbf16>
    %216 = arith.truncf %213 : vector<64x32xf32> to vector<64x32xbf16>
    %cst_99 = arith.constant dense<0.000000e+00> : vector<64x128xf32>
    %217 = tpu.matmul %216, %215, %cst_99 {dimension_numbers = #tpu.dot_dimension_numbers<[1], [0], [0], [1], [0, 0, 1, 1], [], []>} : vector<64x32xbf16>, vector<32x128xbf16>, vector<64x128xf32> -> vector<64x128xf32>
    %c1_100 = arith.constant 1 : index
    %c0_101 = arith.constant 0 : index
    %c0_102 = arith.constant 0 : index
    %218 = vector.load %arg9[%c1_100, %c0_101, %c0_102] : memref<2x1x128xf32, #tpu.memory_space<vmem>>, vector<1x1x128xf32>
    %219 = vector.shape_cast %218 : vector<1x1x128xf32> to vector<1x128xf32>
    %220 = vector.broadcast %219 : vector<1x128xf32> to vector<64x128xf32>
    %221 = arith.addf %217, %220 : vector<64x128xf32>
    %cst_103 = arith.constant 0.000000e+00 : f32
    %222 = vector.broadcast %cst_103 : f32 to vector<64x128xf32>
    %223 = arith.maximumf %221, %222 : vector<64x128xf32>
    %c1_104 = arith.constant 1 : index
    %c0_105 = arith.constant 0 : index
    %c0_106 = arith.constant 0 : index
    %224 = vector.load %arg10[%c1_104, %c0_105, %c0_106] : memref<2x128x32xbf16, #tpu.memory_space<vmem>>, vector<1x128x32xbf16>
    %225 = vector.shape_cast %224 : vector<1x128x32xbf16> to vector<128x32xbf16>
    %226 = arith.truncf %223 : vector<64x128xf32> to vector<64x128xbf16>
    %cst_107 = arith.constant dense<0.000000e+00> : vector<64x32xf32>
    %227 = tpu.matmul %226, %225, %cst_107 {dimension_numbers = #tpu.dot_dimension_numbers<[1], [0], [0], [1], [0, 0, 1, 1], [], []>} : vector<64x128xbf16>, vector<128x32xbf16>, vector<64x32xf32> -> vector<64x32xf32>
    %c1_108 = arith.constant 1 : index
    %c0_109 = arith.constant 0 : index
    %c0_110 = arith.constant 0 : index
    %228 = vector.load %arg11[%c1_108, %c0_109, %c0_110] : memref<2x1x32xf32, #tpu.memory_space<vmem>>, vector<1x1x32xf32>
    %229 = vector.shape_cast %228 : vector<1x1x32xf32> to vector<1x32xf32>
    %230 = vector.broadcast %229 : vector<1x32xf32> to vector<64x32xf32>
    %231 = arith.addf %227, %230 : vector<64x32xf32>
    %232 = arith.addf %213, %231 : vector<64x32xf32>
    %c1_111 = arith.constant 1 : index
    %c0_112 = arith.constant 0 : index
    %c0_113 = arith.constant 0 : index
    %233 = vector.load %arg14[%c1_111, %c0_112, %c0_113] : memref<2x1x32xf32, #tpu.memory_space<vmem>>, vector<1x1x32xf32>
    %234 = vector.shape_cast %233 : vector<1x1x32xf32> to vector<1x32xf32>
    %c1_114 = arith.constant 1 : index
    %c0_115 = arith.constant 0 : index
    %c0_116 = arith.constant 0 : index
    %235 = vector.load %arg15[%c1_114, %c0_115, %c0_116] : memref<2x1x32xf32, #tpu.memory_space<vmem>>, vector<1x1x32xf32>
    %236 = vector.shape_cast %235 : vector<1x1x32xf32> to vector<1x32xf32>
    %cst_117 = arith.constant dense<0.000000e+00> : vector<64xf32>
    %237 = vector.multi_reduction <add>, %232, %cst_117 [1] : vector<64x32xf32> to vector<64xf32>
    %238 = vector.shape_cast %237 : vector<64xf32> to vector<64x1xf32>
    %cst_118 = arith.constant 3.200000e+01 : f32
    %239 = vector.broadcast %cst_118 : f32 to vector<64x1xf32>
    %240 = arith.divf %238, %239 : vector<64x1xf32>
    %241 = vector.broadcast %240 : vector<64x1xf32> to vector<64x32xf32>
    %242 = arith.subf %232, %241 : vector<64x32xf32>
    %243 = arith.mulf %242, %242 : vector<64x32xf32>
    %cst_119 = arith.constant dense<0.000000e+00> : vector<64xf32>
    %244 = vector.multi_reduction <add>, %243, %cst_119 [1] : vector<64x32xf32> to vector<64xf32>
    %245 = vector.shape_cast %244 : vector<64xf32> to vector<64x1xf32>
    %cst_120 = arith.constant 3.200000e+01 : f32
    %246 = vector.broadcast %cst_120 : f32 to vector<64x1xf32>
    %247 = arith.divf %245, %246 : vector<64x1xf32>
    %248 = vector.broadcast %240 : vector<64x1xf32> to vector<64x32xf32>
    %249 = arith.subf %232, %248 : vector<64x32xf32>
    %cst_121 = arith.constant 9.99999974E-6 : f32
    %250 = vector.broadcast %cst_121 : f32 to vector<64x1xf32>
    %251 = arith.addf %247, %250 : vector<64x1xf32>
    %252 = math.rsqrt %251 : vector<64x1xf32>
    %253 = vector.broadcast %252 : vector<64x1xf32> to vector<64x32xf32>
    %254 = arith.mulf %249, %253 : vector<64x32xf32>
    %255 = vector.broadcast %234 : vector<1x32xf32> to vector<64x32xf32>
    %256 = arith.mulf %254, %255 : vector<64x32xf32>
    %257 = vector.broadcast %236 : vector<1x32xf32> to vector<64x32xf32>
    %258 = arith.addf %256, %257 : vector<64x32xf32>
    %259 = vector.shape_cast %258 : vector<64x32xf32> to vector<8x8x32xf32>
    %cst_122 = arith.constant dense<0.000000e+00> : vector<8x32xf32>
    %260 = vector.multi_reduction <add>, %259, %cst_122 [1] : vector<8x8x32xf32> to vector<8x32xf32>
    %cst_123 = arith.constant 8.000000e+00 : f32
    %261 = vector.broadcast %cst_123 : f32 to vector<8x32xf32>
    %262 = arith.divf %260, %261 : vector<8x32xf32>
    %c0_124 = arith.constant 0 : index
    %c0_125 = arith.constant 0 : index
    %263 = vector.load %arg16[%c0_124, %c0_125] : memref<32x32xbf16, #tpu.memory_space<vmem>>, vector<32x32xbf16>
    %264 = arith.truncf %262 : vector<8x32xf32> to vector<8x32xbf16>
    %cst_126 = arith.constant dense<0.000000e+00> : vector<8x32xf32>
    %265 = tpu.matmul %264, %263, %cst_126 {dimension_numbers = #tpu.dot_dimension_numbers<[1], [0], [0], [1], [0, 0, 1, 1], [], []>} : vector<8x32xbf16>, vector<32x32xbf16>, vector<8x32xf32> -> vector<8x32xf32>
    %c0_127 = arith.constant 0 : index
    %c0_128 = arith.constant 0 : index
    %266 = vector.load %arg17[%c0_127, %c0_128] : memref<1x32xf32, #tpu.memory_space<vmem>>, vector<1x32xf32>
    %267 = vector.broadcast %266 : vector<1x32xf32> to vector<8x32xf32>
    %268 = arith.addf %265, %267 : vector<8x32xf32>
    %c0_129 = arith.constant 0 : index
    %c0_130 = arith.constant 0 : index
    %269 = vector.load %arg18[%c0_129, %c0_130] : memref<1x32xf32, #tpu.memory_space<vmem>>, vector<1x32xf32>
    %c0_131 = arith.constant 0 : index
    %c0_132 = arith.constant 0 : index
    %270 = vector.load %arg19[%c0_131, %c0_132] : memref<1x32xf32, #tpu.memory_space<vmem>>, vector<1x32xf32>
    %cst_133 = arith.constant dense<0.000000e+00> : vector<8xf32>
    %271 = vector.multi_reduction <add>, %268, %cst_133 [1] : vector<8x32xf32> to vector<8xf32>
    %272 = vector.shape_cast %271 : vector<8xf32> to vector<8x1xf32>
    %cst_134 = arith.constant 3.200000e+01 : f32
    %273 = vector.broadcast %cst_134 : f32 to vector<8x1xf32>
    %274 = arith.divf %272, %273 : vector<8x1xf32>
    %275 = vector.broadcast %274 : vector<8x1xf32> to vector<8x32xf32>
    %276 = arith.subf %268, %275 : vector<8x32xf32>
    %277 = arith.mulf %276, %276 : vector<8x32xf32>
    %cst_135 = arith.constant dense<0.000000e+00> : vector<8xf32>
    %278 = vector.multi_reduction <add>, %277, %cst_135 [1] : vector<8x32xf32> to vector<8xf32>
    %279 = vector.shape_cast %278 : vector<8xf32> to vector<8x1xf32>
    %cst_136 = arith.constant 3.200000e+01 : f32
    %280 = vector.broadcast %cst_136 : f32 to vector<8x1xf32>
    %281 = arith.divf %279, %280 : vector<8x1xf32>
    %282 = vector.broadcast %274 : vector<8x1xf32> to vector<8x32xf32>
    %283 = arith.subf %268, %282 : vector<8x32xf32>
    %cst_137 = arith.constant 9.99999974E-6 : f32
    %284 = vector.broadcast %cst_137 : f32 to vector<8x1xf32>
    %285 = arith.addf %281, %284 : vector<8x1xf32>
    %286 = math.rsqrt %285 : vector<8x1xf32>
    %287 = vector.broadcast %286 : vector<8x1xf32> to vector<8x32xf32>
    %288 = arith.mulf %283, %287 : vector<8x32xf32>
    %289 = vector.broadcast %269 : vector<1x32xf32> to vector<8x32xf32>
    %290 = arith.mulf %288, %289 : vector<8x32xf32>
    %291 = vector.broadcast %270 : vector<1x32xf32> to vector<8x32xf32>
    %292 = arith.addf %290, %291 : vector<8x32xf32>
    %c0_138 = arith.constant 0 : index
    %c0_139 = arith.constant 0 : index
    %293 = vector.load %arg20[%c0_138, %c0_139] : memref<8x32xf32, #tpu.memory_space<vmem>>, vector<8x32xf32>
    tpu.vector_store %arg20[%c0_138, %c0_139], %292 {strides = array<i32>} : memref<8x32xf32, #tpu.memory_space<vmem>>, vector<8x32xf32>,
    return
  }
  func.func @transform_0(%arg0: i32) -> (i32, i32) {
    %c0_i32 = arith.constant 0 : i32
    %c0_i32_0 = arith.constant 0 : i32
    return %arg0, %c0_i32 : i32, i32
  }
  func.func @transform_1(%arg0: i32) -> (i32, i32) {
    %c0_i32 = arith.constant 0 : i32
    %c0_i32_0 = arith.constant 0 : i32
    %c0_i32_1 = arith.constant 0 : i32
    return %c0_i32, %c0_i32_0 : i32, i32
  }
  func.func @transform_2(%arg0: i32) -> (i32, i32) {
    %c0_i32 = arith.constant 0 : i32
    %c0_i32_0 = arith.constant 0 : i32
    %c0_i32_1 = arith.constant 0 : i32
    return %c0_i32, %c0_i32_0 : i32, i32
  }
  func.func @transform_3(%arg0: i32) -> (i32, i32, i32) {
    %c0_i32 = arith.constant 0 : i32
    %c0_i32_0 = arith.constant 0 : i32
    %c0_i32_1 = arith.constant 0 : i32
    %c0_i32_2 = arith.constant 0 : i32
    return %c0_i32, %c0_i32_0, %c0_i32_1 : i32, i32, i32
  }
  func.func @transform_4(%arg0: i32) -> (i32, i32, i32) {
    %c0_i32 = arith.constant 0 : i32
    %c0_i32_0 = arith.constant 0 : i32
    %c0_i32_1 = arith.constant 0 : i32
    %c0_i32_2 = arith.constant 0 : i32
    return %c0_i32, %c0_i32_0, %c0_i32_1 : i32, i32, i32
  }
  func.func @transform_5(%arg0: i32) -> (i32, i32, i32) {
    %c0_i32 = arith.constant 0 : i32
    %c0_i32_0 = arith.constant 0 : i32
    %c0_i32_1 = arith.constant 0 : i32
    %c0_i32_2 = arith.constant 0 : i32
    return %c0_i32, %c0_i32_0, %c0_i32_1 : i32, i32, i32
  }
  func.func @transform_6(%arg0: i32) -> (i32, i32, i32) {
    %c0_i32 = arith.constant 0 : i32
    %c0_i32_0 = arith.constant 0 : i32
    %c0_i32_1 = arith.constant 0 : i32
    %c0_i32_2 = arith.constant 0 : i32
    return %c0_i32, %c0_i32_0, %c0_i32_1 : i32, i32, i32
  }
  func.func @transform_7(%arg0: i32) -> (i32, i32, i32) {
    %c0_i32 = arith.constant 0 : i32
    %c0_i32_0 = arith.constant 0 : i32
    %c0_i32_1 = arith.constant 0 : i32
    %c0_i32_2 = arith.constant 0 : i32
    return %c0_i32, %c0_i32_0, %c0_i32_1 : i32, i32, i32
  }
  func.func @transform_8(%arg0: i32) -> (i32, i32, i32) {
    %c0_i32 = arith.constant 0 : i32
    %c0_i32_0 = arith.constant 0 : i32
    %c0_i32_1 = arith.constant 0 : i32
    %c0_i32_2 = arith.constant 0 : i32
    return %c0_i32, %c0_i32_0, %c0_i32_1 : i32, i32, i32
  }
  func.func @transform_9(%arg0: i32) -> (i32, i32, i32) {
    %c0_i32 = arith.constant 0 : i32
    %c0_i32_0 = arith.constant 0 : i32
    %c0_i32_1 = arith.constant 0 : i32
    %c0_i32_2 = arith.constant 0 : i32
    return %c0_i32, %c0_i32_0, %c0_i32_1 : i32, i32, i32
  }
  func.func @transform_10(%arg0: i32) -> (i32, i32, i32) {
    %c0_i32 = arith.constant 0 : i32
    %c0_i32_0 = arith.constant 0 : i32
    %c0_i32_1 = arith.constant 0 : i32
    %c0_i32_2 = arith.constant 0 : i32
    return %c0_i32, %c0_i32_0, %c0_i32_1 : i32, i32, i32
  }
  func.func @transform_11(%arg0: i32) -> (i32, i32, i32) {
    %c0_i32 = arith.constant 0 : i32
    %c0_i32_0 = arith.constant 0 : i32
    %c0_i32_1 = arith.constant 0 : i32
    %c0_i32_2 = arith.constant 0 : i32
    return %c0_i32, %c0_i32_0, %c0_i32_1 : i32, i32, i32
  }
  func.func @transform_12(%arg0: i32) -> (i32, i32, i32) {
    %c0_i32 = arith.constant 0 : i32
    %c0_i32_0 = arith.constant 0 : i32
    %c0_i32_1 = arith.constant 0 : i32
    %c0_i32_2 = arith.constant 0 : i32
    return %c0_i32, %c0_i32_0, %c0_i32_1 : i32, i32, i32
  }
  func.func @transform_13(%arg0: i32) -> (i32, i32, i32) {
    %c0_i32 = arith.constant 0 : i32
    %c0_i32_0 = arith.constant 0 : i32
    %c0_i32_1 = arith.constant 0 : i32
    %c0_i32_2 = arith.constant 0 : i32
    return %c0_i32, %c0_i32_0, %c0_i32_1 : i32, i32, i32
  }
  func.func @transform_14(%arg0: i32) -> (i32, i32, i32) {
    %c0_i32 = arith.constant 0 : i32
    %c0_i32_0 = arith.constant 0 : i32
    %c0_i32_1 = arith.constant 0 : i32
    %c0_i32_2 = arith.constant 0 : i32
    return %c0_i32, %c0_i32_0, %c0_i32_1 : i32, i32, i32
  }
  func.func @transform_15(%arg0: i32) -> (i32, i32) {
    %c0_i32 = arith.constant 0 : i32
    %c0_i32_0 = arith.constant 0 : i32
    %c0_i32_1 = arith.constant 0 : i32
    return %c0_i32, %c0_i32_0 : i32, i32
  }
  func.func @transform_16(%arg0: i32) -> (i32, i32) {
    %c0_i32 = arith.constant 0 : i32
    %c0_i32_0 = arith.constant 0 : i32
    %c0_i32_1 = arith.constant 0 : i32
    return %c0_i32, %c0_i32_0 : i32, i32
  }
  func.func @transform_17(%arg0: i32) -> (i32, i32) {
    %c0_i32 = arith.constant 0 : i32
    %c0_i32_0 = arith.constant 0 : i32
    %c0_i32_1 = arith.constant 0 : i32
    return %c0_i32, %c0_i32_0 : i32, i32
  }
  func.func @transform_18(%arg0: i32) -> (i32, i32) {
    %c0_i32 = arith.constant 0 : i32
    %c0_i32_0 = arith.constant 0 : i32
    %c0_i32_1 = arith.constant 0 : i32
    return %c0_i32, %c0_i32_0 : i32, i32
  }
  func.func @transform_19(%arg0: i32) -> (i32, i32) {
    %c0_i32 = arith.constant 0 : i32
    %c0_i32_0 = arith.constant 0 : i32
    return %arg0, %c0_i32 : i32, i32
  }
}

</mosaic_0001>

<bundles_post_ra>
// kernel: tpu_custom_call.1
= control target key start
LH: loop header
LB: loop body
LE: loop exit
PB: predicated region body
PF: predicated region fallthrough
CT: control target
= control target key end

     0   :  { %s10589_s0 = inlined_call_operand.vmem [shape: f32[128,8], index: 0, kind: input, shape index: {}]   ;;  %s10590_s1 = inlined_call_operand.vmem [shape: bf16[8,32], index: 1, kind: input, shape index: {}]   ;;  %s10591_s2 = inlined_call_operand.vmem [shape: f32[1,32], index: 2, kind: input, shape index: {}]   ;;  %s10592_s3 = inlined_call_operand.vmem [shape: bf16[2,32,96], index: 3, kind: input, shape index: {}]   ;;  %s10593_s4 = inlined_call_operand.vmem [shape: f32[2,1,96], index: 4, kind: input, shape index: {}]   ;;  %s10594_s5 = inlined_call_operand.vmem [shape: bf16[2,32,32], index: 5, kind: input, shape index: {}]   ;;  %s10595_s6 = inlined_call_operand.vmem [shape: f32[2,1,32], index: 6, kind: input, shape index: {}]   ;;  %s10596_s7 = inlined_call_operand.vmem [shape: bf16[2,32,128], index: 7, kind: input, shape index: {}]   ;;  %s10597_s8 = inlined_call_operand.vmem [shape: f32[2,1,128], index: 8, kind: input, shape index: {}]   ;;  %s10598_s9 = inlined_call_operand.vmem [shape: bf16[2,128,32], index: 9, kind: input, shape index: {}]   ;;  %s10599_s10 = inlined_call_operand.vmem [shape: f32[2,1,32], index: 10, kind: input, shape index: {}]   ;;  %s10600_s11 = inlined_call_operand.vmem [shape: f32[2,1,32], index: 11, kind: input, shape index: {}]   ;;  %s10601_s12 = inlined_call_operand.vmem [shape: f32[2,1,32], index: 12, kind: input, shape index: {}]   ;;  %s10602_s13 = inlined_call_operand.vmem [shape: f32[2,1,32], index: 13, kind: input, shape index: {}]   ;;  %s10603_s14 = inlined_call_operand.vmem [shape: f32[2,1,32], index: 14, kind: input, shape index: {}]   ;;  %s10604_s15 = inlined_call_operand.vmem [shape: bf16[32,32], index: 15, kind: input, shape index: {}]   ;;  %s10605_s16 = inlined_call_operand.vmem [shape: f32[1,32], index: 16, kind: input, shape index: {}]   ;;  %s10606_s17 = inlined_call_operand.vmem [shape: f32[1,32], index: 17, kind: input, shape index: {}]   ;;  %s10607_s18 = inlined_call_operand.vmem [shape: f32[1,32], index: 18, kind: input, shape index: {}]   ;;  %s10608_s19 = inlined_call_operand.hbm [shape: f32[16,32], index: 19, kind: output, shape index: {}]  }
   0x1   :  { %10625 = sst [smem:[#allocation8_spill]] %s10589_s0 }
   0x2   :  { %10626 = sst [smem:[#allocation9_spill]] %s10590_s1 }
   0x3   :  { %10627 = sst [smem:[#allocation10_spill]] %s10591_s2 }
   0x4   :  { %10628 = sst [smem:[#allocation11_spill]] %s10592_s3 }
   0x5   :  { %10629 = sst [smem:[#allocation12_spill]] %s10593_s4 }
   0x6   :  { %10630 = sst [smem:[#allocation13_spill]] %s10594_s5 }
   0x7   :  { %10631 = sst [smem:[#allocation14_spill]] %s10595_s6 }
   0x8   :  { %10632 = sst [smem:[#allocation15_spill]] %s10596_s7 }
   0x9   :  { %10633 = sst [smem:[#allocation16_spill]] %s10597_s8 }
   0xa   :  { %24 = vsyncpa [#allocation3], 0 }
   0xb   :  { %26 = vsyncpa [#allocation3 + $0x1], 0  ;;  %s9189_s0 = smov 0   ;;  %s9191_s30 = smov 0  }
   0xc   :  { %s9193_s20 = smov 0   ;;  %s9195_s21 = smov 0  }
   0xd LB: > { %10634 = sst [smem:[#allocation5_spill]] %s9074_s20  ;;  %s9210_s1 = sadd.s32 4294967295, %s9078_s21   ;;  %s9078_s21 = sphi %s9195_s21, %s10654_s21   ;;  %s9074_s20 = sphi %s9193_s20, %s10656_s20   ;;  %s9070_s30 = sphi %s9191_s30, %s10658_s30   ;;  %s9066_s0 = sphi %s9189_s0, %s10657_s0  }
   0xe   : > { %s7826_s22 = sadd.s32 4294967294, %s9078_s21   ;;  %s9214_s2 = sadd.s32 1, %s9078_s21  }
   0xf   : > { %10635 = sst [smem:[#allocation6_spill]] %s9214_s2  ;;  %s443_s23 = sadd.s32 1, %s9074_s20 }
  0x10   : > { %s440_s24 = ssub.s32 %s9078_s21, %s9214_s2  ;;  %p453_p0 = scmp.ne.s32.totalorder %s9074_s20, %s9070_s30 }
  0x11   : > { %p441_p1 = scmp.eq.s32.totalorder %s440_s24, 0  ;;  %p454_p2 = scmp.eq.s32.totalorder %s9210_s1, 1 }
  0x12   : > { %p459_p3 = scmp.ne.s32.totalorder %s9070_s30, %s9066_s0  ;;  %p460_p4 = scmp.eq.s32.totalorder %s7826_s22, 1 }
  0x13   : > { %s9225_s25 = scalar_select %p441_p1, %s9074_s20, %s443_s23  }
  0x14   : > { %p9227_p5 = por %p454_p2, %p453_p0  ;;  %p9231_p6 = por %p460_p4, %p459_p3 }
  0x15   : > { %10636 = sst [smem:[#allocation7_spill]] %s9225_s25  ;;  %p7829_p7 = scmp.ge.s32.totalorder %s9078_s21, 1 }
  0x16   : > { %p541_p8 = scmp.lt.s32.totalorder %s9078_s21, 3 }
  0x18   : > { %p542_p9 = pnand %p7829_p7, %p541_p8 }
  0x19   : > { %s10639_s29 = sld [smem:[#allocation9_spill]] (!%p542_p9)  ;;  %s7831_s22 = sshll.u32 (!%p542_p9), %s9210_s1, 3 }
  0x1a   : > { %545 = sbr.rel (%p542_p9) target bundleno = 6607 (0x19cf), region = 96  ;;  %p598_p10 = scmp.lt.s32.totalorder (!%p542_p9), %s7831_s22, 15 }
  0x1b   : > { %s10640_s20 = sld [smem:[#allocation8_spill]] (!%p542_p9)  ;;  %s10623_s25 = smov (!%p542_p9), 96  }
  0x1c   : > { %s10641_s27 = sld [smem:[#allocation11_spill]] (!%p542_p9)  ;;  %s10621_s28 = smov (!%p542_p9), 64  }
  0x1d   : > { %s10643_s4 = sld [smem:[#allocation12_spill]] (!%p542_p9)  ;;  %s10650_s24 = smov (!%p542_p9), 80  }
  0x1e   : > { %s10644_s5 = sld [smem:[#allocation13_spill]] (!%p542_p9) }
  0x1f   : > { %v612_v0 = vld [vmem:[%s10639_s29] sm:$0xf]  ;;  %vm637_vm0 = vcmask 1043456   ;;  %s10660_s22 = smov (!%p598_p10, %s7831_s22), 15  ;;  %vm624_vm1 = vcmask 64512   ;;  %vm733_vm2 = vcmask 261120  }
  0x20   : > { %8706 = vmatprep.subr.msk.bf16.mxu0 %vm637_vm0, %v612_v0  ;;  %v639_v1 = vsel %vm637_vm0, %v612_v0, 0  ;;  %s7832_s23 = sshll.u32 %s10660_s22, 3  ;;  %v9080_v37 = vmov 0.0   ;;  %vm9081_vm3 = vmmov 0   ;;  %vm814_vm4 = vcmask 130048   ;;  %s10619_s29 = smov 80  }
  0x21   : > { %8245 = vmatpush3.bf16.msra.mxu0 %v639_v1  ;;  %s601_s2 = scalar_lea.vmem %s10640_s20, %s7832_s23  ;;  %s10642_s23 = sld [smem:[#allocation10_spill]]  ;;  %vm7653_vm5 = vcmask 1041409   ;;  %vm7655_vm6 = vcmask 1042434   ;;  %vm7657_vm7 = vcmask 1043459   ;;  %vm7659_vm8 = vcmask 1044484  }
  0x22   : > { %v604_v2 = vld [vmem:[%s601_s2] sm:$0xff]  ;;  %v605_v3 = vld [vmem:[%s601_s2 + $0x8] sm:$0xff]  ;;  %v606_v4 = vld [vmem:[%s601_s2 + $0x10] sm:$0xff]  ;;  %s10613_s22 = smov 48   ;;  %s10645_s6 = sld [smem:[#allocation14_spill]]  ;;  %vm7661_vm9 = vcmask 1045509  }
  0x23   : > { %v613_v5 = vpack.c.bf16 %v605_v3, %v604_v2  ;;  %v607_v6 = vld [vmem:[%s601_s2 + $0x18] sm:$0xff]  ;;  %v608_v7 = vld [vmem:[%s601_s2 + $0x20] sm:$0xff]  ;;  %v609_v8 = vld [vmem:[%s601_s2 + $0x28] sm:$0xff]  ;;  %s10646_s7 = sld [smem:[#allocation15_spill]]  ;;  %s10651_s20 = smov 112   ;;  %vm7663_vm10 = vcmask 1046534  }
  0x24   : > { %v614_v9 = vpack.c.bf16 %v607_v6, %v606_v4  ;;  %v615_v10 = vpack.c.bf16 %v609_v8, %v608_v7  ;;  %v610_v11 = vld [vmem:[%s601_s2 + $0x30] sm:$0xff]  ;;  %v611_v12 = vld [vmem:[%s601_s2 + $0x38] sm:$0xff]  ;;  %v8794_v14 = vld [vmem:[%s10641_s27 + $0x8] sm:$0xff]   ;;  %s10615_s2 = smov 112   ;;  %s10647_s8 = sld [smem:[#allocation16_spill]]  ;;  %vm7665_vm11 = vcmask 1047559  }
  0x25   : > { %8246 = vmatprep.mubr.msk.bf16.mxu0 %vm624_vm1, %v613_v5  ;;  %v616_v13 = vpack.c.bf16 %v611_v12, %v610_v11  ;;  %8254 = vmatprep.subr.bf16.mxu0 %v8794_v14  ;;  %v8795_v15 = vld [vmem:[%s10641_s27] sm:$0xff]  }
  0x26   : > { %8247 = vmatmul.mubr.msk.bf16.vlgmr.msra.gmra.mxu0 %vm624_vm1, %v614_v9  ;;  %8702 = vmatprep.subr.bf16.mxu1 %v8794_v14  ;;  %v7838_v38 = vld [vmem:[%s10643_s4] ss:$0 sm:$0xff] }
  0x27   : > { %8250 = vmatprep.mubr.msk.bf16.mxu0 %vm624_vm1, %v615_v10  ;;  %8255 = vmatpush3.bf16.msra.mxu0 %v8794_v14  ;;  %v7833_v19 = vld [vmem:[%s10642_s23] ss:$0 sm:$0xff]  ;;  %s9088_s23 = smov [#allocation2]  }
  0x28   : > { %8704 = vmatpush3.bf16.msra.mxu1 %v8794_v14  ;;  %8256 = vmatprep.subr.bf16.mxu0 %v8795_v15 }
  0x29   : > { %8703 = vmatprep.subr.bf16.mxu1 %v8795_v15 }
  0x2b   : > { %8257 = vmatpush3.bf16.msra.mxu0 %v8795_v15 }
  0x2c   : > { %8705 = vmatpush3.bf16.msra.mxu1 %v8795_v15  ;;  %8266 = vmatprep.subr.mxu0 %v9080_v37 }
  0x2d   : > { %8276 = vmatprep.subr.mxu1 %v9080_v37 }
  0x2e   : > { %8251 = vmatmul.mubr.msk.bf16.gmra.mxu0 %vm624_vm1, %v616_v13 }
  0xe6   : > { %v8248_v16 = vpop.f32.mrf.mxu0 }
  0xe7   : > { %v9263_v24 = vadd.f32 %v8248_v16, %v7833_v19 }
  0xe8   : > { %v675_v17 = vpop.f32.mrf.mxu0 }
  0xe9   : > { %v9259_v22 = vadd.f32 %v7833_v19, %v675_v17 }
  0xea   : > { %v8249_v18 = vpop.f32.mrf.mxu0 }
  0xeb   : > { %v9257_v20 = vadd.f32 %v8249_v18, %v7833_v19 }
  0xec   : > { %v678_v21 = vpop.f32.mrf.mxu0 }
  0xed   : > { %v9261_v23 = vadd.f32 %v7833_v19, %v678_v21  ;;  %v711_v27 = vpack.c.bf16 %v9257_v20, %v9263_v24 }
  0xee   : > { %v8252_v25 = vpop.f32.mrf.mxu0 }
  0xef   : > { %v710_v26 = vpack.c.bf16 %v9261_v23, %v9259_v22  ;;  %v9277_v34 = vadd.f32 %v8252_v25, %v7833_v19 }
  0xf0   : > { %v691_v28 = vpop.f32.mrf.mxu0 }
  0xf1   : > { %8258 = vmatprep.mubr.msk.bf16.mxu0 %vm733_vm2, %v710_v26  ;;  %v9273_v32 = vadd.f32 %v7833_v19, %v691_v28 }
  0xf2   : > { %v8253_v29 = vpop.f32.mrf.mxu0  ;;  %8259 = vmatmul.mubr.msk.bf16.vlgmr.msra.gmra.mxu0 %vm733_vm2, %v711_v27 }
  0xf3   : > { %v9271_v30 = vadd.f32 %v8253_v29, %v7833_v19  ;;  %8268 = vmatprep.mubr.msk.f32.mxu0 %vm9081_vm3, %v9080_v37 }
  0xf4   : > { %v694_v31 = vpop.f32.mrf.mxu0 }
  0xf5   : > { %v9275_v33 = vadd.f32 %v7833_v19, %v694_v31  ;;  %v713_v36 = vpack.c.bf16 %v9271_v30, %v9277_v34 }
  0xf7   : > { %v712_v35 = vpack.c.bf16 %v9275_v33, %v9273_v32 }
  0xf9   : > { %8262 = vmatprep.mubr.msk.bf16.mxu1 %vm733_vm2, %v712_v35 }
  0xfa   : > { %8263 = vmatmul.mubr.msk.bf16.vlgmr.msra.gmra.mxu1 %vm733_vm2, %v713_v36 }
  0xfb   : > { %8278 = vmatprep.mubr.msk.f32.mxu1 %vm9081_vm3, %v9080_v37 }
 0x1b2   : > { %v8260_v39 = vpop.f32.mrf.mxu0 }
 0x1b3   : > { %v9294_v40 = vadd.f32 %v8260_v39, %v7838_v38 }
 0x1b4   : > { %v780_v41 = vpop.f32.mrf.mxu0 }
 0x1b5   : > { %v9296_v42 = vadd.f32 %v7838_v38, %v780_v41  ;;  %967 = vrot.lane.b32.xlu1 %v9294_v40, %s10623_s25 }
 0x1b6   : > { %v8261_v43 = vpop.f32.mrf.mxu0 }
 0x1b7   : > { %v9300_v44 = vadd.f32 %v8261_v43, %v7838_v38  ;;  %812 = vrot.lane.b32.xlu0 %v9296_v42, %s10623_s25 }
 0x1b8   : > { %v783_v45 = vpop.f32.mrf.mxu0 }
 0x1b9   : > { %v9304_v46 = vadd.f32 %v7838_v38, %v783_v45  ;;  %1044 = vrot.lane.b32.xlu1 %v9300_v44, %s10623_s25 }
 0x1ba   : > { %v8264_v47 = vpop.f32.mrf.mxu1 }
 0x1bb   : > { %890 = vrot.lane.b32.xlu0 %v9304_v46, %s10623_s25  ;;  %v9314_v52 = vadd.f32 %v8264_v47, %v7838_v38 }
 0x1bc   : > { %v796_v48 = vpop.f32.mrf.mxu1 }
 0x1bd   : > { %v9310_v49 = vadd.f32 %v7838_v38, %v796_v48 }
 0x1be   : > { %v8265_v50 = vpop.f32.mrf.mxu1 }
 0x1bf   : > { %1121 = vrot.lane.b32.xlu0 %v9310_v49, %s10623_s25  ;;  %v9322_v54 = vadd.f32 %v8265_v50, %v7838_v38 }
 0x1c0   : > { %v799_v51 = vpop.f32.mrf.mxu1 }
 0x1c1   : > { %v9316_v53 = vadd.f32 %v7838_v38, %v799_v51 }
 0x1c3   : > { %1198 = vrot.lane.b32.xlu1 %v9316_v53, %s10623_s25  ;;  %1275 = vrot.lane.b32.xlu0 %v9314_v52, %s10623_s25 }
 0x1c7   : > { %1352 = vrot.lane.b32.xlu1 %v9322_v54, %s10623_s25  ;;  %s10648_s25 = smov 96  }
 0x227   : > { %v968_v55 = vpop.permute.xlu1 %967 }
 0x228   : > { %8277 = vmatpush3.xpose.msk.msra.mxu1 %vm814_vm4, %v968_v55 }
 0x229   : > { %v813_v56 = vpop.permute.xlu0 %812  ;;  %8286 = vmatprep.subr.mxu1 %v9080_v37 }
 0x22a   : > { %8267 = vmatpush3.xpose.msk.msra.mxu0 %vm814_vm4, %v813_v56 }
 0x22b   : > { %8279 = vmatmul.mubr.msk.f32.vlgmr.msra.gmra.mxu1 %vm814_vm4, %v9294_v40  ;;  %8271 = vmatprep.subr.mxu0 %v9080_v37  ;;  %v1045_v58 = vpop.permute.xlu1 %1044 }
 0x22c   : > { %8288 = vmatprep.mubr.msk.f32.mxu1 %vm9081_vm3, %v9080_v37 }
 0x22d   : > { %8269 = vmatmul.mubr.msk.f32.vlgmr.msra.gmra.mxu0 %vm814_vm4, %v9296_v42  ;;  %v891_v57 = vpop.permute.xlu0 %890 }
 0x22e   : > { %8272 = vmatpush3.xpose.msk.msra.mxu0 %vm814_vm4, %v891_v57  ;;  %8273 = vmatprep.mubr.msk.f32.mxu0 %vm9081_vm3, %v9080_v37 }
 0x22f   : > { %8281 = vmatprep.subr.mxu0 %v9080_v37 }
 0x231   : > { %8274 = vmatmul.mubr.msk.f32.vlgmr.msra.gmra.mxu0 %vm814_vm4, %v9304_v46  ;;  %v1122_v59 = vpop.permute.xlu0 %1121 }
 0x232   : > { %8282 = vmatpush3.xpose.msk.msra.mxu0 %vm814_vm4, %v1045_v58  ;;  %8287 = vmatpush3.xpose.msk.msra.mxu1 %vm814_vm4, %v1122_v59 }
 0x233   : > { %8283 = vmatprep.mubr.msk.f32.mxu0 %vm9081_vm3, %v9080_v37  ;;  %8291 = vmatprep.subr.mxu0 %v9080_v37 }
 0x234   : > { %8296 = vmatprep.subr.mxu1 %v9080_v37 }
 0x235   : > { %v1199_v60 = vpop.permute.xlu1 %1198  ;;  %8284 = vmatmul.mubr.msk.f32.vlgmr.msra.gmra.mxu0 %vm814_vm4, %v9300_v44  ;;  %8289 = vmatmul.mubr.msk.f32.vlgmr.msra.gmra.mxu1 %vm814_vm4, %v9310_v49  ;;  %v1276_v61 = vpop.permute.xlu0 %1275 }
 0x236   : > { %8292 = vmatpush3.xpose.msk.msra.mxu0 %vm814_vm4, %v1199_v60  ;;  %8297 = vmatpush3.xpose.msk.msra.mxu1 %vm814_vm4, %v1276_v61 }
 0x237   : > { %8293 = vmatprep.mubr.msk.f32.mxu0 %vm9081_vm3, %v9080_v37  ;;  %8298 = vmatprep.mubr.msk.f32.mxu1 %vm9081_vm3, %v9080_v37 }
 0x238   : > { %8301 = vmatprep.subr.mxu0 %v9080_v37  ;;  %8306 = vmatprep.subr.mxu1 %v9080_v37 }
 0x239   : > { %v1353_v62 = vpop.permute.xlu1 %1352  ;;  %8294 = vmatmul.mubr.msk.f32.vlgmr.msra.gmra.mxu0 %vm814_vm4, %v9316_v53  ;;  %8299 = vmatmul.mubr.msk.f32.vlgmr.msra.gmra.mxu1 %vm814_vm4, %v9314_v52 }
 0x23a   : > { %8302 = vmatpush3.xpose.msk.msra.mxu0 %vm814_vm4, %v1353_v62  ;;  %8303 = vmatprep.mubr.msk.f32.mxu0 %vm9081_vm3, %v9080_v37 }
 0x23b   : > { %8311 = vmatprep.subr.mxu0 %v9080_v37  ;;  %8308 = vmatprep.mubr.msk.f32.mxu1 %vm9081_vm3, %v9080_v37 }
 0x23d   : > { %8304 = vmatmul.mubr.msk.f32.vlgmr.msra.gmra.mxu0 %vm814_vm4, %v9322_v54 }
 0x23e   : > { %8313 = vmatprep.mubr.msk.f32.mxu0 %vm9081_vm3, %v9080_v37 }
 0x2eb   : > { %v1039_v63 = vpop.f32.mrf.mxu1 }
 0x2ec   : > { %v1434_v0 = vsel %vm624_vm1, %v1039_v63, -inf }
 0x2ed   : > { %v8280_v1 = vpop.f32.mrf.mxu1  ;;  %1435 = vmax.xlane.f32.xlu0 %v1434_v0  ;;  %v885_v2 = vpop.f32.mrf.mxu0 }
 0x2ee   : > { %v1428_v4 = vsel %vm624_vm1, %v885_v2, -inf }
 0x2ef   : > { %v8270_v3 = vpop.f32.mrf.mxu0 }
 0x2f1   : > { %1429 = vmax.xlane.f32.xlu0 %v1428_v4  ;;  %v962_v5 = vpop.f32.mrf.mxu0 }
 0x2f2   : > { %v1431_v6 = vsel %vm624_vm1, %v962_v5, -inf }
 0x2f3   : > { %1432 = vmax.xlane.f32.xlu1 %v1431_v6  ;;  %v8275_v7 = vpop.f32.mrf.mxu0 }
 0x2f5   : > { %v1116_v8 = vpop.f32.mrf.mxu0  ;;  %v1193_v9 = vpop.f32.mrf.mxu1 }
 0x2f6   : > { %v1437_v10 = vsel %vm624_vm1, %v1116_v8, -inf  ;;  %v1440_v11 = vsel %vm624_vm1, %v1193_v9, -inf }
 0x2f7   : > { %1438 = vmax.xlane.f32.xlu0 %v1437_v10  ;;  %v8285_v12 = vpop.f32.mrf.mxu0  ;;  %1441 = vmax.xlane.f32.xlu1 %v1440_v11  ;;  %v8290_v13 = vpop.f32.mrf.mxu1 }
 0x2f9   : > { %v1270_v14 = vpop.f32.mrf.mxu0  ;;  %v1347_v15 = vpop.f32.mrf.mxu1 }
 0x2fa   : > { %v1443_v16 = vsel %vm624_vm1, %v1270_v14, -inf  ;;  %v1446_v17 = vsel %vm624_vm1, %v1347_v15, -inf }
 0x2fb   : > { %1444 = vmax.xlane.f32.xlu0 %v1443_v16  ;;  %v8295_v18 = vpop.f32.mrf.mxu0  ;;  %1447 = vmax.xlane.f32.xlu1 %v1446_v17  ;;  %v8300_v19 = vpop.f32.mrf.mxu1 }
 0x2fd   : > { %v1424_v21 = vpop.f32.mrf.mxu0 }
 0x2fe   : > { %v1449_v25 = vsel %vm624_vm1, %v1424_v21, -inf }
 0x2ff   : > { %1450 = vmax.xlane.f32.xlu0 %v1449_v25  ;;  %v8305_v26 = vpop.f32.mrf.mxu0 }
 0x30c   : > { %1516 = vrot.lane.b32.xlu1 %v9296_v42, %s10621_s28 }
 0x310   : > { %1668 = vrot.lane.b32.xlu1 %v9294_v40, %s10621_s28 }
 0x314   : > { %1744 = vrot.lane.b32.xlu1 %v9300_v44, %s10621_s28 }
 0x315   : > { %1592 = vrot.lane.b32.xlu0 %v9304_v46, %s10621_s28 }
 0x318   : > { %1896 = vrot.lane.b32.xlu1 %v9316_v53, %s10621_s28 }
 0x319   : > { %1820 = vrot.lane.b32.xlu0 %v9310_v49, %s10621_s28 }
 0x31c   : > { %2048 = vrot.lane.b32.xlu1 %v9322_v54, %s10621_s28 }
 0x31d   : > { %1972 = vrot.lane.b32.xlu0 %v9314_v52, %s10621_s28  ;;  %s10649_s28 = smov 64  }
 0x320   : > { %2204 = vrot.lane.b32.xlu1 %v9304_v46, %s10619_s29 }
 0x321   : > { %2126 = vrot.lane.b32.xlu0 %v9296_v42, %s10619_s29 }
 0x324   : > { %2202 = vrot.lane.b32.xlu1 %v9304_v46, %s10615_s2 }
 0x325   : > { %2124 = vrot.lane.b32.xlu0 %v9296_v42, %s10615_s2 }
 0x376   : > { %v1436_v27 = vpop.xlane.xlu0 %1435 }
 0x377   : > { %v1454_v28 = vsub.f32 %v1039_v63, %v1436_v27 }
 0x379   : > { %v1464_v29 = vmul.f32 1.442695, %v1454_v28 }
 0x37a   : > { %v1430_v31 = vpop.xlane.xlu0 %1429 }
 0x37b   : > { %8824 = vpow2.f32 %v1464_v29  ;;  %v1452_v35 = vsub.f32 %v885_v2, %v1430_v31 }
 0x37c   : > { %v1433_v36 = vpop.xlane.xlu1 %1432 }
 0x37d   : > { %v1460_v38 = vmul.f32 1.442695, %v1452_v35  ;;  %v1453_v39 = vsub.f32 %v962_v5, %v1433_v36 }
 0x37f   : > { %8826 = vpow2.f32 %v1460_v38  ;;  %v1462_v41 = vmul.f32 1.442695, %v1453_v39 }
 0x380   : > { %v1442_v43 = vpop.xlane.xlu1 %1441  ;;  %v1439_v45 = vpop.xlane.xlu0 %1438 }
 0x381   : > { %8828 = vpow2.f32 %v1462_v41  ;;  %v1456_v47 = vsub.f32 %v1193_v9, %v1442_v43  ;;  %v1455_v48 = vsub.f32 %v1116_v8, %v1439_v45 }
 0x383   : > { %v1468_v50 = vmul.f32 1.442695, %v1456_v47  ;;  %v1466_v51 = vmul.f32 1.442695, %v1455_v48 }
 0x384   : > { %v1448_v55 = vpop.xlane.xlu1 %1447  ;;  %v1445_v56 = vpop.xlane.xlu0 %1444 }
 0x385   : > { %8830 = vpow2.f32 %v1468_v50  ;;  %v1458_v57 = vsub.f32 %v1347_v15, %v1448_v55  ;;  %v1457_v58 = vsub.f32 %v1270_v14, %v1445_v56 }
 0x386   : > { %8832 = vpow2.f32 %v1466_v51 }
 0x387   : > { %v1472_v59 = vmul.f32 1.442695, %v1458_v57  ;;  %v1470_v60 = vmul.f32 1.442695, %v1457_v58 }
 0x388   : > { %v9406_v61 = vpop.eup %8824  ;;  %v1517_v62 = vpop.permute.xlu1 %1516 }
 0x389   : > { %v1451_v63 = vpop.xlane.xlu0 %1450  ;;  %8834 = vpow2.f32 %v1472_v59  ;;  %8307 = vmatpush3.msra.mxu1 %v1517_v62  ;;  %v1482_v1 = vsel %vm624_vm1, %v9406_v61, 0.0 }
 0x38a   : > { %v1459_v0 = vsub.f32 %v1424_v21, %v1451_v63  ;;  %8836 = vpow2.f32 %v1470_v60  ;;  %1483 = vadd.xlane.f32.xlu1 %v1482_v1  ;;  %8316 = vmatprep.subr.mxu1 %v9080_v37 }
 0x38c   : > { %v1474_v2 = vmul.f32 1.442695, %v1459_v0  ;;  %v9411_v3 = vpop.eup %8826  ;;  %v1669_v18 = vpop.permute.xlu1 %1668 }
 0x38d   : > { %v1593_v4 = vpop.permute.xlu0 %1592  ;;  %v1476_v5 = vsel %vm624_vm1, %v9411_v3, 0.0 }
 0x38e   : > { %8838 = vpow2.f32 %v1474_v2  ;;  %8312 = vmatpush3.msra.mxu0 %v1593_v4  ;;  %v9415_v6 = vpop.eup %8828  ;;  %1477 = vadd.xlane.f32.xlu1 %v1476_v5 }
 0x38f   : > { %8321 = vmatprep.subr.mxu0 %v9080_v37  ;;  %v1479_v7 = vsel %vm624_vm1, %v9415_v6, 0.0 }
 0x390   : > { %1480 = vadd.xlane.f32.xlu0 %v1479_v7  ;;  %v1745_v19 = vpop.permute.xlu1 %1744 }
 0x391   : > { %v1821_v25 = vpop.permute.xlu0 %1820 }
 0x392   : > { %v9420_v8 = vpop.eup %8830 }
 0x393   : > { %v9422_v9 = vpop.eup %8832  ;;  %v1488_v10 = vsel %vm624_vm1, %v9420_v8, 0.0 }
 0x394   : > { %1489 = vadd.xlane.f32.xlu1 %v1488_v10  ;;  %v1485_v11 = vsel %vm624_vm1, %v9422_v9, 0.0  ;;  %v1897_v21 = vpop.permute.xlu1 %1896 }
 0x395   : > { %1486 = vadd.xlane.f32.xlu0 %v1485_v11  ;;  %v1973_v27 = vpop.permute.xlu0 %1972 }
 0x396   : > { %v9428_v12 = vpop.eup %8834 }
 0x397   : > { %v9430_v13 = vpop.eup %8836  ;;  %v1494_v14 = vsel %vm624_vm1, %v9428_v12, 0.0 }
 0x398   : > { %1495 = vadd.xlane.f32.xlu1 %v1494_v14  ;;  %v1491_v15 = vsel %vm624_vm1, %v9430_v13, 0.0  ;;  %v9464_v26 = vpop.permute.xlu1 %2048 }
 0x399   : > { %1492 = vadd.xlane.f32.xlu0 %v1491_v15  ;;  %v9468_v29 = vpop.permute.xlu0 %2126 }
 0x39b   : > { %v9436_v16 = vpop.eup %8838 }
 0x39c   : > { %v1497_v17 = vsel %vm624_vm1, %v9436_v16, 0.0  ;;  %v9466_v28 = vpop.permute.xlu1 %2204 }
 0x39d   : > { %1498 = vadd.xlane.f32.xlu0 %v1497_v17  ;;  %v9472_v36 = vpop.permute.xlu0 %2124 }
 0x3a0   : > { %v9470_v31 = vpop.permute.xlu1 %2202 }
 0x3a9   : > { %2360 = vrot.lane.b32.xlu1 %v9300_v44, %s10619_s29 }
 0x3ad   : > { %2358 = vrot.lane.b32.xlu1 %v9300_v44, %s10615_s2 }
 0x3b1   : > { %2516 = vrot.lane.b32.xlu1 %v9316_v53, %s10619_s29 }
 0x3b3   : > { %2282 = vrot.lane.b32.xlu0 %v9294_v40, %s10619_s29 }
 0x3b5   : > { %2514 = vrot.lane.b32.xlu1 %v9316_v53, %s10615_s2 }
 0x3b7   : > { %2280 = vrot.lane.b32.xlu0 %v9294_v40, %s10615_s2 }
 0x3b9   : > { %2672 = vrot.lane.b32.xlu1 %v9322_v54, %s10619_s29 }
 0x3bb   : > { %2438 = vrot.lane.b32.xlu0 %v9310_v49, %s10619_s29 }
 0x3bd   : > { %2670 = vrot.lane.b32.xlu1 %v9322_v54, %s10615_s2 }
 0x3bf   : > { %2436 = vrot.lane.b32.xlu0 %v9310_v49, %s10615_s2 }
 0x3c3   : > { %2594 = vrot.lane.b32.xlu0 %v9314_v52, %s10619_s29  ;;  %s9022_s29 = sshll.u32 %s9088_s23, 4  ;;  %s9023_s29 = int_to_ptr.vmem [resolvable:$false] %s9022_s29 }
 0x3c7   : > { %2592 = vrot.lane.b32.xlu0 %v9314_v52, %s10615_s2  ;;  %s10617_s2 = smov 16  }
 0x413   : > { %v1484_v35 = vpop.xlane.xlu1 %1483 }
 0x417   : > { %v1478_v38 = vpop.xlane.xlu1 %1477 }
 0x418   : > { %8840 = vrcp.f32 %v1478_v38 }
 0x419   : > { %8842 = vrcp.f32 %v1484_v35  ;;  %v1481_v39 = vpop.xlane.xlu0 %1480 }
 0x41a   : > { %8844 = vrcp.f32 %v1481_v39 }
 0x41d   : > { %v1490_v41 = vpop.xlane.xlu1 %1489 }
 0x41e   : > { %8846 = vrcp.f32 %v1490_v41  ;;  %v1487_v43 = vpop.xlane.xlu0 %1486 }
 0x41f   : > { %8848 = vrcp.f32 %v1487_v43 }
 0x421   : > { %v1496_v45 = vpop.xlane.xlu1 %1495 }
 0x422   : > { %8850 = vrcp.f32 %v1496_v45  ;;  %v1493_v47 = vpop.xlane.xlu0 %1492 }
 0x423   : > { %8852 = vrcp.f32 %v1493_v47 }
 0x425   : > { %v8841_v48 = vpop.eup %8840  ;;  %v2361_v57 = vpop.permute.xlu1 %2360 }
 0x426   : > { %v8843_v50 = vpop.eup %8842  ;;  %v1499_v51 = vpop.xlane.xlu0 %1498  ;;  %v1508_v55 = vmul.f32 %v8841_v48, %v9411_v3 }
 0x427   : > { %v8845_v56 = vpop.eup %8844  ;;  %8854 = vrcp.f32 %v1499_v51  ;;  %v1510_v60 = vmul.f32 %v8843_v50, %v9406_v61 }
 0x428   : > { %8309 = vmatmul.mubr.msk.f32.vlgmr.msra.gmra.mxu1 %vm624_vm1, %v1508_v55  ;;  %v1509_v58 = vmul.f32 %v8845_v56, %v9415_v6 }
 0x429   : > { %8317 = vmatpush3.msra.mxu1 %v1669_v18  ;;  %8318 = vmatprep.mubr.msk.f32.mxu1 %vm9081_vm3, %v9080_v37  ;;  %v2359_v1 = vpop.permute.xlu1 %2358 }
 0x42a   : > { %v2283_v59 = vpop.permute.xlu0 %2282  ;;  %8314 = vmatmul.mubr.msk.f32.vlgmr.msra.gmra.mxu0 %vm624_vm1, %v1509_v58  ;;  %8326 = vmatprep.subr.mxu1 %v9080_v37 }
 0x42b   : > { %v8847_v62 = vpop.eup %8846  ;;  %8322 = vmatpush3.msra.mxu0 %v1745_v19  ;;  %8323 = vmatprep.mubr.msk.f32.mxu0 %vm9081_vm3, %v9080_v37 }
 0x42c   : > { %v8849_v63 = vpop.eup %8848  ;;  %8319 = vmatmul.mubr.msk.f32.vlgmr.msra.gmra.mxu1 %vm624_vm1, %v1510_v60  ;;  %8331 = vmatprep.subr.mxu0 %v9080_v37  ;;  %v1512_v61 = vmul.f32 %v8847_v62, %v9420_v8 }
 0x42d   : > { %8327 = vmatpush3.msra.mxu1 %v1821_v25  ;;  %v1511_v0 = vmul.f32 %v8849_v63, %v9422_v9  ;;  %8328 = vmatprep.mubr.msk.f32.mxu1 %vm9081_vm3, %v9080_v37  ;;  %v2517_v9 = vpop.permute.xlu1 %2516 }
 0x42e   : > { %v2281_v2 = vpop.permute.xlu0 %2280  ;;  %8336 = vmatprep.subr.mxu1 %v9080_v37 }
 0x42f   : > { %v8851_v3 = vpop.eup %8850  ;;  %8324 = vmatmul.mubr.msk.f32.vlgmr.msra.gmra.mxu0 %vm624_vm1, %v1511_v0 }
 0x430   : > { %v8853_v4 = vpop.eup %8852  ;;  %8332 = vmatpush3.msra.mxu0 %v1897_v21  ;;  %8329 = vmatmul.mubr.msk.f32.vlgmr.msra.gmra.mxu1 %vm624_vm1, %v1512_v61  ;;  %v1514_v7 = vmul.f32 %v8851_v3, %v9428_v12 }
 0x431   : > { %8337 = vmatpush3.msra.mxu1 %v1973_v27  ;;  %8333 = vmatprep.mubr.msk.f32.mxu0 %vm9081_vm3, %v9080_v37  ;;  %v1513_v5 = vmul.f32 %v8853_v4, %v9430_v13  ;;  %v2515_v12 = vpop.permute.xlu1 %2514 }
 0x432   : > { %8341 = vmatprep.subr.mxu0 %v9080_v37  ;;  %v2439_v6 = vpop.permute.xlu0 %2438  ;;  %8338 = vmatprep.mubr.msk.f32.mxu1 %vm9081_vm3, %v9080_v37 }
 0x433   : > { %8334 = vmatmul.mubr.msk.f32.vlgmr.msra.gmra.mxu0 %vm624_vm1, %v1513_v5  ;;  %8346 = vmatprep.subr.mxu1 %v9080_v37 }
 0x434   : > { %v8855_v8 = vpop.eup %8854  ;;  %8342 = vmatpush3.msra.mxu0 %v9464_v26  ;;  %8339 = vmatmul.mubr.msk.f32.vlgmr.msra.gmra.mxu1 %vm624_vm1, %v1514_v7 }
 0x435   : > { %8347 = vmatpush3.xpose.msk.msra.mxu1 %vm814_vm4, %v9468_v29  ;;  %8343 = vmatprep.mubr.msk.f32.mxu0 %vm9081_vm3, %v9080_v37  ;;  %v1515_v10 = vmul.f32 %v8855_v8, %v9436_v16  ;;  %v2673_v14 = vpop.permute.xlu1 %2672 }
 0x436   : > { %8351 = vmatprep.subr.mxu0 %v9080_v37  ;;  %8348 = vmatprep.mubr.msk.f32.mxu1 %vm9081_vm3, %v9080_v37  ;;  %v2437_v11 = vpop.permute.xlu0 %2436 }
 0x437   : > { %8344 = vmatmul.mubr.msk.f32.vlgmr.msra.gmra.mxu0 %vm624_vm1, %v1515_v10  ;;  %8356 = vmatprep.subr.mxu1 %v9080_v37 }
 0x438   : > { %8352 = vmatpush3.xpose.msk.msra.mxu0 %vm814_vm4, %v9466_v28  ;;  %8349 = vmatmul.mubr.msk.f32.vlgmr.msra.gmra.mxu1 %vm814_vm4, %v9472_v36 }
 0x439   : > { %8357 = vmatpush3.xpose.msk.msra.mxu1 %vm814_vm4, %v2283_v59  ;;  %8353 = vmatprep.mubr.msk.f32.mxu0 %vm9081_vm3, %v9080_v37  ;;  %v2671_v16 = vpop.permute.xlu1 %2670 }
 0x43a   : > { %8361 = vmatprep.subr.mxu0 %v9080_v37  ;;  %8358 = vmatprep.mubr.msk.f32.mxu1 %vm9081_vm3, %v9080_v37  ;;  %v2595_v13 = vpop.permute.xlu0 %2594 }
 0x43b   : > { %8354 = vmatmul.mubr.msk.f32.vlgmr.msra.gmra.mxu0 %vm814_vm4, %v9470_v31  ;;  %8366 = vmatprep.subr.mxu1 %v9080_v37 }
 0x43c   : > { %8362 = vmatpush3.xpose.msk.msra.mxu0 %vm814_vm4, %v2361_v57  ;;  %8359 = vmatmul.mubr.msk.f32.vlgmr.msra.gmra.mxu1 %vm814_vm4, %v2281_v2 }
 0x43d   : > { %8367 = vmatpush3.xpose.msk.msra.mxu1 %vm814_vm4, %v2439_v6  ;;  %8363 = vmatprep.mubr.msk.f32.mxu0 %vm9081_vm3, %v9080_v37 }
 0x43e   : > { %8371 = vmatprep.subr.mxu0 %v9080_v37  ;;  %8368 = vmatprep.mubr.msk.f32.mxu1 %vm9081_vm3, %v9080_v37  ;;  %v2593_v15 = vpop.permute.xlu0 %2592 }
 0x43f   : > { %8364 = vmatmul.mubr.msk.f32.vlgmr.msra.gmra.mxu0 %vm814_vm4, %v2359_v1  ;;  %8376 = vmatprep.subr.mxu1 %v9080_v37 }
 0x440   : > { %8372 = vmatpush3.xpose.msk.msra.mxu0 %vm814_vm4, %v2517_v9  ;;  %8369 = vmatmul.mubr.msk.f32.vlgmr.msra.gmra.mxu1 %vm814_vm4, %v2437_v11 }
 0x441   : > { %8377 = vmatpush3.xpose.msk.msra.mxu1 %vm814_vm4, %v2595_v13  ;;  %8373 = vmatprep.mubr.msk.f32.mxu0 %vm9081_vm3, %v9080_v37 }
 0x442   : > { %8381 = vmatprep.subr.mxu0 %v9080_v37  ;;  %8378 = vmatprep.mubr.msk.f32.mxu1 %vm9081_vm3, %v9080_v37 }
 0x443   : > { %8374 = vmatmul.mubr.msk.f32.vlgmr.msra.gmra.mxu0 %vm814_vm4, %v2515_v12  ;;  %8386 = vmatprep.subr.mxu1 %v9080_v37 }
 0x444   : > { %8382 = vmatpush3.xpose.msk.msra.mxu0 %vm814_vm4, %v2673_v14  ;;  %8379 = vmatmul.mubr.msk.f32.vlgmr.msra.gmra.mxu1 %vm814_vm4, %v2593_v15 }
 0x445   : > { %8383 = vmatprep.mubr.msk.f32.mxu0 %vm9081_vm3, %v9080_v37  ;;  %8391 = vmatprep.subr.mxu0 %v9080_v37 }
 0x446   : > { %8388 = vmatprep.mubr.msk.f32.mxu1 %vm9081_vm3, %v9080_v37 }
 0x447   : > { %8384 = vmatmul.mubr.msk.f32.vlgmr.msra.gmra.mxu0 %vm814_vm4, %v2671_v16 }
 0x448   : > { %8393 = vmatprep.mubr.msk.f32.mxu0 %vm9081_vm3, %v9080_v37 }
 0x4e8   : > { %v9557_v17 = vpop.f32.mrf.mxu1 }
 0x4ea   : > { %v8310_v18 = vpop.f32.mrf.mxu1  ;;  %v9559_v19 = vpop.f32.mrf.mxu0 }
 0x4ec   : > { %v8315_v21 = vpop.f32.mrf.mxu0  ;;  %v9561_v25 = vpop.f32.mrf.mxu1 }
 0x4ee   : > { %v8320_v26 = vpop.f32.mrf.mxu1 }
 0x4ef   : > { %v9563_v27 = vpop.f32.mrf.mxu0 }
 0x4f0   : > { %v9565_v28 = vpop.f32.mrf.mxu1 }
 0x4f1   : > { %v8325_v29 = vpop.f32.mrf.mxu0 }
 0x4f2   : > { %v8330_v31 = vpop.f32.mrf.mxu1 }
 0x4f3   : > { %v9567_v35 = vpop.f32.mrf.mxu0 }
 0x4f4   : > { %v9569_v36 = vpop.f32.mrf.mxu1 }
 0x4f5   : > { %v8335_v38 = vpop.f32.mrf.mxu0 }
 0x4f6   : > { %v8340_v39 = vpop.f32.mrf.mxu1 }
 0x4f7   : > { %v9571_v41 = vpop.f32.mrf.mxu0 }
 0x4f8   : > { %v2198_v43 = vpop.f32.mrf.mxu1 }
 0x4f9   : > { %v8345_v45 = vpop.f32.mrf.mxu0  ;;  %v2748_v47 = vsel %vm624_vm1, %v2198_v43, -inf }
 0x4fa   : > { %2749 = vmax.xlane.f32.xlu0 %v2748_v47  ;;  %v8350_v48 = vpop.f32.mrf.mxu1 }
 0x4fb   : > { %v2276_v50 = vpop.f32.mrf.mxu0 }
 0x4fc   : > { %v2751_v51 = vsel %vm624_vm1, %v2276_v50, -inf  ;;  %v2354_v55 = vpop.f32.mrf.mxu1 }
 0x4fd   : > { %2752 = vmax.xlane.f32.xlu1 %v2751_v51  ;;  %v8355_v56 = vpop.f32.mrf.mxu0  ;;  %v2754_v57 = vsel %vm624_vm1, %v2354_v55, -inf }
 0x4fe   : > { %2755 = vmax.xlane.f32.xlu0 %v2754_v57  ;;  %v8360_v58 = vpop.f32.mrf.mxu1 }
 0x4ff   : > { %v2432_v59 = vpop.f32.mrf.mxu0 }
 0x500   : > { %v2510_v60 = vpop.f32.mrf.mxu1  ;;  %v2757_v63 = vsel %vm624_vm1, %v2432_v59, -inf }
 0x501   : > { %v8365_v62 = vpop.f32.mrf.mxu0  ;;  %v2760_v0 = vsel %vm624_vm1, %v2510_v60, -inf }
 0x502   : > { %2758 = vmax.xlane.f32.xlu0 %v2757_v63  ;;  %2761 = vmax.xlane.f32.xlu1 %v2760_v0  ;;  %v8370_v1 = vpop.f32.mrf.mxu1 }
 0x503   : > { %v2588_v2 = vpop.f32.mrf.mxu0 }
 0x504   : > { %v2666_v61 = vpop.f32.mrf.mxu1  ;;  %v2763_v4 = vsel %vm624_vm1, %v2588_v2, -inf }
 0x505   : > { %v8375_v3 = vpop.f32.mrf.mxu0  ;;  %v2766_v5 = vsel %vm624_vm1, %v2666_v61, -inf }
 0x506   : > { %2764 = vmax.xlane.f32.xlu0 %v2763_v4  ;;  %2767 = vmax.xlane.f32.xlu1 %v2766_v5  ;;  %v8380_v6 = vpop.f32.mrf.mxu1 }
 0x507   : > { %v2744_v7 = vpop.f32.mrf.mxu0 }
 0x508   : > { %v2769_v9 = vsel %vm624_vm1, %v2744_v7, -inf }
 0x509   : > { %v8385_v8 = vpop.f32.mrf.mxu0 }
 0x50a   : > { %2770 = vmax.xlane.f32.xlu0 %v2769_v9 }
 0x517   : > { %2836 = vrot.lane.b32.xlu1 %v9296_v42, %s10613_s22 }
 0x51b   : > { %2988 = vrot.lane.b32.xlu1 %v9294_v40, %s10613_s22 }
 0x51f   : > { %3064 = vrot.lane.b32.xlu1 %v9300_v44, %s10613_s22 }
 0x520   : > { %2912 = vrot.lane.b32.xlu0 %v9304_v46, %s10613_s22 }
 0x523   : > { %3216 = vrot.lane.b32.xlu1 %v9316_v53, %s10613_s22 }
 0x524   : > { %3140 = vrot.lane.b32.xlu0 %v9310_v49, %s10613_s22 }
 0x583   : > { %v2750_v10 = vpop.xlane.xlu0 %2749 }
 0x584   : > { %v2772_v11 = vsub.f32 %v2198_v43, %v2750_v10 }
 0x586   : > { %v2780_v12 = vmul.f32 1.442695, %v2772_v11  ;;  %v2753_v13 = vpop.xlane.xlu1 %2752 }
 0x587   : > { %v2773_v42 = vsub.f32 %v2276_v50, %v2753_v13  ;;  %v2756_v14 = vpop.xlane.xlu0 %2755 }
 0x588   : > { %8856 = vpow2.f32 %v2780_v12  ;;  %v2774_v40 = vsub.f32 %v2354_v55, %v2756_v14 }
 0x589   : > { %v2782_v15 = vmul.f32 1.442695, %v2773_v42 }
 0x58a   : > { %v2784_v16 = vmul.f32 1.442695, %v2774_v40 }
 0x58b   : > { %8858 = vpow2.f32 %v2782_v15  ;;  %v2762_v44 = vpop.xlane.xlu1 %2761  ;;  %v2759_v18 = vpop.xlane.xlu0 %2758 }
 0x58c   : > { %8860 = vpow2.f32 %v2784_v16  ;;  %v2776_v46 = vsub.f32 %v2510_v60, %v2762_v44  ;;  %v2775_v21 = vsub.f32 %v2432_v59, %v2759_v18 }
 0x58e   : > { %v2788_v53 = vmul.f32 1.442695, %v2776_v46  ;;  %v2786_v26 = vmul.f32 1.442695, %v2775_v21 }
 0x58f   : > { %v2768_v29 = vpop.xlane.xlu1 %2767  ;;  %v2765_v49 = vpop.xlane.xlu0 %2764 }
 0x590   : > { %8862 = vpow2.f32 %v2788_v53  ;;  %v2778_v31 = vsub.f32 %v2666_v61, %v2768_v29  ;;  %v2777_v38 = vsub.f32 %v2588_v2, %v2765_v49 }
 0x591   : > { %8864 = vpow2.f32 %v2786_v26 }
 0x592   : > { %v2792_v39 = vmul.f32 1.442695, %v2778_v31  ;;  %v2790_v43 = vmul.f32 1.442695, %v2777_v38 }
 0x593   : > { %v2837_v45 = vpop.permute.xlu1 %2836  ;;  %v2771_v47 = vpop.xlane.xlu0 %2770 }
 0x594   : > { %8866 = vpow2.f32 %v2792_v39  ;;  %v2779_v48 = vsub.f32 %v2744_v7, %v2771_v47  ;;  %8387 = vmatpush3.msra.mxu1 %v2837_v45 }
 0x595   : > { %v8857_v50 = vpop.eup %8856  ;;  %8868 = vpow2.f32 %v2790_v43  ;;  %8396 = vmatprep.subr.mxu1 %v9080_v37 }
 0x596   : > { %v2794_v51 = vmul.f32 1.442695, %v2779_v48  ;;  %v2796_v55 = vsel %vm624_vm1, %v8857_v50, 0.0 }
 0x597   : > { %2797 = vadd.xlane.f32.xlu1 %v2796_v55  ;;  %v2913_v56 = vpop.permute.xlu0 %2912  ;;  %v2989_v7 = vpop.permute.xlu1 %2988  ;;  %v8797_v55 = vld [vmem:[%s10644_s5] sm:$0xff]  }
 0x598   : > { %v8859_v57 = vpop.eup %8858  ;;  %8870 = vpow2.f32 %v2794_v51  ;;  %8392 = vmatpush3.msra.mxu0 %v2913_v56  ;;  %v8796_v51 = vld [vmem:[%s10644_s5 + $0x8] sm:$0xff]  }
 0x599   : > { %v8861_v58 = vpop.eup %8860  ;;  %v2799_v59 = vsel %vm624_vm1, %v8859_v57, 0.0  ;;  %8401 = vmatprep.subr.mxu0 %v9080_v37 }
 0x59a   : > { %2800 = vadd.xlane.f32.xlu0 %v2799_v59  ;;  %v2802_v60 = vsel %vm624_vm1, %v8861_v58, 0.0 }
 0x59b   : > { %2803 = vadd.xlane.f32.xlu1 %v2802_v60  ;;  %v3065_v8 = vpop.permute.xlu1 %3064  ;;  %v3141_v10 = vpop.permute.xlu0 %3140 }
 0x59d   : > { %v8863_v62 = vpop.eup %8862 }
 0x59e   : > { %v8865_v63 = vpop.eup %8864  ;;  %v2808_v0 = vsel %vm624_vm1, %v8863_v62, 0.0 }
 0x59f   : > { %2809 = vadd.xlane.f32.xlu1 %v2808_v0  ;;  %v2805_v1 = vsel %vm624_vm1, %v8865_v63, 0.0  ;;  %v3217_v9 = vpop.permute.xlu1 %3216 }
 0x5a0   : > { %2806 = vadd.xlane.f32.xlu0 %v2805_v1 }
 0x5a1   : > { %v8867_v2 = vpop.eup %8866 }
 0x5a2   : > { %v9600_v61 = vpop.eup %8868  ;;  %v2814_v3 = vsel %vm624_vm1, %v8867_v2, 0.0 }
 0x5a3   : > { %2815 = vadd.xlane.f32.xlu1 %v2814_v3  ;;  %v2811_v4 = vsel %vm624_vm1, %v9600_v61, 0.0 }
 0x5a4   : > { %2812 = vadd.xlane.f32.xlu0 %v2811_v4 }
 0x5a5   : > { %v9605_v5 = vpop.eup %8870 }
 0x5a6   : > { %v2817_v6 = vsel %vm624_vm1, %v9605_v5, 0.0 }
 0x5a8   : > { %2818 = vadd.xlane.f32.xlu0 %v2817_v6 }
 0x5b4   : > { %3368 = vrot.lane.b32.xlu1 %v9322_v54, %s10613_s22 }
 0x5be   : > { %3292 = vrot.lane.b32.xlu0 %v9314_v52, %s10613_s22  ;;  %s10652_s22 = smov 48  }
 0x620   : > { %v2798_v11 = vpop.xlane.xlu1 %2797 }
 0x621   : > { %8872 = vrcp.f32 %v2798_v11 }
 0x623   : > { %v2801_v12 = vpop.xlane.xlu0 %2800 }
 0x624   : > { %8874 = vrcp.f32 %v2801_v12  ;;  %v2804_v13 = vpop.xlane.xlu1 %2803 }
 0x625   : > { %8876 = vrcp.f32 %v2804_v13 }
 0x628   : > { %v2810_v42 = vpop.xlane.xlu1 %2809 }
 0x629   : > { %8878 = vrcp.f32 %v2810_v42  ;;  %v2807_v14 = vpop.xlane.xlu0 %2806 }
 0x62a   : > { %8880 = vrcp.f32 %v2807_v14 }
 0x62c   : > { %v2816_v40 = vpop.xlane.xlu1 %2815 }
 0x62d   : > { %8882 = vrcp.f32 %v2816_v40  ;;  %v2813_v54 = vpop.xlane.xlu0 %2812 }
 0x62e   : > { %v8873_v15 = vpop.eup %8872  ;;  %8884 = vrcp.f32 %v2813_v54 }
 0x62f   : > { %v2828_v52 = vmul.f32 %v8873_v15, %v8857_v50 }
 0x630   : > { %v3369_v47 = vpop.permute.xlu1 %3368 }
 0x631   : > { %v8875_v16 = vpop.eup %8874  ;;  %v2819_v44 = vpop.xlane.xlu0 %2818  ;;  %8389 = vmatmul.mubr.msk.f32.vlgmr.msra.gmra.mxu1 %vm624_vm1, %v2828_v52 }
 0x632   : > { %v8877_v18 = vpop.eup %8876  ;;  %8886 = vrcp.f32 %v2819_v44  ;;  %8397 = vmatpush3.msra.mxu1 %v2989_v7  ;;  %v2829_v46 = vmul.f32 %v8875_v16, %v8859_v57  ;;  %8398 = vmatprep.mubr.msk.f32.mxu1 %vm9081_vm3, %v9080_v37 }
 0x633   : > { %8406 = vmatprep.subr.mxu1 %v9080_v37  ;;  %v2830_v21 = vmul.f32 %v8877_v18, %v8861_v58 }
 0x634   : > { %8394 = vmatmul.mubr.msk.f32.vlgmr.msra.gmra.mxu0 %vm624_vm1, %v2829_v46 }
 0x635   : > { %8402 = vmatpush3.msra.mxu0 %v3065_v8  ;;  %8399 = vmatmul.mubr.msk.f32.vlgmr.msra.gmra.mxu1 %vm624_vm1, %v2830_v21  ;;  %v3293_v31 = vpop.permute.xlu0 %3292 }
 0x636   : > { %v8879_v53 = vpop.eup %8878  ;;  %8407 = vmatpush3.msra.mxu1 %v3141_v10  ;;  %8403 = vmatprep.mubr.msk.f32.mxu0 %vm9081_vm3, %v9080_v37 }
 0x637   : > { %v8881_v26 = vpop.eup %8880  ;;  %8408 = vmatprep.mubr.msk.f32.mxu1 %vm9081_vm3, %v9080_v37  ;;  %8411 = vmatprep.subr.mxu0 %v9080_v37  ;;  %v2832_v29 = vmul.f32 %v8879_v53, %v8863_v62 }
 0x638   : > { %8416 = vmatprep.subr.mxu1 %v9080_v37  ;;  %v2831_v49 = vmul.f32 %v8881_v26, %v8865_v63 }
 0x639   : > { %8409 = vmatmul.mubr.msk.f32.vlgmr.msra.gmra.mxu1 %vm624_vm1, %v2832_v29 }
 0x63a   : > { %v8883_v38 = vpop.eup %8882  ;;  %8404 = vmatmul.mubr.msk.f32.vlgmr.msra.gmra.mxu0 %vm624_vm1, %v2831_v49  ;;  %8417 = vmatpush3.msra.mxu1 %v3293_v31 }
 0x63b   : > { %v8885_v39 = vpop.eup %8884  ;;  %8412 = vmatpush3.msra.mxu0 %v3217_v9  ;;  %8413 = vmatprep.mubr.msk.f32.mxu0 %vm9081_vm3, %v9080_v37  ;;  %v2834_v43 = vmul.f32 %v8883_v38, %v8867_v2 }
 0x63c   : > { %8418 = vmatprep.mubr.msk.f32.mxu1 %vm9081_vm3, %v9080_v37  ;;  %8421 = vmatprep.subr.mxu0 %v9080_v37  ;;  %v2833_v45 = vmul.f32 %v8885_v39, %v9600_v61 }
 0x63d   : > { %8419 = vmatmul.mubr.msk.f32.vlgmr.msra.gmra.mxu1 %vm624_vm1, %v2834_v43  ;;  %8426 = vmatprep.subr.bf16.mxu1 %v8796_v51 }
 0x63e   : > { %8414 = vmatmul.mubr.msk.f32.vlgmr.msra.gmra.mxu0 %vm624_vm1, %v2833_v45  ;;  %8427 = vmatpush3.bf16.msra.mxu1 %v8796_v51 }
 0x63f   : > { %v8887_v48 = vpop.eup %8886  ;;  %8422 = vmatpush3.msra.mxu0 %v3369_v47  ;;  %8423 = vmatprep.mubr.msk.f32.mxu0 %vm9081_vm3, %v9080_v37 }
 0x640   : > { %v2835_v50 = vmul.f32 %v8887_v48, %v9605_v5  ;;  %8428 = vmatprep.subr.bf16.mxu1 %v8797_v55 }
 0x642   : > { %8424 = vmatmul.mubr.msk.f32.vlgmr.msra.gmra.mxu0 %vm624_vm1, %v2835_v50  ;;  %8429 = vmatpush3.bf16.msra.mxu1 %v8797_v55 }
 0x6f1   : > { %v2908_v56 = vpop.f32.mrf.mxu1 }
 0x6f3   : > { %v8390_v57 = vpop.f32.mrf.mxu1 }
 0x6f4   : > { %v2984_v58 = vpop.f32.mrf.mxu0 }
 0x6f5   : > { %v8754_v59 = vpack.i.bf16 %v2984_v58, %v2908_v56  ;;  %v3060_v60 = vpop.f32.mrf.mxu1 }
 0x6f6   : > { %v8395_v62 = vpop.f32.mrf.mxu0 }
 0x6f7   : > { %8755 = vrot.lane.b32.xlu0 %v8754_v59, %s10617_s2  ;;  %v8400_v63 = vpop.f32.mrf.mxu1 }
 0x6f9   : > { %v3212_v0 = vpop.f32.mrf.mxu1 }
 0x6fa   : > { %v3136_v1 = vpop.f32.mrf.mxu0 }
 0x6fb   : > { %v8759_v2 = vpack.i.bf16 %v3136_v1, %v3060_v60  ;;  %v8410_v61 = vpop.f32.mrf.mxu1 }
 0x6fc   : > { %v8405_v3 = vpop.f32.mrf.mxu0 }
 0x6fd   : > { %8760 = vrot.lane.b32.xlu1 %v8759_v2, %s10617_s2  ;;  %v3364_v4 = vpop.f32.mrf.mxu1 }
 0x6fe   : > { %v3288_v5 = vpop.f32.mrf.mxu0 }
 0x6ff   : > { %v8764_v6 = vpack.i.bf16 %v3288_v5, %v3212_v0  ;;  %v8420_v7 = vpop.f32.mrf.mxu1 }
 0x700   : > { %v8415_v8 = vpop.f32.mrf.mxu0 }
 0x701   : > { %8765 = vrot.lane.b32.xlu0 %v8764_v6, %s10617_s2 }
 0x702   : > { %v3440_v9 = vpop.f32.mrf.mxu0 }
 0x703   : > { %v8769_v10 = vpack.i.bf16 %v3440_v9, %v3364_v4 }
 0x704   : > { %v8425_v11 = vpop.f32.mrf.mxu0 }
 0x705   : > { %8770 = vrot.lane.b32.xlu1 %v8769_v10, %s10617_s2 }
 0x769   : > { %v8756_v12 = vpop.permute.xlu0 %8755 }
 0x76a   : > { %v8758_v13 = vunpack.i.h.bf16 %v8756_v12  ;;  %v8757_v42 = vunpack.i.l.bf16 %v8756_v12 }
 0x76c   : > { %v3477_v14 = vsel %vm814_vm4, %v9559_v19, %v8758_v13  ;;  %v3476_v40 = vsel %vm814_vm4, %v9557_v17, %v8757_v42 }
 0x76d   : > { %v3488_v54 = vpack.c.bf16 %v3477_v14, %v3476_v40 }
 0x76f   : > { %v8761_v15 = vpop.permute.xlu1 %8760  ;;  %8430 = vmatprep.mubr.msk.bf16.mxu1 %vm733_vm2, %v3488_v54 }
 0x770   : > { %v8763_v52 = vunpack.i.h.bf16 %v8761_v15  ;;  %v8762_v16 = vunpack.i.l.bf16 %v8761_v15 }
 0x772   : > { %v3479_v44 = vsel %vm814_vm4, %v9563_v27, %v8763_v52  ;;  %v3478_v18 = vsel %vm814_vm4, %v9561_v25, %v8762_v16 }
 0x773   : > { %v3489_v46 = vpack.c.bf16 %v3479_v44, %v3478_v18  ;;  %v8766_v21 = vpop.permute.xlu0 %8765 }
 0x774   : > { %v8768_v53 = vunpack.i.h.bf16 %v8766_v21  ;;  %v8767_v26 = vunpack.i.l.bf16 %v8766_v21 }
 0x775   : > { %8431 = vmatmul.mubr.msk.bf16.vlgmr.msra.gmra.mxu1 %vm733_vm2, %v3489_v46 }
 0x776   : > { %v3481_v17 = vsel %vm814_vm4, %v9567_v35, %v8768_v53  ;;  %v3480_v19 = vsel %vm814_vm4, %v9565_v28, %v8767_v26  ;;  %v7893_v28 = vld [vmem:[%s10645_s6] ss:$0 sm:$0xff] }
 0x777   : > { %v8771_v29 = vpop.permute.xlu1 %8770  ;;  %v3490_v49 = vpack.c.bf16 %v3481_v17, %v3480_v19 }
 0x778   : > { %v8773_v31 = vunpack.i.h.bf16 %v8771_v29  ;;  %v8772_v38 = vunpack.i.l.bf16 %v8771_v29 }
 0x779   : > { %8434 = vmatprep.mubr.msk.bf16.mxu1 %vm733_vm2, %v3490_v49 }
 0x77a   : > { %v3483_v25 = vsel %vm814_vm4, %v9571_v41, %v8773_v31  ;;  %v3482_v27 = vsel %vm814_vm4, %v9569_v36, %v8772_v38 }
 0x77b   : > { %v3491_v39 = vpack.c.bf16 %v3483_v25, %v3482_v27 }
 0x77d   : > { %8435 = vmatmul.mubr.msk.bf16.gmra.mxu1 %vm733_vm2, %v3491_v39 }
 0x835   : > { %v8432_v43 = vpop.f32.mrf.mxu1 }
 0x836   : > { %v3566_v45 = vadd.f32 %v8432_v43, %v7893_v28 }
 0x837   : > { %v3557_v35 = vpop.f32.mrf.mxu1 }
 0x838   : > { %v3558_v47 = vadd.f32 %v7893_v28, %v3557_v35  ;;  %v3590_v36 = vadd.f32 %v3566_v45, %v9263_v24 }
 0x839   : > { %v8433_v48 = vpop.f32.mrf.mxu1 }
 0x83a   : > { %v3588_v50 = vadd.f32 %v3558_v47, %v9259_v22  ;;  %v3569_v51 = vadd.f32 %v8433_v48, %v7893_v28  ;;  %v3604_v22 = vsel %vm733_vm2, %v3590_v36, 0.0 }
 0x83b   : > { %v3560_v55 = vpop.f32.mrf.mxu1 }
 0x83c   : > { %v3561_v41 = vadd.f32 %v7893_v28, %v3560_v55  ;;  %v3598_v56 = vsel %vm733_vm2, %v3588_v50, 0.0  ;;  %v3591_v60 = vadd.f32 %v3569_v51, %v9257_v20 }
 0x83d   : > { %v8436_v57 = vpop.f32.mrf.mxu1  ;;  %3599 = vadd.xlane.f32.xlu0 %v3598_v56  ;;  %v8798_v56 = vld [vmem:[%s10646_s7 + $0x8] sm:$0xff]  }
 0x83e   : > { %v3589_v58 = vadd.f32 %v3561_v41, %v9261_v23  ;;  %v3582_v62 = vadd.f32 %v8436_v57, %v7893_v28  ;;  %v3607_v24 = vsel %vm733_vm2, %v3591_v60, 0.0  ;;  %8438 = vmatprep.subr.bf16.mxu0 %v8798_v56  ;;  %v8800_v57 = vld [vmem:[%s10598_s9 + $0x38] sm:$0xff]  }
 0x83f   : > { %v3573_v59 = vpop.f32.mrf.mxu1  ;;  %8439 = vmatpush3.bf16.msra.mxu0 %v8798_v56  ;;  %8450 = vmatprep.subr.bf16.mxu1 %v8800_v57 }
 0x840   : > { %v3574_v63 = vadd.f32 %v7893_v28, %v3573_v59  ;;  %v3601_v0 = vsel %vm733_vm2, %v3589_v58, 0.0  ;;  %v3594_v20 = vadd.f32 %v3582_v62, %v9277_v34  ;;  %8451 = vmatpush3.bf16.msra.mxu1 %v8800_v57  ;;  %v8802_v59 = vld [vmem:[%s10598_s9 + $0x28] sm:$0xff]   ;;  %v8804_v62 = vld [vmem:[%s10598_s9 + $0x18] sm:$0xff]  }
 0x841   : > { %v8437_v1 = vpop.f32.mrf.mxu1  ;;  %3602 = vadd.xlane.f32.xlu1 %v3601_v0  ;;  %3605 = vadd.xlane.f32.xlu0 %v3604_v22 }
 0x842   : > { %v3592_v2 = vadd.f32 %v3574_v63, %v9273_v32  ;;  %v3585_v3 = vadd.f32 %v8437_v1, %v7893_v28  ;;  %v3616_v6 = vsel %vm733_vm2, %v3594_v20, 0.0 }
 0x843   : > { %v3576_v61 = vpop.f32.mrf.mxu1 }
 0x844   : > { %v3577_v4 = vadd.f32 %v7893_v28, %v3576_v61  ;;  %v3610_v23 = vsel %vm733_vm2, %v3592_v2, 0.0  ;;  %v3595_v8 = vadd.f32 %v3585_v3, %v9271_v30 }
 0x845   : > { %3611 = vadd.xlane.f32.xlu1 %v3610_v23  ;;  %3608 = vadd.xlane.f32.xlu0 %v3607_v24 }
 0x846   : > { %v3593_v5 = vadd.f32 %v3577_v4, %v9275_v33  ;;  %v3619_v32 = vsel %vm733_vm2, %v3595_v8, 0.0 }
 0x848   : > { %v3613_v7 = vsel %vm733_vm2, %v3593_v5, 0.0 }
 0x849   : > { %3617 = vadd.xlane.f32.xlu1 %v3616_v6  ;;  %3614 = vadd.xlane.f32.xlu0 %v3613_v7 }
 0x84d   : > { %3620 = vadd.xlane.f32.xlu0 %v3619_v32 }
 0x8c6   : > { %v3600_v9 = vpop.xlane.xlu0 %3599 }
 0x8c7   : > { %v3623_v10 = vmul.f32 0.03125, %v3600_v9 }
 0x8c9   : > { %v9688_v11 = vsub.f32 %v3588_v50, %v3623_v10 }
 0x8ca   : > { %v3603_v34 = vpop.xlane.xlu1 %3602  ;;  %v3606_v12 = vpop.xlane.xlu0 %3605 }
 0x8cb   : > { %v3624_v13 = vmul.f32 0.03125, %v3603_v34  ;;  %v3625_v42 = vmul.f32 0.03125, %v3606_v12  ;;  %v3639_v33 = vmul.f32 %v9688_v11, %v9688_v11 }
 0x8cd   : > { %v9692_v14 = vsub.f32 %v3589_v58, %v3624_v13  ;;  %v9694_v40 = vsub.f32 %v3590_v36, %v3625_v42  ;;  %v3647_v30 = vsel %vm733_vm2, %v3639_v33, 0.0  ;;  %v8799_v36 = vld [vmem:[%s10646_s7] sm:$0xff]   ;;  %v8801_v58 = vld [vmem:[%s10598_s9 + $0x30] sm:$0xff]  }
 0x8ce   : > { %v3612_v54 = vpop.xlane.xlu1 %3611  ;;  %3648 = vadd.xlane.f32.xlu1 %v3647_v30  ;;  %v3609_v15 = vpop.xlane.xlu0 %3608  ;;  %8440 = vmatprep.subr.bf16.mxu0 %v8799_v36 }
 0x8cf   : > { %v3627_v52 = vmul.f32 0.03125, %v3612_v54  ;;  %v3626_v16 = vmul.f32 0.03125, %v3609_v15  ;;  %v3640_v44 = vmul.f32 %v9692_v14, %v9692_v14  ;;  %v3641_v18 = vmul.f32 %v9694_v40, %v9694_v40  ;;  %8441 = vmatpush3.bf16.msra.mxu0 %v8799_v36  ;;  %8452 = vmatprep.subr.bf16.mxu1 %v8801_v58 }
 0x8d0   : > { %8453 = vmatpush3.bf16.msra.mxu1 %v8801_v58 }
 0x8d1   : > { %v9701_v46 = vsub.f32 %v3592_v2, %v3627_v52  ;;  %v9703_v21 = vsub.f32 %v3591_v60, %v3626_v16  ;;  %v3650_v53 = vsel %vm733_vm2, %v3640_v44, 0.0  ;;  %v3653_v26 = vsel %vm733_vm2, %v3641_v18, 0.0  ;;  %8454 = vmatprep.subr.bf16.mxu1 %v8802_v59  ;;  %v8803_v60 = vld [vmem:[%s10598_s9 + $0x20] sm:$0xff]  }
 0x8d2   : > { %v3618_v17 = vpop.xlane.xlu1 %3617  ;;  %3651 = vadd.xlane.f32.xlu0 %v3650_v53  ;;  %3654 = vadd.xlane.f32.xlu1 %v3653_v26  ;;  %v3615_v19 = vpop.xlane.xlu0 %3614  ;;  %v7900_v52 = vld [vmem:[%s10600_s11] ss:$0 sm:$0xff] }
 0x8d3   : > { %v3629_v29 = vmul.f32 0.03125, %v3618_v17  ;;  %v3628_v49 = vmul.f32 0.03125, %v3615_v19  ;;  %v3643_v31 = vmul.f32 %v9701_v46, %v9701_v46  ;;  %v3642_v38 = vmul.f32 %v9703_v21, %v9703_v21  ;;  %v7901_v26 = vld [vmem:[%s10601_s12] ss:$0 sm:$0xff] }
 0x8d4   : > { %8455 = vmatpush3.bf16.msra.mxu1 %v8802_v59 }
 0x8d5   : > { %v9711_v25 = vsub.f32 %v3594_v20, %v3629_v29  ;;  %v9713_v27 = vsub.f32 %v3593_v5, %v3628_v49  ;;  %v3659_v39 = vsel %vm733_vm2, %v3643_v31, 0.0  ;;  %v3656_v43 = vsel %vm733_vm2, %v3642_v38, 0.0  ;;  %8456 = vmatprep.subr.bf16.mxu1 %v8803_v60 }
 0x8d6   : > { %3660 = vadd.xlane.f32.xlu1 %v3659_v39  ;;  %3657 = vadd.xlane.f32.xlu0 %v3656_v43  ;;  %v3621_v28 = vpop.xlane.xlu0 %3620 }
 0x8d7   : > { %v3630_v35 = vmul.f32 0.03125, %v3621_v28  ;;  %v3645_v45 = vmul.f32 %v9711_v25, %v9711_v25  ;;  %v3644_v47 = vmul.f32 %v9713_v27, %v9713_v27 }
 0x8d8   : > { %8457 = vmatpush3.bf16.msra.mxu1 %v8803_v60 }
 0x8d9   : > { %v9721_v48 = vsub.f32 %v3595_v8, %v3630_v35  ;;  %v3665_v50 = vsel %vm733_vm2, %v3645_v45, 0.0  ;;  %v3662_v51 = vsel %vm733_vm2, %v3644_v47, 0.0  ;;  %8458 = vmatprep.subr.bf16.mxu1 %v8804_v62 }
 0x8da   : > { %3666 = vadd.xlane.f32.xlu1 %v3665_v50  ;;  %3663 = vadd.xlane.f32.xlu0 %v3662_v51 }
 0x8db   : > { %v3646_v55 = vmul.f32 %v9721_v48, %v9721_v48 }
 0x8dc   : > { %8459 = vmatpush3.bf16.msra.mxu1 %v8804_v62  ;;  %v8805_v62 = vld [vmem:[%s10598_s9 + $0x10] sm:$0xff]  }
 0x8dd   : > { %v3668_v41 = vsel %vm733_vm2, %v3646_v55, 0.0  ;;  %8460 = vmatprep.subr.bf16.mxu1 %v8805_v62 }
 0x8de   : > { %3669 = vadd.xlane.f32.xlu0 %v3668_v41 }
 0x8e0   : > { %8461 = vmatpush3.bf16.msra.mxu1 %v8805_v62 }
 0x957   : > { %v3649_v63 = vpop.xlane.xlu1 %3648 }
 0x958   : > { %v3671_v0 = vmul.f32 0.03125, %v3649_v63  ;;  %v8806_v63 = vld [vmem:[%s10598_s9 + $0x8] sm:$0xff]  }
 0x959   : > { %8462 = vmatprep.subr.bf16.mxu1 %v8806_v63 }
 0x95a   : > { %v3679_v22 = vadd.f32 1e-05, %v3671_v0  ;;  %8463 = vmatpush3.bf16.msra.mxu1 %v8806_v63  ;;  %v8807_v0 = vld [vmem:[%s10598_s9] sm:$0xff]  }
 0x95b   : > { %v3655_v1 = vpop.xlane.xlu1 %3654  ;;  %v3652_v2 = vpop.xlane.xlu0 %3651  ;;  %8464 = vmatprep.subr.bf16.mxu1 %v8807_v0 }
 0x95c   : > { %8888 = vrsqrt.f32 %v3679_v22  ;;  %v3673_v61 = vmul.f32 0.03125, %v3655_v1  ;;  %v3672_v24 = vmul.f32 0.03125, %v3652_v2  ;;  %v7902_v2 = vld [vmem:[%s10647_s8] ss:$0 sm:$0xff] }
 0x95e   : > { %v3681_v3 = vadd.f32 1e-05, %v3673_v61  ;;  %v3680_v4 = vadd.f32 1e-05, %v3672_v24  ;;  %8465 = vmatpush3.bf16.msra.mxu1 %v8807_v0 }
 0x95f   : > { %v3661_v23 = vpop.xlane.xlu1 %3660  ;;  %v3658_v20 = vpop.xlane.xlu0 %3657  ;;  %8506 = vmatprep.subr.mxu1 %v9080_v37 }
 0x960   : > { %8890 = vrsqrt.f32 %v3681_v3  ;;  %v3675_v5 = vmul.f32 0.03125, %v3661_v23  ;;  %v3674_v6 = vmul.f32 0.03125, %v3658_v20 }
 0x961   : > { %8892 = vrsqrt.f32 %v3680_v4 }
 0x962   : > { %v3683_v7 = vadd.f32 1e-05, %v3675_v5  ;;  %v3682_v8 = vadd.f32 1e-05, %v3674_v6 }
 0x963   : > { %v3667_v32 = vpop.xlane.xlu1 %3666  ;;  %v3664_v9 = vpop.xlane.xlu0 %3663 }
 0x964   : > { %8894 = vrsqrt.f32 %v3683_v7  ;;  %v3677_v10 = vmul.f32 0.03125, %v3667_v32  ;;  %v3676_v34 = vmul.f32 0.03125, %v3664_v9 }
 0x965   : > { %8896 = vrsqrt.f32 %v3682_v8 }
 0x966   : > { %v3685_v12 = vadd.f32 1e-05, %v3677_v10  ;;  %v3684_v13 = vadd.f32 1e-05, %v3676_v34 }
 0x967   : > { %v3670_v42 = vpop.xlane.xlu0 %3669 }
 0x968   : > { %8898 = vrsqrt.f32 %v3685_v12  ;;  %v3678_v33 = vmul.f32 0.03125, %v3670_v42 }
 0x969   : > { %v8889_v30 = vpop.eup %8888  ;;  %8900 = vrsqrt.f32 %v3684_v13 }
 0x96a   : > { %v3686_v54 = vadd.f32 1e-05, %v3678_v33  ;;  %v3695_v15 = vmul.f32 %v8889_v30, %v9688_v11 }
 0x96c   : > { %8902 = vrsqrt.f32 %v3686_v54  ;;  %v3709_v18 = vmul.f32 %v7900_v52, %v3695_v15 }
 0x96d   : > { %v8891_v16 = vpop.eup %8890 }
 0x96e   : > { %v8893_v44 = vpop.eup %8892  ;;  %v3697_v53 = vmul.f32 %v8891_v16, %v9694_v40  ;;  %v9758_v11 = vadd.f32 %v7901_v26, %v3709_v18 }
 0x96f   : > { %v3696_v17 = vmul.f32 %v8893_v44, %v9692_v14 }
 0x970   : > { %v3711_v39 = vmul.f32 %v7900_v52, %v3697_v53 }
 0x971   : > { %v8895_v19 = vpop.eup %8894  ;;  %v3710_v29 = vmul.f32 %v7900_v52, %v3696_v17  ;;  %v7909_v17 = vld [vmem:[%s10599_s10] ss:$0 sm:$0xff] }
 0x972   : > { %v8897_v49 = vpop.eup %8896  ;;  %v3699_v43 = vmul.f32 %v8895_v19, %v9701_v46  ;;  %v9768_v47 = vadd.f32 %v7901_v26, %v3711_v39 }
 0x973   : > { %v3698_v31 = vmul.f32 %v8897_v49, %v9703_v21  ;;  %v9761_v38 = vadd.f32 %v7901_v26, %v3710_v29 }
 0x974   : > { %v3713_v51 = vmul.f32 %v7900_v52, %v3699_v43 }
 0x975   : > { %v8899_v28 = vpop.eup %8898  ;;  %v3735_v40 = vpack.c.bf16 %v9761_v38, %v9758_v11  ;;  %v3712_v35 = vmul.f32 %v7900_v52, %v3698_v31 }
 0x976   : > { %v8901_v45 = vpop.eup %8900  ;;  %v3701_v14 = vmul.f32 %v8899_v28, %v9711_v25  ;;  %v9777_v25 = vadd.f32 %v7901_v26, %v3713_v51 }
 0x977   : > { %8442 = vmatprep.mubr.msk.bf16.mxu0 %vm733_vm2, %v3735_v40  ;;  %v9770_v50 = vadd.f32 %v7901_v26, %v3712_v35  ;;  %v3700_v21 = vmul.f32 %v8901_v45, %v9713_v27 }
 0x978   : > { %v3715_v36 = vmul.f32 %v7900_v52, %v3701_v14 }
 0x979   : > { %v8903_v55 = vpop.eup %8902  ;;  %v3736_v46 = vpack.c.bf16 %v9770_v50, %v9768_v47  ;;  %v3714_v41 = vmul.f32 %v7900_v52, %v3700_v21 }
 0x97a   : > { %v3702_v56 = vmul.f32 %v8903_v55, %v9721_v48  ;;  %v9783_v27 = vadd.f32 %v7901_v26, %v3715_v36 }
 0x97b   : > { %8443 = vmatmul.mubr.msk.bf16.vlgmr.msra.gmra.mxu0 %vm733_vm2, %v3736_v46  ;;  %v9779_v57 = vadd.f32 %v7901_v26, %v3714_v41 }
 0x97c   : > { %v3716_v58 = vmul.f32 %v7900_v52, %v3702_v56 }
 0x97d   : > { %v3737_v59 = vpack.c.bf16 %v9779_v57, %v9777_v25 }
 0x97e   : > { %v9785_v60 = vadd.f32 %v7901_v26, %v3716_v58 }
 0x97f   : > { %8446 = vmatprep.mubr.msk.bf16.mxu0 %vm733_vm2, %v3737_v59 }
 0x980   : > { %v3738_v48 = vpack.c.bf16 %v9785_v60, %v9783_v27 }
 0x983   : > { %8447 = vmatmul.mubr.msk.bf16.gmra.mxu0 %vm733_vm2, %v3738_v48 }
 0xa3b   : > { %v8444_v22 = vpop.f32.mrf.mxu0 }
 0xa3c   : > { %v3813_v4 = vadd.f32 %v8444_v22, %v7902_v2 }
 0xa3d   : > { %v3804_v1 = vpop.f32.mrf.mxu0 }
 0xa3e   : > { %v3805_v24 = vadd.f32 %v7902_v2, %v3804_v1  ;;  %v3837_v32 = vmax.f32 %v3813_v4, 0.0 }
 0xa3f   : > { %v8445_v61 = vpop.f32.mrf.mxu0 }
 0xa40   : > { %v3816_v3 = vadd.f32 %v8445_v61, %v7902_v2  ;;  %v3835_v7 = vmax.f32 %v3805_v24, 0.0 }
 0xa41   : > { %v3807_v23 = vpop.f32.mrf.mxu0 }
 0xa42   : > { %v3808_v20 = vadd.f32 %v7902_v2, %v3807_v23  ;;  %v3838_v5 = vmax.f32 %v3816_v3, 0.0 }
 0xa43   : > { %v8448_v6 = vpop.f32.mrf.mxu0 }
 0xa44   : > { %v3836_v8 = vmax.f32 %v3808_v20, 0.0  ;;  %v3860_v34 = vpack.c.bf16 %v3838_v5, %v3837_v32  ;;  %v3829_v33 = vadd.f32 %v8448_v6, %v7902_v2 }
 0xa45   : > { %v3820_v9 = vpop.f32.mrf.mxu0 }
 0xa46   : > { %v3859_v10 = vpack.c.bf16 %v3836_v8, %v3835_v7  ;;  %v3821_v13 = vadd.f32 %v7902_v2, %v3820_v9  ;;  %v3841_v44 = vmax.f32 %v3829_v33, 0.0 }
 0xa47   : > { %v8449_v12 = vpop.f32.mrf.mxu0 }
 0xa48   : > { %v3832_v42 = vadd.f32 %v8449_v12, %v7902_v2  ;;  %8466 = vmatprep.mubr.bf16.mxu1 %v3859_v10  ;;  %v3839_v52 = vmax.f32 %v3821_v13, 0.0 }
 0xa49   : > { %v3823_v30 = vpop.f32.mrf.mxu0  ;;  %8467 = vmatmul.mubr.bf16.vlgmr.msra.gmra.mxu1 %v3860_v34 }
 0xa4a   : > { %v3824_v54 = vadd.f32 %v7902_v2, %v3823_v30  ;;  %v3842_v15 = vmax.f32 %v3832_v42, 0.0 }
 0xa4c   : > { %v3840_v16 = vmax.f32 %v3824_v54, 0.0  ;;  %v3862_v53 = vpack.c.bf16 %v3842_v15, %v3841_v44 }
 0xa4e   : > { %v3861_v18 = vpack.c.bf16 %v3840_v16, %v3839_v52 }
 0xa50   : > { %8470 = vmatprep.mubr.bf16.mxu1 %v3861_v18 }
 0xa51   : > { %8471 = vmatmul.mubr.bf16.gmra.mxu1 %v3862_v53 }
 0xa52   : > { %8508 = vmatprep.mubr.msk.f32.mxu1 %vm9081_vm3, %v9080_v37 }
 0xb09   : > { %v8468_v26 = vpop.f32.mrf.mxu1 }
 0xb0a   : > { %v3961_v29 = vadd.f32 %v8468_v26, %v7909_v17 }
 0xb0b   : > { %v3952_v19 = vpop.f32.mrf.mxu1 }
 0xb0c   : > { %v3953_v49 = vadd.f32 %v7909_v17, %v3952_v19  ;;  %v3985_v45 = vadd.f32 %v3961_v29, %v9768_v47 }
 0xb0d   : > { %v8469_v31 = vpop.f32.mrf.mxu1 }
 0xb0e   : > { %v3983_v39 = vadd.f32 %v3953_v49, %v9758_v11  ;;  %v3964_v43 = vadd.f32 %v8469_v31, %v7909_v17  ;;  %v3999_v11 = vsel %vm733_vm2, %v3985_v45, 0.0 }
 0xb0f   : > { %v3955_v28 = vpop.f32.mrf.mxu1 }
 0xb10   : > { %v3956_v40 = vadd.f32 %v7909_v17, %v3955_v28  ;;  %v3993_v35 = vsel %vm733_vm2, %v3983_v39, 0.0  ;;  %v3986_v55 = vadd.f32 %v3964_v43, %v9770_v50 }
 0xb11   : > { %3994 = vadd.xlane.f32.xlu1 %v3993_v35  ;;  %v8472_v14 = vpop.f32.mrf.mxu1  ;;  %v8808_v35 = vld [vmem:[%s10641_s27 + $0x18] sm:$0xff]  }
 0xb12   : > { %v3984_v21 = vadd.f32 %v3956_v40, %v9761_v38  ;;  %v3977_v46 = vadd.f32 %v8472_v14, %v7909_v17  ;;  %v4002_v47 = vsel %vm733_vm2, %v3986_v55, 0.0  ;;  %8474 = vmatprep.subr.bf16.mxu0 %v8808_v35 }
 0xb13   : > { %v3968_v51 = vpop.f32.mrf.mxu1  ;;  %8475 = vmatpush3.bf16.msra.mxu0 %v8808_v35 }
 0xb14   : > { %v3969_v41 = vadd.f32 %v7909_v17, %v3968_v51  ;;  %v3996_v56 = vsel %vm733_vm2, %v3984_v21, 0.0  ;;  %v3989_v50 = vadd.f32 %v3977_v46, %v9783_v27 }
 0xb15   : > { %3997 = vadd.xlane.f32.xlu0 %v3996_v56  ;;  %4000 = vadd.xlane.f32.xlu1 %v3999_v11  ;;  %v8473_v36 = vpop.f32.mrf.mxu1 }
 0xb16   : > { %v3987_v58 = vadd.f32 %v3969_v41, %v9777_v25  ;;  %v3980_v48 = vadd.f32 %v8473_v36, %v7909_v17  ;;  %v4011_v1 = vsel %vm733_vm2, %v3989_v50, 0.0 }
 0xb17   : > { %v3971_v59 = vpop.f32.mrf.mxu1 }
 0xb18   : > { %v3972_v62 = vadd.f32 %v7909_v17, %v3971_v59  ;;  %v4005_v38 = vsel %vm733_vm2, %v3987_v58, 0.0  ;;  %v3990_v0 = vadd.f32 %v3980_v48, %v9785_v60 }
 0xb19   : > { %4003 = vadd.xlane.f32.xlu0 %v4002_v47  ;;  %4006 = vadd.xlane.f32.xlu1 %v4005_v38 }
 0xb1a   : > { %v3988_v63 = vadd.f32 %v3972_v62, %v9779_v57  ;;  %v4014_v25 = vsel %vm733_vm2, %v3990_v0, 0.0 }
 0xb1c   : > { %v4008_v22 = vsel %vm733_vm2, %v3988_v63, 0.0 }
 0xb1d   : > { %4009 = vadd.xlane.f32.xlu0 %v4008_v22  ;;  %4012 = vadd.xlane.f32.xlu1 %v4011_v1 }
 0xb21   : > { %4015 = vadd.xlane.f32.xlu0 %v4014_v25 }
 0xb9a   : > { %v3995_v2 = vpop.xlane.xlu1 %3994 }
 0xb9b   : > { %v4017_v61 = vmul.f32 0.03125, %v3995_v2 }
 0xb9d   : > { %v9825_v24 = vsub.f32 %v3983_v39, %v4017_v61 }
 0xb9e   : > { %v4001_v27 = vpop.xlane.xlu1 %4000  ;;  %v3998_v3 = vpop.xlane.xlu0 %3997 }
 0xb9f   : > { %v4019_v4 = vmul.f32 0.03125, %v4001_v27  ;;  %v4018_v23 = vmul.f32 0.03125, %v3998_v3  ;;  %v4033_v57 = vmul.f32 %v9825_v24, %v9825_v24 }
 0xba1   : > { %v9829_v60 = vsub.f32 %v3985_v45, %v4019_v4  ;;  %v9831_v20 = vsub.f32 %v3984_v21, %v4018_v23  ;;  %v4041_v5 = vsel %vm733_vm2, %v4033_v57, 0.0  ;;  %v8809_v45 = vld [vmem:[%s10641_s27 + $0x10] sm:$0xff]   ;;  %v7918_v23 = vld [vmem:[%s10602_s13] ss:$0 sm:$0xff] }
 0xba2   : > { %4042 = vadd.xlane.f32.xlu1 %v4041_v5  ;;  %v4007_v6 = vpop.xlane.xlu1 %4006  ;;  %v4004_v7 = vpop.xlane.xlu0 %4003  ;;  %8476 = vmatprep.subr.bf16.mxu0 %v8809_v45 }
 0xba3   : > { %v4021_v8 = vmul.f32 0.03125, %v4007_v6  ;;  %v4020_v32 = vmul.f32 0.03125, %v4004_v7  ;;  %v4035_v9 = vmul.f32 %v9829_v60, %v9829_v60  ;;  %v4034_v10 = vmul.f32 %v9831_v20, %v9831_v20  ;;  %8477 = vmatpush3.bf16.msra.mxu0 %v8809_v45 }
 0xba4   : > { %8486 = vmatprep.subr.mxu0 %v9080_v37 }
 0xba5   : > { %v9838_v34 = vsub.f32 %v3987_v58, %v4021_v8  ;;  %v9840_v12 = vsub.f32 %v3986_v55, %v4020_v32  ;;  %v4047_v13 = vsel %vm733_vm2, %v4035_v9, 0.0  ;;  %v4044_v42 = vsel %vm733_vm2, %v4034_v10, 0.0  ;;  %v7919_v8 = vld [vmem:[%s10603_s14] ss:$0 sm:$0xff] }
 0xba6   : > { %4048 = vadd.xlane.f32.xlu1 %v4047_v13  ;;  %v4013_v33 = vpop.xlane.xlu1 %4012  ;;  %4045 = vadd.xlane.f32.xlu0 %v4044_v42  ;;  %v4010_v30 = vpop.xlane.xlu0 %4009 }
 0xba7   : > { %v4023_v54 = vmul.f32 0.03125, %v4013_v33  ;;  %v4022_v15 = vmul.f32 0.03125, %v4010_v30  ;;  %v4037_v52 = vmul.f32 %v9838_v34, %v9838_v34  ;;  %v4036_v16 = vmul.f32 %v9840_v12, %v9840_v12 }
 0xba9   : > { %v9848_v44 = vsub.f32 %v3989_v50, %v4023_v54  ;;  %v9850_v18 = vsub.f32 %v3988_v63, %v4022_v15  ;;  %v4053_v53 = vsel %vm733_vm2, %v4037_v52, 0.0  ;;  %v4050_v26 = vsel %vm733_vm2, %v4036_v16, 0.0 }
 0xbaa   : > { %4054 = vadd.xlane.f32.xlu1 %v4053_v53  ;;  %4051 = vadd.xlane.f32.xlu0 %v4050_v26  ;;  %v4016_v17 = vpop.xlane.xlu0 %4015 }
 0xbab   : > { %v4024_v19 = vmul.f32 0.03125, %v4016_v17  ;;  %v4039_v29 = vmul.f32 %v9848_v44, %v9848_v44  ;;  %v4038_v49 = vmul.f32 %v9850_v18, %v9850_v18 }
 0xbad   : > { %v9858_v31 = vsub.f32 %v3990_v0, %v4024_v19  ;;  %v4059_v39 = vsel %vm733_vm2, %v4039_v29, 0.0  ;;  %v4056_v43 = vsel %vm733_vm2, %v4038_v49, 0.0 }
 0xbae   : > { %4060 = vadd.xlane.f32.xlu1 %v4059_v39  ;;  %4057 = vadd.xlane.f32.xlu0 %v4056_v43 }
 0xbaf   : > { %v4040_v28 = vmul.f32 %v9858_v31, %v9858_v31 }
 0xbb1   : > { %v4062_v40 = vsel %vm733_vm2, %v4040_v28, 0.0 }
 0xbb2   : > { %4063 = vadd.xlane.f32.xlu0 %v4062_v40 }
 0xc2b   : > { %v4043_v14 = vpop.xlane.xlu1 %4042 }
 0xc2c   : > { %v4065_v21 = vmul.f32 0.03125, %v4043_v14  ;;  %v7925_v14 = vld [vmem:[%s10643_s4 + $0x1] ss:$0 sm:$0xff] }
 0xc2e   : > { %v4073_v51 = vadd.f32 1e-05, %v4065_v21 }
 0xc2f   : > { %v4049_v55 = vpop.xlane.xlu1 %4048  ;;  %v4046_v46 = vpop.xlane.xlu0 %4045 }
 0xc30   : > { %8904 = vrsqrt.f32 %v4073_v51  ;;  %v4067_v41 = vmul.f32 0.03125, %v4049_v55  ;;  %v4066_v56 = vmul.f32 0.03125, %v4046_v46 }
 0xc32   : > { %v4075_v11 = vadd.f32 1e-05, %v4067_v41  ;;  %v4074_v36 = vadd.f32 1e-05, %v4066_v56 }
 0xc33   : > { %v4055_v58 = vpop.xlane.xlu1 %4054  ;;  %v4052_v59 = vpop.xlane.xlu0 %4051 }
 0xc34   : > { %8906 = vrsqrt.f32 %v4075_v11  ;;  %v4069_v47 = vmul.f32 0.03125, %v4055_v58  ;;  %v4068_v48 = vmul.f32 0.03125, %v4052_v59 }
 0xc35   : > { %8908 = vrsqrt.f32 %v4074_v36 }
 0xc36   : > { %v4077_v62 = vadd.f32 1e-05, %v4069_v47  ;;  %v4076_v38 = vadd.f32 1e-05, %v4068_v48 }
 0xc37   : > { %v4061_v50 = vpop.xlane.xlu1 %4060  ;;  %v4058_v63 = vpop.xlane.xlu0 %4057 }
 0xc38   : > { %8910 = vrsqrt.f32 %v4077_v62  ;;  %v4071_v0 = vmul.f32 0.03125, %v4061_v50  ;;  %v4070_v22 = vmul.f32 0.03125, %v4058_v63 }
 0xc39   : > { %8912 = vrsqrt.f32 %v4076_v38 }
 0xc3a   : > { %v4079_v1 = vadd.f32 1e-05, %v4071_v0  ;;  %v4078_v25 = vadd.f32 1e-05, %v4070_v22 }
 0xc3b   : > { %v4064_v2 = vpop.xlane.xlu0 %4063 }
 0xc3c   : > { %8914 = vrsqrt.f32 %v4079_v1  ;;  %v4072_v61 = vmul.f32 0.03125, %v4064_v2 }
 0xc3d   : > { %v8905_v27 = vpop.eup %8904  ;;  %8916 = vrsqrt.f32 %v4078_v25 }
 0xc3e   : > { %v4080_v3 = vadd.f32 1e-05, %v4072_v61  ;;  %v4089_v4 = vmul.f32 %v8905_v27, %v9825_v24 }
 0xc40   : > { %8918 = vrsqrt.f32 %v4080_v3  ;;  %v4103_v6 = vmul.f32 %v7918_v23, %v4089_v4 }
 0xc41   : > { %v8907_v57 = vpop.eup %8906 }
 0xc42   : > { %v8909_v5 = vpop.eup %8908  ;;  %v4091_v7 = vmul.f32 %v8907_v57, %v9829_v60  ;;  %v9881_v24 = vadd.f32 %v7919_v8, %v4103_v6 }
 0xc43   : > { %v4090_v32 = vmul.f32 %v8909_v5, %v9831_v20 }
 0xc44   : > { %v4105_v42 = vmul.f32 %v7918_v23, %v4091_v7 }
 0xc45   : > { %v8911_v9 = vpop.eup %8910  ;;  %v4104_v10 = vmul.f32 %v7918_v23, %v4090_v32 }
 0xc46   : > { %v8913_v13 = vpop.eup %8912  ;;  %v4093_v54 = vmul.f32 %v8911_v9, %v9838_v34  ;;  %v9891_v53 = vadd.f32 %v7919_v8, %v4105_v42 }
 0xc47   : > { %v4092_v33 = vmul.f32 %v8913_v13, %v9840_v12  ;;  %v9884_v30 = vadd.f32 %v7919_v8, %v4104_v10 }
 0xc48   : > { %v4107_v17 = vmul.f32 %v7918_v23, %v4093_v54 }
 0xc49   : > { %v8915_v15 = vpop.eup %8914  ;;  %v4106_v60 = vmul.f32 %v7918_v23, %v4092_v33  ;;  %v4130_v52 = vpack.c.bf16 %v9884_v30, %v9881_v24 }
 0xc4a   : > { %v8917_v16 = vpop.eup %8916  ;;  %v4095_v20 = vmul.f32 %v8915_v15, %v9848_v44  ;;  %v9900_v44 = vadd.f32 %v7919_v8, %v4107_v17 }
 0xc4b   : > { %8478 = vmatprep.mubr.msk.bf16.mxu0 %vm733_vm2, %v4130_v52  ;;  %v9893_v26 = vadd.f32 %v7919_v8, %v4106_v60  ;;  %v4094_v12 = vmul.f32 %v8917_v16, %v9850_v18 }
 0xc4c   : > { %v4109_v39 = vmul.f32 %v7918_v23, %v4095_v20 }
 0xc4d   : > { %v8919_v19 = vpop.eup %8918  ;;  %v4131_v34 = vpack.c.bf16 %v9893_v26, %v9891_v53  ;;  %v4108_v29 = vmul.f32 %v7918_v23, %v4094_v12 }
 0xc4e   : > { %v4096_v49 = vmul.f32 %v8919_v19, %v9858_v31  ;;  %v9906_v18 = vadd.f32 %v7919_v8, %v4109_v39 }
 0xc4f   : > { %8479 = vmatmul.mubr.msk.bf16.vlgmr.msra.gmra.mxu0 %vm733_vm2, %v4131_v34  ;;  %v9902_v43 = vadd.f32 %v7919_v8, %v4108_v29 }
 0xc50   : > { %v4110_v28 = vmul.f32 %v7918_v23, %v4096_v49 }
 0xc51   : > { %v4132_v40 = vpack.c.bf16 %v9902_v43, %v9900_v44 }
 0xc52   : > { %v9908_v35 = vadd.f32 %v7919_v8, %v4110_v28 }
 0xc53   : > { %8482 = vmatprep.mubr.msk.bf16.mxu0 %vm733_vm2, %v4132_v40 }
 0xc54   : > { %v4133_v31 = vpack.c.bf16 %v9908_v35, %v9906_v18 }
 0xc57   : > { %8483 = vmatmul.mubr.msk.bf16.gmra.mxu0 %vm733_vm2, %v4133_v31 }
 0xc58   : > { %8488 = vmatprep.mubr.msk.f32.mxu0 %vm9081_vm3, %v9080_v37 }
 0xd0f   : > { %v8480_v45 = vpop.f32.mrf.mxu0 }
 0xd10   : > { %v9923_v41 = vadd.f32 %v8480_v45, %v7925_v14 }
 0xd11   : > { %v4200_v21 = vpop.f32.mrf.mxu0 }
 0xd12   : > { %v9919_v51 = vadd.f32 %v7925_v14, %v4200_v21 }
 0xd13   : > { %v8481_v55 = vpop.f32.mrf.mxu0 }
 0xd14   : > { %4232 = vrot.lane.b32.xlu1 %v9919_v51, %s10648_s25  ;;  %v9931_v58 = vadd.f32 %v8481_v55, %v7925_v14 }
 0xd15   : > { %v4203_v46 = vpop.f32.mrf.mxu0 }
 0xd16   : > { %v9925_v56 = vadd.f32 %v7925_v14, %v4203_v46 }
 0xd17   : > { %v8484_v11 = vpop.f32.mrf.mxu0 }
 0xd18   : > { %4309 = vrot.lane.b32.xlu0 %v9925_v56, %s10648_s25  ;;  %4386 = vrot.lane.b32.xlu1 %v9923_v41, %s10648_s25  ;;  %v9939_v62 = vadd.f32 %v8484_v11, %v7925_v14 }
 0xd19   : > { %v4216_v36 = vpop.f32.mrf.mxu0 }
 0xd1a   : > { %v9933_v59 = vadd.f32 %v7925_v14, %v4216_v36 }
 0xd1b   : > { %v8485_v47 = vpop.f32.mrf.mxu0 }
 0xd1c   : > { %4463 = vrot.lane.b32.xlu1 %v9931_v58, %s10648_s25  ;;  %4540 = vrot.lane.b32.xlu0 %v9933_v59, %s10648_s25  ;;  %v9947_v50 = vadd.f32 %v8485_v47, %v7925_v14 }
 0xd1d   : > { %v4219_v48 = vpop.f32.mrf.mxu0 }
 0xd1e   : > { %v9941_v38 = vadd.f32 %v7925_v14, %v4219_v48 }
 0xd20   : > { %4617 = vrot.lane.b32.xlu1 %v9941_v38, %s10648_s25  ;;  %4694 = vrot.lane.b32.xlu0 %v9939_v62, %s10648_s25 }
 0xd24   : > { %4771 = vrot.lane.b32.xlu1 %v9947_v50, %s10648_s25  ;;  %s8045_s25 = sshll.u32 %s9210_s1, 7  ;;  %s9024_s1 = scalar_lea.vmem %s9023_s29, 256 }
 0xd86   : > { %v4233_v63 = vpop.permute.xlu1 %4232 }
 0xd87   : > { %8487 = vmatpush3.xpose.msk.msra.mxu0 %vm814_vm4, %v4233_v63 }
 0xd88   : > { %8491 = vmatprep.subr.mxu0 %v9080_v37 }
 0xd8a   : > { %v4387_v0 = vpop.permute.xlu1 %4386  ;;  %8489 = vmatmul.mubr.msk.f32.vlgmr.msra.gmra.mxu0 %vm814_vm4, %v9919_v51  ;;  %v4310_v22 = vpop.permute.xlu0 %4309 }
 0xd8b   : > { %8492 = vmatpush3.xpose.msk.msra.mxu0 %vm814_vm4, %v4310_v22  ;;  %8493 = vmatprep.mubr.msk.f32.mxu0 %vm9081_vm3, %v9080_v37 }
 0xd8c   : > { %8496 = vmatprep.subr.mxu0 %v9080_v37 }
 0xd8e   : > { %v4464_v1 = vpop.permute.xlu1 %4463  ;;  %8494 = vmatmul.mubr.msk.f32.vlgmr.msra.gmra.mxu0 %vm814_vm4, %v9925_v56  ;;  %v4541_v25 = vpop.permute.xlu0 %4540 }
 0xd8f   : > { %8497 = vmatpush3.xpose.msk.msra.mxu0 %vm814_vm4, %v4387_v0  ;;  %8507 = vmatpush3.xpose.msk.msra.mxu1 %vm814_vm4, %v4541_v25 }
 0xd90   : > { %8498 = vmatprep.mubr.msk.f32.mxu0 %vm9081_vm3, %v9080_v37  ;;  %8501 = vmatprep.subr.mxu0 %v9080_v37 }
 0xd91   : > { %8516 = vmatprep.subr.mxu1 %v9080_v37 }
 0xd92   : > { %8499 = vmatmul.mubr.msk.f32.vlgmr.msra.gmra.mxu0 %vm814_vm4, %v9923_v41  ;;  %8509 = vmatmul.mubr.msk.f32.vlgmr.msra.gmra.mxu1 %vm814_vm4, %v9933_v59  ;;  %v4695_v2 = vpop.permute.xlu0 %4694  ;;  %v4618_v61 = vpop.permute.xlu1 %4617 }
 0xd93   : > { %8502 = vmatpush3.xpose.msk.msra.mxu0 %vm814_vm4, %v4464_v1  ;;  %8517 = vmatpush3.xpose.msk.msra.mxu1 %vm814_vm4, %v4695_v2 }
 0xd94   : > { %8503 = vmatprep.mubr.msk.f32.mxu0 %vm9081_vm3, %v9080_v37  ;;  %8518 = vmatprep.mubr.msk.f32.mxu1 %vm9081_vm3, %v9080_v37 }
 0xd95   : > { %8511 = vmatprep.subr.mxu0 %v9080_v37  ;;  %8526 = vmatprep.subr.mxu1 %v9080_v37 }
 0xd96   : > { %8504 = vmatmul.mubr.msk.f32.vlgmr.msra.gmra.mxu0 %vm814_vm4, %v9931_v58  ;;  %8519 = vmatmul.mubr.msk.f32.vlgmr.msra.gmra.mxu1 %vm814_vm4, %v9939_v62  ;;  %v4772_v27 = vpop.permute.xlu1 %4771 }
 0xd97   : > { %8512 = vmatpush3.xpose.msk.msra.mxu0 %vm814_vm4, %v4618_v61  ;;  %8513 = vmatprep.mubr.msk.f32.mxu0 %vm9081_vm3, %v9080_v37 }
 0xd98   : > { %8521 = vmatprep.subr.mxu0 %v9080_v37  ;;  %8528 = vmatprep.mubr.msk.f32.mxu1 %vm9081_vm3, %v9080_v37 }
 0xd9a   : > { %8514 = vmatmul.mubr.msk.f32.vlgmr.msra.gmra.mxu0 %vm814_vm4, %v9941_v38 }
 0xd9b   : > { %8522 = vmatpush3.xpose.msk.msra.mxu0 %vm814_vm4, %v4772_v27  ;;  %8523 = vmatprep.mubr.msk.f32.mxu0 %vm9081_vm3, %v9080_v37 }
 0xd9c   : > { %8531 = vmatprep.subr.mxu0 %v9080_v37 }
 0xd9e   : > { %8524 = vmatmul.mubr.msk.f32.vlgmr.msra.gmra.mxu0 %vm814_vm4, %v9947_v50 }
 0xd9f   : > { %8533 = vmatprep.mubr.msk.f32.mxu0 %vm9081_vm3, %v9080_v37 }
 0xe4a   : > { %v4304_v3 = vpop.f32.mrf.mxu0 }
 0xe4b   : > { %v4847_v4 = vsel %vm624_vm1, %v4304_v3, -inf }
 0xe4c   : > { %v8490_v23 = vpop.f32.mrf.mxu0  ;;  %4848 = vmax.xlane.f32.xlu0 %v4847_v4 }
 0xe4e   : > { %v4381_v57 = vpop.f32.mrf.mxu0 }
 0xe4f   : > { %v4850_v5 = vsel %vm624_vm1, %v4381_v57, -inf }
 0xe50   : > { %4851 = vmax.xlane.f32.xlu1 %v4850_v5  ;;  %v8495_v6 = vpop.f32.mrf.mxu0 }
 0xe52   : > { %v4458_v7 = vpop.f32.mrf.mxu0  ;;  %v4612_v8 = vpop.f32.mrf.mxu1 }
 0xe53   : > { %v4853_v32 = vsel %vm624_vm1, %v4458_v7, -inf  ;;  %v4859_v9 = vsel %vm624_vm1, %v4612_v8, -inf }
 0xe54   : > { %4854 = vmax.xlane.f32.xlu0 %v4853_v32  ;;  %v8500_v10 = vpop.f32.mrf.mxu0  ;;  %4860 = vmax.xlane.f32.xlu1 %v4859_v9  ;;  %v8510_v13 = vpop.f32.mrf.mxu1 }
 0xe56   : > { %v4535_v42 = vpop.f32.mrf.mxu0  ;;  %v4766_v33 = vpop.f32.mrf.mxu1 }
 0xe57   : > { %v4856_v54 = vsel %vm624_vm1, %v4535_v42, -inf  ;;  %v4865_v15 = vsel %vm624_vm1, %v4766_v33, -inf }
 0xe58   : > { %4857 = vmax.xlane.f32.xlu0 %v4856_v54  ;;  %v8505_v60 = vpop.f32.mrf.mxu0  ;;  %4866 = vmax.xlane.f32.xlu1 %v4865_v15  ;;  %v8520_v52 = vpop.f32.mrf.mxu1 }
 0xe5a   : > { %v4689_v16 = vpop.f32.mrf.mxu0 }
 0xe5b   : > { %v4862_v20 = vsel %vm624_vm1, %v4689_v16, -inf }
 0xe5c   : > { %4863 = vmax.xlane.f32.xlu0 %v4862_v20  ;;  %v8515_v12 = vpop.f32.mrf.mxu0 }
 0xe5e   : > { %v4843_v17 = vpop.f32.mrf.mxu0 }
 0xe5f   : > { %v4868_v19 = vsel %vm624_vm1, %v4843_v17, -inf }
 0xe60   : > { %4869 = vmax.xlane.f32.xlu0 %v4868_v19  ;;  %v8525_v34 = vpop.f32.mrf.mxu0 }
 0xe69   : > { %4935 = vrot.lane.b32.xlu1 %v9919_v51, %s10649_s28 }
 0xe6d   : > { %5087 = vrot.lane.b32.xlu1 %v9923_v41, %s10649_s28 }
 0xe71   : > { %5163 = vrot.lane.b32.xlu1 %v9931_v58, %s10649_s28 }
 0xe75   : > { %5315 = vrot.lane.b32.xlu1 %v9941_v38, %s10649_s28 }
 0xe76   : > { %5011 = vrot.lane.b32.xlu0 %v9925_v56, %s10649_s28 }
 0xe79   : > { %5467 = vrot.lane.b32.xlu1 %v9947_v50, %s10649_s28 }
 0xe7a   : > { %5239 = vrot.lane.b32.xlu0 %v9933_v59, %s10649_s28 }
 0xe7d   : > { %5623 = vrot.lane.b32.xlu1 %v9925_v56, %s10650_s24 }
 0xe7e   : > { %5391 = vrot.lane.b32.xlu0 %v9939_v62, %s10649_s28  ;;  %s10653_s28 = smov 16  }
 0xe81   : > { %5621 = vrot.lane.b32.xlu1 %v9925_v56, %s10651_s20 }
 0xe82   : > { %5545 = vrot.lane.b32.xlu0 %v9919_v51, %s10650_s24 }
 0xe85   : > { %5779 = vrot.lane.b32.xlu1 %v9931_v58, %s10650_s24 }
 0xe86   : > { %5543 = vrot.lane.b32.xlu0 %v9919_v51, %s10651_s20 }
 0xe8a   : > { %5701 = vrot.lane.b32.xlu0 %v9923_v41, %s10650_s24 }
 0xed5   : > { %v4849_v29 = vpop.xlane.xlu0 %4848 }
 0xed6   : > { %v4871_v49 = vsub.f32 %v4304_v3, %v4849_v29 }
 0xed8   : > { %v4879_v39 = vmul.f32 1.442695, %v4871_v49 }
 0xed9   : > { %v4852_v28 = vpop.xlane.xlu1 %4851 }
 0xeda   : > { %8920 = vpow2.f32 %v4879_v39  ;;  %v4872_v40 = vsub.f32 %v4381_v57, %v4852_v28 }
 0xedc   : > { %v4881_v31 = vmul.f32 1.442695, %v4872_v40 }
 0xedd   : > { %v4861_v45 = vpop.xlane.xlu1 %4860  ;;  %v4855_v14 = vpop.xlane.xlu0 %4854 }
 0xede   : > { %8922 = vpow2.f32 %v4881_v31  ;;  %v4875_v21 = vsub.f32 %v4612_v8, %v4861_v45  ;;  %v4873_v55 = vsub.f32 %v4458_v7, %v4855_v14 }
 0xee0   : > { %v4883_v46 = vmul.f32 1.442695, %v4873_v55  ;;  %v4887_v11 = vmul.f32 1.442695, %v4875_v21 }
 0xee1   : > { %v4867_v36 = vpop.xlane.xlu1 %4866  ;;  %v4858_v47 = vpop.xlane.xlu0 %4857 }
 0xee2   : > { %v4877_v48 = vsub.f32 %v4766_v33, %v4867_v36  ;;  %v4874_v63 = vsub.f32 %v4535_v42, %v4858_v47  ;;  %8924 = vpow2.f32 %v4883_v46 }
 0xee3   : > { %8926 = vpow2.f32 %v4887_v11 }
 0xee4   : > { %v4885_v0 = vmul.f32 1.442695, %v4874_v63  ;;  %v4891_v22 = vmul.f32 1.442695, %v4877_v48 }
 0xee5   : > { %v4936_v1 = vpop.permute.xlu1 %4935  ;;  %v4864_v25 = vpop.xlane.xlu0 %4863 }
 0xee6   : > { %v4876_v2 = vsub.f32 %v4689_v16, %v4864_v25  ;;  %8527 = vmatpush3.msra.mxu1 %v4936_v1  ;;  %8928 = vpow2.f32 %v4885_v0 }
 0xee7   : > { %v10035_v61 = vpop.eup %8920  ;;  %8536 = vmatprep.subr.mxu1 %v9080_v37  ;;  %8930 = vpow2.f32 %v4891_v22 }
 0xee8   : > { %v4889_v27 = vmul.f32 1.442695, %v4876_v2  ;;  %v4895_v3 = vsel %vm624_vm1, %v10035_v61, 0.0 }
 0xee9   : > { %4896 = vadd.xlane.f32.xlu1 %v4895_v3  ;;  %v4870_v4 = vpop.xlane.xlu0 %4869  ;;  %v5088_v20 = vpop.permute.xlu1 %5087 }
 0xeea   : > { %8932 = vpow2.f32 %v4889_v27  ;;  %v4878_v23 = vsub.f32 %v4843_v17, %v4870_v4 }
 0xeeb   : > { %v10040_v57 = vpop.eup %8922 }
 0xeec   : > { %v4893_v5 = vmul.f32 1.442695, %v4878_v23  ;;  %v4898_v6 = vsel %vm624_vm1, %v10040_v57, 0.0 }
 0xeed   : > { %4899 = vadd.xlane.f32.xlu0 %v4898_v6  ;;  %v5012_v7 = vpop.permute.xlu0 %5011  ;;  %v5164_v12 = vpop.permute.xlu1 %5163 }
 0xeee   : > { %8934 = vpow2.f32 %v4893_v5  ;;  %8532 = vmatpush3.msra.mxu0 %v5012_v7 }
 0xeef   : > { %8541 = vmatprep.subr.mxu0 %v9080_v37  ;;  %v10045_v8 = vpop.eup %8924 }
 0xef0   : > { %v4901_v32 = vsel %vm624_vm1, %v10045_v8, 0.0  ;;  %v10049_v9 = vpop.eup %8926 }
 0xef1   : > { %4902 = vadd.xlane.f32.xlu1 %v4901_v32  ;;  %v4907_v13 = vsel %vm624_vm1, %v10049_v9, 0.0  ;;  %v5316_v17 = vpop.permute.xlu1 %5315  ;;  %v5240_v19 = vpop.permute.xlu0 %5239 }
 0xef3   : > { %v10051_v10 = vpop.eup %8928 }
 0xef4   : > { %v4904_v42 = vsel %vm624_vm1, %v10051_v10, 0.0  ;;  %v10057_v33 = vpop.eup %8930 }
 0xef5   : > { %4908 = vadd.xlane.f32.xlu1 %v4907_v13  ;;  %4905 = vadd.xlane.f32.xlu0 %v4904_v42  ;;  %v4913_v60 = vsel %vm624_vm1, %v10057_v33, 0.0  ;;  %v10089_v34 = vpop.permute.xlu1 %5467  ;;  %v5392_v29 = vpop.permute.xlu0 %5391 }
 0xef7   : > { %v10059_v54 = vpop.eup %8932 }
 0xef8   : > { %v4910_v15 = vsel %vm624_vm1, %v10059_v54, 0.0 }
 0xef9   : > { %4914 = vadd.xlane.f32.xlu1 %v4913_v60  ;;  %4911 = vadd.xlane.f32.xlu0 %v4910_v15  ;;  %v10091_v49 = vpop.permute.xlu1 %5623  ;;  %v5546_v39 = vpop.permute.xlu0 %5545 }
 0xefb   : > { %v10065_v52 = vpop.eup %8934 }
 0xefc   : > { %v4916_v16 = vsel %vm624_vm1, %v10065_v52, 0.0 }
 0xefd   : > { %4917 = vadd.xlane.f32.xlu0 %v4916_v16  ;;  %v10093_v28 = vpop.permute.xlu1 %5621  ;;  %v10095_v40 = vpop.permute.xlu0 %5543 }
 0xf01   : > { %v10097_v31 = vpop.permute.xlu1 %5779  ;;  %v10099_v45 = vpop.permute.xlu0 %5701 }
 0xf0a   : > { %5777 = vrot.lane.b32.xlu1 %v9931_v58, %s10651_s20 }
 0xf0e   : > { %5935 = vrot.lane.b32.xlu1 %v9941_v38, %s10650_s24 }
 0xf12   : > { %5933 = vrot.lane.b32.xlu1 %v9941_v38, %s10651_s20 }
 0xf13   : > { %5699 = vrot.lane.b32.xlu0 %v9923_v41, %s10651_s20 }
 0xf16   : > { %6091 = vrot.lane.b32.xlu1 %v9947_v50, %s10650_s24 }
 0xf17   : > { %5857 = vrot.lane.b32.xlu0 %v9933_v59, %s10650_s24 }
 0xf1a   : > { %6089 = vrot.lane.b32.xlu1 %v9947_v50, %s10651_s20 }
 0xf1b   : > { %5855 = vrot.lane.b32.xlu0 %v9933_v59, %s10651_s20 }
 0xf1f   : > { %6013 = vrot.lane.b32.xlu0 %v9939_v62, %s10650_s24  ;;  %s594_s24 = sand.u32 1, %s9070_s30  }
 0xf23   : > { %6011 = vrot.lane.b32.xlu0 %v9939_v62, %s10651_s20  ;;  %s7830_s20 = sshll.u32 %s594_s24, 3 }
 0xf72   : > { %v4897_v14 = vpop.xlane.xlu1 %4896 }
 0xf73   : > { %8936 = vrcp.f32 %v4897_v14 }
 0xf76   : > { %v4900_v21 = vpop.xlane.xlu0 %4899 }
 0xf77   : > { %8938 = vrcp.f32 %v4900_v21 }
 0xf7a   : > { %v4903_v55 = vpop.xlane.xlu1 %4902 }
 0xf7b   : > { %8940 = vrcp.f32 %v4903_v55 }
 0xf7e   : > { %v4909_v46 = vpop.xlane.xlu1 %4908  ;;  %v4906_v11 = vpop.xlane.xlu0 %4905 }
 0xf7f   : > { %8942 = vrcp.f32 %v4909_v46 }
 0xf80   : > { %v8937_v36 = vpop.eup %8936  ;;  %8944 = vrcp.f32 %v4906_v11 }
 0xf81   : > { %v4927_v47 = vmul.f32 %v8937_v36, %v10035_v61 }
 0xf82   : > { %v4915_v48 = vpop.xlane.xlu1 %4914  ;;  %v4912_v63 = vpop.xlane.xlu0 %4911 }
 0xf83   : > { %8529 = vmatmul.mubr.msk.f32.vlgmr.msra.gmra.mxu1 %vm624_vm1, %v4927_v47  ;;  %8946 = vrcp.f32 %v4915_v48 }
 0xf84   : > { %v8939_v0 = vpop.eup %8938  ;;  %8537 = vmatpush3.msra.mxu1 %v5088_v20  ;;  %8538 = vmatprep.mubr.msk.f32.mxu1 %vm9081_vm3, %v9080_v37  ;;  %8948 = vrcp.f32 %v4912_v63 }
 0xf85   : > { %v4928_v22 = vmul.f32 %v8939_v0, %v10040_v57  ;;  %8546 = vmatprep.subr.mxu1 %v9080_v37 }
 0xf86   : > { %v4918_v1 = vpop.xlane.xlu0 %4917  ;;  %v5778_v57 = vpop.permute.xlu1 %5777 }
 0xf87   : > { %8534 = vmatmul.mubr.msk.f32.vlgmr.msra.gmra.mxu0 %vm624_vm1, %v4928_v22  ;;  %8950 = vrcp.f32 %v4918_v1 }
 0xf88   : > { %8542 = vmatpush3.msra.mxu0 %v5164_v12  ;;  %8543 = vmatprep.mubr.msk.f32.mxu0 %vm9081_vm3, %v9080_v37  ;;  %v8941_v25 = vpop.eup %8940 }
 0xf89   : > { %8551 = vmatprep.subr.mxu0 %v9080_v37  ;;  %v4929_v2 = vmul.f32 %v8941_v25, %v10045_v8 }
 0xf8a   : > { %v5700_v61 = vpop.permute.xlu0 %5699 }
 0xf8b   : > { %8539 = vmatmul.mubr.msk.f32.vlgmr.msra.gmra.mxu1 %vm624_vm1, %v4929_v2 }
 0xf8c   : > { %v8943_v27 = vpop.eup %8942  ;;  %8547 = vmatpush3.msra.mxu1 %v5240_v19  ;;  %8548 = vmatprep.mubr.msk.f32.mxu1 %vm9081_vm3, %v9080_v37 }
 0xf8d   : > { %v8945_v3 = vpop.eup %8944  ;;  %8556 = vmatprep.subr.mxu1 %v9080_v37  ;;  %v4931_v4 = vmul.f32 %v8943_v27, %v10049_v9 }
 0xf8e   : > { %v4930_v23 = vmul.f32 %v8945_v3, %v10051_v10  ;;  %v5858_v6 = vpop.permute.xlu0 %5857  ;;  %v5936_v10 = vpop.permute.xlu1 %5935 }
 0xf8f   : > { %8549 = vmatmul.mubr.msk.f32.vlgmr.msra.gmra.mxu1 %vm624_vm1, %v4931_v4 }
 0xf90   : > { %v8947_v5 = vpop.eup %8946  ;;  %8544 = vmatmul.mubr.msk.f32.vlgmr.msra.gmra.mxu0 %vm624_vm1, %v4930_v23  ;;  %8557 = vmatpush3.msra.mxu1 %v5392_v29 }
 0xf91   : > { %v8949_v7 = vpop.eup %8948  ;;  %8552 = vmatpush3.msra.mxu0 %v5316_v17  ;;  %8553 = vmatprep.mubr.msk.f32.mxu0 %vm9081_vm3, %v9080_v37  ;;  %v4933_v8 = vmul.f32 %v8947_v5, %v10057_v33 }
 0xf92   : > { %8558 = vmatprep.mubr.msk.f32.mxu1 %vm9081_vm3, %v9080_v37  ;;  %8561 = vmatprep.subr.mxu0 %v9080_v37  ;;  %v4932_v32 = vmul.f32 %v8949_v7, %v10059_v54  ;;  %v5856_v42 = vpop.permute.xlu0 %5855  ;;  %v5934_v33 = vpop.permute.xlu1 %5933 }
 0xf93   : > { %8566 = vmatprep.subr.mxu1 %v9080_v37  ;;  %8559 = vmatmul.mubr.msk.f32.vlgmr.msra.gmra.mxu1 %vm624_vm1, %v4933_v8 }
 0xf94   : > { %v8951_v9 = vpop.eup %8950  ;;  %8554 = vmatmul.mubr.msk.f32.vlgmr.msra.gmra.mxu0 %vm624_vm1, %v4932_v32  ;;  %8567 = vmatpush3.xpose.msk.msra.mxu1 %vm814_vm4, %v5546_v39 }
 0xf95   : > { %8562 = vmatpush3.msra.mxu0 %v10089_v34  ;;  %8563 = vmatprep.mubr.msk.f32.mxu0 %vm9081_vm3, %v9080_v37  ;;  %v4934_v13 = vmul.f32 %v8951_v9, %v10065_v52 }
 0xf96   : > { %8568 = vmatprep.mubr.msk.f32.mxu1 %vm9081_vm3, %v9080_v37  ;;  %8571 = vmatprep.subr.mxu0 %v9080_v37  ;;  %v6014_v54 = vpop.permute.xlu0 %6013  ;;  %v6092_v15 = vpop.permute.xlu1 %6091 }
 0xf97   : > { %8576 = vmatprep.subr.mxu1 %v9080_v37  ;;  %8569 = vmatmul.mubr.msk.f32.vlgmr.msra.gmra.mxu1 %vm814_vm4, %v10095_v40 }
 0xf98   : > { %8564 = vmatmul.mubr.msk.f32.vlgmr.msra.gmra.mxu0 %vm624_vm1, %v4934_v13  ;;  %8577 = vmatpush3.xpose.msk.msra.mxu1 %vm814_vm4, %v10099_v45 }
 0xf99   : > { %8572 = vmatpush3.xpose.msk.msra.mxu0 %vm814_vm4, %v10091_v49  ;;  %8573 = vmatprep.mubr.msk.f32.mxu0 %vm9081_vm3, %v9080_v37 }
 0xf9a   : > { %8578 = vmatprep.mubr.msk.f32.mxu1 %vm9081_vm3, %v9080_v37  ;;  %8581 = vmatprep.subr.mxu0 %v9080_v37  ;;  %v6012_v60 = vpop.permute.xlu0 %6011  ;;  %v6090_v52 = vpop.permute.xlu1 %6089 }
 0xf9b   : > { %8586 = vmatprep.subr.mxu1 %v9080_v37  ;;  %8579 = vmatmul.mubr.msk.f32.vlgmr.msra.gmra.mxu1 %vm814_vm4, %v5700_v61 }
 0xf9c   : > { %8574 = vmatmul.mubr.msk.f32.vlgmr.msra.gmra.mxu0 %vm814_vm4, %v10093_v28  ;;  %8587 = vmatpush3.xpose.msk.msra.mxu1 %vm814_vm4, %v5858_v6 }
 0xf9d   : > { %8582 = vmatpush3.xpose.msk.msra.mxu0 %vm814_vm4, %v10097_v31  ;;  %8583 = vmatprep.mubr.msk.f32.mxu0 %vm9081_vm3, %v9080_v37 }
 0xf9e   : > { %8588 = vmatprep.mubr.msk.f32.mxu1 %vm9081_vm3, %v9080_v37  ;;  %8591 = vmatprep.subr.mxu0 %v9080_v37 }
 0xf9f   : > { %8596 = vmatprep.subr.mxu1 %v9080_v37  ;;  %8589 = vmatmul.mubr.msk.f32.vlgmr.msra.gmra.mxu1 %vm814_vm4, %v5856_v42 }
 0xfa0   : > { %8584 = vmatmul.mubr.msk.f32.vlgmr.msra.gmra.mxu0 %vm814_vm4, %v5778_v57  ;;  %8597 = vmatpush3.xpose.msk.msra.mxu1 %vm814_vm4, %v6014_v54 }
 0xfa1   : > { %8592 = vmatpush3.xpose.msk.msra.mxu0 %vm814_vm4, %v5936_v10  ;;  %8593 = vmatprep.mubr.msk.f32.mxu0 %vm9081_vm3, %v9080_v37 }
 0xfa2   : > { %8598 = vmatprep.mubr.msk.f32.mxu1 %vm9081_vm3, %v9080_v37  ;;  %8601 = vmatprep.subr.mxu0 %v9080_v37 }
 0xfa3   : > { %8599 = vmatmul.mubr.msk.f32.vlgmr.msra.gmra.mxu1 %vm814_vm4, %v6012_v60  ;;  %8606 = vmatprep.subr.mxu1 %v9080_v37 }
 0xfa4   : > { %8594 = vmatmul.mubr.msk.f32.vlgmr.msra.gmra.mxu0 %vm814_vm4, %v5934_v33  ;;  %8608 = vmatprep.mubr.msk.f32.mxu1 %vm9081_vm3, %v9080_v37 }
 0xfa5   : > { %8602 = vmatpush3.xpose.msk.msra.mxu0 %vm814_vm4, %v6092_v15  ;;  %8603 = vmatprep.mubr.msk.f32.mxu0 %vm9081_vm3, %v9080_v37 }
 0xfa6   : > { %8611 = vmatprep.subr.mxu0 %v9080_v37 }
 0xfa8   : > { %8604 = vmatmul.mubr.msk.f32.vlgmr.msra.gmra.mxu0 %vm814_vm4, %v6090_v52 }
 0xfa9   : > { %8613 = vmatprep.mubr.msk.f32.mxu0 %vm9081_vm3, %v9080_v37 }
0x1043   : > { %v10185_v16 = vpop.f32.mrf.mxu1 }
0x1045   : > { %v8530_v20 = vpop.f32.mrf.mxu1 }
0x1047   : > { %v10187_v12 = vpop.f32.mrf.mxu0 }
0x1049   : > { %v8535_v17 = vpop.f32.mrf.mxu0 }
0x104b   : > { %v10189_v19 = vpop.f32.mrf.mxu1 }
0x104d   : > { %v8540_v34 = vpop.f32.mrf.mxu1 }
0x104f   : > { %v10191_v29 = vpop.f32.mrf.mxu1 }
0x1050   : > { %v10193_v49 = vpop.f32.mrf.mxu0 }
0x1051   : > { %v8550_v39 = vpop.f32.mrf.mxu1 }
0x1052   : > { %v8545_v28 = vpop.f32.mrf.mxu0 }
0x1053   : > { %v10195_v40 = vpop.f32.mrf.mxu1 }
0x1054   : > { %v10197_v31 = vpop.f32.mrf.mxu0 }
0x1055   : > { %v8560_v45 = vpop.f32.mrf.mxu1 }
0x1056   : > { %v8555_v14 = vpop.f32.mrf.mxu0 }
0x1057   : > { %v5617_v21 = vpop.f32.mrf.mxu1 }
0x1058   : > { %v10199_v55 = vpop.f32.mrf.mxu0  ;;  %v6167_v46 = vsel %vm624_vm1, %v5617_v21, -inf }
0x1059   : > { %6168 = vmax.xlane.f32.xlu0 %v6167_v46  ;;  %v8570_v11 = vpop.f32.mrf.mxu1 }
0x105a   : > { %v8565_v36 = vpop.f32.mrf.mxu0 }
0x105b   : > { %v5773_v47 = vpop.f32.mrf.mxu1 }
0x105c   : > { %v5695_v48 = vpop.f32.mrf.mxu0  ;;  %v6173_v63 = vsel %vm624_vm1, %v5773_v47, -inf }
0x105d   : > { %v6170_v0 = vsel %vm624_vm1, %v5695_v48, -inf  ;;  %6174 = vmax.xlane.f32.xlu0 %v6173_v63  ;;  %v8580_v22 = vpop.f32.mrf.mxu1 }
0x105e   : > { %6171 = vmax.xlane.f32.xlu1 %v6170_v0  ;;  %v8575_v1 = vpop.f32.mrf.mxu0 }
0x105f   : > { %v5929_v25 = vpop.f32.mrf.mxu1 }
0x1060   : > { %v5851_v2 = vpop.f32.mrf.mxu0  ;;  %v6179_v61 = vsel %vm624_vm1, %v5929_v25, -inf }
0x1061   : > { %v6176_v27 = vsel %vm624_vm1, %v5851_v2, -inf  ;;  %v8590_v3 = vpop.f32.mrf.mxu1 }
0x1062   : > { %v8585_v4 = vpop.f32.mrf.mxu0  ;;  %6177 = vmax.xlane.f32.xlu0 %v6176_v27  ;;  %6180 = vmax.xlane.f32.xlu1 %v6179_v61 }
0x1063   : > { %v6085_v23 = vpop.f32.mrf.mxu1 }
0x1064   : > { %v6007_v57 = vpop.f32.mrf.mxu0  ;;  %v6185_v5 = vsel %vm624_vm1, %v6085_v23, -inf }
0x1065   : > { %v6182_v6 = vsel %vm624_vm1, %v6007_v57, -inf  ;;  %v8600_v7 = vpop.f32.mrf.mxu1 }
0x1066   : > { %v8595_v8 = vpop.f32.mrf.mxu0  ;;  %6183 = vmax.xlane.f32.xlu0 %v6182_v6  ;;  %6186 = vmax.xlane.f32.xlu1 %v6185_v5 }
0x1068   : > { %v6163_v32 = vpop.f32.mrf.mxu0 }
0x1069   : > { %v6188_v9 = vsel %vm624_vm1, %v6163_v32, -inf }
0x106a   : > { %v8605_v10 = vpop.f32.mrf.mxu0  ;;  %6189 = vmax.xlane.f32.xlu0 %v6188_v9 }
0x1077   : > { %6255 = vrot.lane.b32.xlu1 %v9919_v51, %s10652_s22 }
0x107b   : > { %6407 = vrot.lane.b32.xlu1 %v9923_v41, %s10652_s22 }
0x107f   : > { %6483 = vrot.lane.b32.xlu1 %v9931_v58, %s10652_s22 }
0x1080   : > { %6331 = vrot.lane.b32.xlu0 %v9925_v56, %s10652_s22 }
0x1083   : > { %6635 = vrot.lane.b32.xlu1 %v9941_v38, %s10652_s22 }
0x1084   : > { %6559 = vrot.lane.b32.xlu0 %v9933_v59, %s10652_s22 }
0x10e2   : > { %v6169_v13 = vpop.xlane.xlu0 %6168 }
0x10e3   : > { %v6191_v42 = vsub.f32 %v5617_v21, %v6169_v13 }
0x10e5   : > { %v6199_v33 = vmul.f32 1.442695, %v6191_v42 }
0x10e6   : > { %v6175_v54 = vpop.xlane.xlu0 %6174 }
0x10e7   : > { %8952 = vpow2.f32 %v6199_v33  ;;  %v6172_v51 = vpop.xlane.xlu1 %6171  ;;  %v6193_v15 = vsub.f32 %v5773_v47, %v6175_v54 }
0x10e8   : > { %v6192_v41 = vsub.f32 %v5695_v48, %v6172_v51 }
0x10e9   : > { %v6203_v60 = vmul.f32 1.442695, %v6193_v15 }
0x10ea   : > { %v6201_v52 = vmul.f32 1.442695, %v6192_v41 }
0x10eb   : > { %8954 = vpow2.f32 %v6203_v60  ;;  %v6181_v58 = vpop.xlane.xlu1 %6180  ;;  %v6178_v20 = vpop.xlane.xlu0 %6177 }
0x10ec   : > { %8956 = vpow2.f32 %v6201_v52  ;;  %v6195_v56 = vsub.f32 %v5929_v25, %v6181_v58  ;;  %v6194_v17 = vsub.f32 %v5851_v2, %v6178_v20 }
0x10ee   : > { %v6207_v38 = vmul.f32 1.442695, %v6195_v56  ;;  %v6205_v34 = vmul.f32 1.442695, %v6194_v17 }
0x10ef   : > { %v6187_v39 = vpop.xlane.xlu1 %6186  ;;  %v6184_v59 = vpop.xlane.xlu0 %6183 }
0x10f0   : > { %8958 = vpow2.f32 %v6207_v38  ;;  %v6197_v28 = vsub.f32 %v6085_v23, %v6187_v39  ;;  %v6196_v45 = vsub.f32 %v6007_v57, %v6184_v59 }
0x10f1   : > { %8960 = vpow2.f32 %v6205_v34 }
0x10f2   : > { %v6211_v14 = vmul.f32 1.442695, %v6197_v28  ;;  %v6209_v21 = vmul.f32 1.442695, %v6196_v45 }
0x10f3   : > { %v6256_v46 = vpop.permute.xlu1 %6255  ;;  %v6190_v11 = vpop.xlane.xlu0 %6189 }
0x10f4   : > { %v8953_v36 = vpop.eup %8952  ;;  %8962 = vpow2.f32 %v6211_v14  ;;  %v6198_v47 = vsub.f32 %v6163_v32, %v6190_v11  ;;  %8607 = vmatpush3.msra.mxu1 %v6256_v46 }
0x10f5   : > { %8964 = vpow2.f32 %v6209_v21  ;;  %v6215_v48 = vsel %vm624_vm1, %v8953_v36, 0.0  ;;  %8616 = vmatprep.subr.mxu1 %v9080_v37 }
0x10f6   : > { %v6213_v63 = vmul.f32 1.442695, %v6198_v47  ;;  %6216 = vadd.xlane.f32.xlu1 %v6215_v48  ;;  %v8810_v48 = vld [vmem:[%s10644_s5 + $0x18] sm:$0xff]  }
0x10f7   : > { %v6332_v0 = vpop.permute.xlu0 %6331  ;;  %v6408_v32 = vpop.permute.xlu1 %6407 }
0x10f8   : > { %v8955_v22 = vpop.eup %8954  ;;  %8966 = vpow2.f32 %v6213_v63  ;;  %8612 = vmatpush3.msra.mxu0 %v6332_v0  ;;  %v8811_v0 = vld [vmem:[%s10644_s5 + $0x10] sm:$0xff]  }
0x10f9   : > { %v8957_v1 = vpop.eup %8956  ;;  %v6221_v25 = vsel %vm624_vm1, %v8955_v22, 0.0  ;;  %8621 = vmatprep.subr.mxu0 %v9080_v37 }
0x10fa   : > { %v6218_v2 = vsel %vm624_vm1, %v8957_v1, 0.0  ;;  %6222 = vadd.xlane.f32.xlu1 %v6221_v25 }
0x10fb   : > { %6219 = vadd.xlane.f32.xlu0 %v6218_v2  ;;  %v6484_v9 = vpop.permute.xlu1 %6483  ;;  %v6560_v42 = vpop.permute.xlu0 %6559 }
0x10fd   : > { %v8959_v61 = vpop.eup %8958 }
0x10fe   : > { %v8961_v27 = vpop.eup %8960  ;;  %v6227_v3 = vsel %vm624_vm1, %v8959_v61, 0.0 }
0x10ff   : > { %6228 = vadd.xlane.f32.xlu1 %v6227_v3  ;;  %v6224_v4 = vsel %vm624_vm1, %v8961_v27, 0.0  ;;  %v6636_v10 = vpop.permute.xlu1 %6635 }
0x1100   : > { %6225 = vadd.xlane.f32.xlu0 %v6224_v4 }
0x1101   : > { %v8963_v23 = vpop.eup %8962 }
0x1102   : > { %v10228_v57 = vpop.eup %8964  ;;  %v6233_v5 = vsel %vm624_vm1, %v8963_v23, 0.0 }
0x1103   : > { %6234 = vadd.xlane.f32.xlu1 %v6233_v5  ;;  %v6230_v6 = vsel %vm624_vm1, %v10228_v57, 0.0 }
0x1104   : > { %6231 = vadd.xlane.f32.xlu0 %v6230_v6 }
0x1105   : > { %v10233_v7 = vpop.eup %8966 }
0x1106   : > { %v6236_v8 = vsel %vm624_vm1, %v10233_v7, 0.0 }
0x1108   : > { %6237 = vadd.xlane.f32.xlu0 %v6236_v8 }
0x1114   : > { %6787 = vrot.lane.b32.xlu1 %v9947_v50, %s10652_s22 }
0x111e   : > { %6711 = vrot.lane.b32.xlu0 %v9939_v62, %s10652_s22 }
0x117f   : > { %v6217_v13 = vpop.xlane.xlu1 %6216 }
0x1180   : > { %8968 = vrcp.f32 %v6217_v13 }
0x1183   : > { %v6223_v33 = vpop.xlane.xlu1 %6222 }
0x1184   : > { %8970 = vrcp.f32 %v6223_v33  ;;  %v6220_v54 = vpop.xlane.xlu0 %6219 }
0x1185   : > { %8972 = vrcp.f32 %v6220_v54 }
0x1188   : > { %v6229_v51 = vpop.xlane.xlu1 %6228 }
0x1189   : > { %8974 = vrcp.f32 %v6229_v51  ;;  %v6226_v15 = vpop.xlane.xlu0 %6225 }
0x118a   : > { %8976 = vrcp.f32 %v6226_v15 }
0x118c   : > { %v6235_v41 = vpop.xlane.xlu1 %6234 }
0x118d   : > { %v8969_v60 = vpop.eup %8968  ;;  %8978 = vrcp.f32 %v6235_v41  ;;  %v6232_v50 = vpop.xlane.xlu0 %6231 }
0x118e   : > { %8980 = vrcp.f32 %v6232_v50  ;;  %v6247_v62 = vmul.f32 %v8969_v60, %v8953_v36 }
0x1190   : > { %8609 = vmatmul.mubr.msk.f32.vlgmr.msra.gmra.mxu1 %vm624_vm1, %v6247_v62  ;;  %v6788_v11 = vpop.permute.xlu1 %6787 }
0x1191   : > { %v8971_v52 = vpop.eup %8970  ;;  %v6238_v58 = vpop.xlane.xlu0 %6237  ;;  %8617 = vmatpush3.msra.mxu1 %v6408_v32  ;;  %8618 = vmatprep.mubr.msk.f32.mxu1 %vm9081_vm3, %v9080_v37 }
0x1192   : > { %v8973_v20 = vpop.eup %8972  ;;  %8982 = vrcp.f32 %v6238_v58  ;;  %8626 = vmatprep.subr.mxu1 %v9080_v37  ;;  %v6249_v56 = vmul.f32 %v8971_v52, %v8955_v22 }
0x1193   : > { %v6248_v17 = vmul.f32 %v8973_v20, %v8957_v1 }
0x1194   : > { %8619 = vmatmul.mubr.msk.f32.vlgmr.msra.gmra.mxu1 %vm624_vm1, %v6249_v56 }
0x1195   : > { %8614 = vmatmul.mubr.msk.f32.vlgmr.msra.gmra.mxu0 %vm624_vm1, %v6248_v17  ;;  %8627 = vmatpush3.msra.mxu1 %v6560_v42  ;;  %v6712_v28 = vpop.permute.xlu0 %6711 }
0x1196   : > { %v8975_v38 = vpop.eup %8974  ;;  %8622 = vmatpush3.msra.mxu0 %v6484_v9  ;;  %8623 = vmatprep.mubr.msk.f32.mxu0 %vm9081_vm3, %v9080_v37 }
0x1197   : > { %v8977_v34 = vpop.eup %8976  ;;  %8628 = vmatprep.mubr.msk.f32.mxu1 %vm9081_vm3, %v9080_v37  ;;  %8631 = vmatprep.subr.mxu0 %v9080_v37  ;;  %v6251_v39 = vmul.f32 %v8975_v38, %v8959_v61 }
0x1198   : > { %8636 = vmatprep.subr.mxu1 %v9080_v37  ;;  %v6250_v59 = vmul.f32 %v8977_v34, %v8961_v27 }
0x1199   : > { %8629 = vmatmul.mubr.msk.f32.vlgmr.msra.gmra.mxu1 %vm624_vm1, %v6251_v39 }
0x119a   : > { %v8979_v45 = vpop.eup %8978  ;;  %8624 = vmatmul.mubr.msk.f32.vlgmr.msra.gmra.mxu0 %vm624_vm1, %v6250_v59  ;;  %8637 = vmatpush3.msra.mxu1 %v6712_v28 }
0x119b   : > { %v8981_v14 = vpop.eup %8980  ;;  %8632 = vmatpush3.msra.mxu0 %v6636_v10  ;;  %8633 = vmatprep.mubr.msk.f32.mxu0 %vm9081_vm3, %v9080_v37  ;;  %v6253_v21 = vmul.f32 %v8979_v45, %v8963_v23 }
0x119c   : > { %8638 = vmatprep.mubr.msk.f32.mxu1 %vm9081_vm3, %v9080_v37  ;;  %8641 = vmatprep.subr.mxu0 %v9080_v37  ;;  %v6252_v46 = vmul.f32 %v8981_v14, %v10228_v57 }
0x119d   : > { %8639 = vmatmul.mubr.msk.f32.vlgmr.msra.gmra.mxu1 %vm624_vm1, %v6253_v21  ;;  %8646 = vmatprep.subr.bf16.mxu1 %v8810_v48 }
0x119e   : > { %8634 = vmatmul.mubr.msk.f32.vlgmr.msra.gmra.mxu0 %vm624_vm1, %v6252_v46  ;;  %8647 = vmatpush3.bf16.msra.mxu1 %v8810_v48 }
0x119f   : > { %v8983_v36 = vpop.eup %8982  ;;  %8642 = vmatpush3.msra.mxu0 %v6788_v11  ;;  %8643 = vmatprep.mubr.msk.f32.mxu0 %vm9081_vm3, %v9080_v37 }
0x11a0   : > { %v6254_v47 = vmul.f32 %v8983_v36, %v10233_v7  ;;  %8648 = vmatprep.subr.bf16.mxu1 %v8811_v0 }
0x11a2   : > { %8644 = vmatmul.mubr.msk.f32.vlgmr.msra.gmra.mxu0 %vm624_vm1, %v6254_v47  ;;  %8649 = vmatpush3.bf16.msra.mxu1 %v8811_v0 }
0x1250   : > { %v6327_v63 = vpop.f32.mrf.mxu1 }
0x1252   : > { %v8610_v22 = vpop.f32.mrf.mxu1 }
0x1254   : > { %v6479_v1 = vpop.f32.mrf.mxu1 }
0x1255   : > { %v6403_v25 = vpop.f32.mrf.mxu0 }
0x1256   : > { %v8774_v2 = vpack.i.bf16 %v6403_v25, %v6327_v63  ;;  %v8620_v61 = vpop.f32.mrf.mxu1 }
0x1257   : > { %v8615_v27 = vpop.f32.mrf.mxu0 }
0x1258   : > { %8775 = vrot.lane.b32.xlu0 %v8774_v2, %s10653_s28 }
0x1259   : > { %v6631_v3 = vpop.f32.mrf.mxu1 }
0x125a   : > { %v6555_v4 = vpop.f32.mrf.mxu0 }
0x125b   : > { %v8779_v23 = vpack.i.bf16 %v6555_v4, %v6479_v1  ;;  %v8630_v57 = vpop.f32.mrf.mxu1 }
0x125c   : > { %v8625_v5 = vpop.f32.mrf.mxu0 }
0x125d   : > { %8780 = vrot.lane.b32.xlu1 %v8779_v23, %s10653_s28  ;;  %v6783_v6 = vpop.f32.mrf.mxu1 }
0x125e   : > { %v6707_v7 = vpop.f32.mrf.mxu0 }
0x125f   : > { %v8784_v8 = vpack.i.bf16 %v6707_v7, %v6631_v3  ;;  %v8640_v32 = vpop.f32.mrf.mxu1 }
0x1260   : > { %v8635_v9 = vpop.f32.mrf.mxu0 }
0x1261   : > { %8785 = vrot.lane.b32.xlu0 %v8784_v8, %s10653_s28 }
0x1262   : > { %v6859_v10 = vpop.f32.mrf.mxu0 }
0x1263   : > { %v8789_v13 = vpack.i.bf16 %v6859_v10, %v6783_v6 }
0x1264   : > { %v8645_v42 = vpop.f32.mrf.mxu0 }
0x1265   : > { %8790 = vrot.lane.b32.xlu1 %v8789_v13, %s10653_s28  ;;  %s596_s28 = scalar_lea.vmem [#allocation2], %s7830_s20 }
0x1266   : > { %s7767_s4 = sshll.u32 %s596_s28, 4  ;;  %s7768_s4 = int_to_ptr.vmem [resolvable:$true] %s7767_s4 }
0x1267   : > { %s9018_s22 = scalar_lea.vmem %s7768_s4, 128  ;;  %p9025_p0 = scmp.lt.s32.totalorder %s7768_s4, %s9023_s29 }
0x1268   : > { %p9019_p11 = scmp.ne.s32.totalorder %s7768_s4, %s9018_s22  ;;  %p9026_p1 = scmp.lt.s32.totalorder %s9024_s1, %s9018_s22 }
0x126a   : > { %p9020_p12 = pnand %p9019_p11, %p9227_p5  ;;  %p9027_p2 = por %p9026_p1, %p9025_p0 }
0x126c   : > { %p9021_p13 = pneg %p9020_p12 }
0x126e   : > { %p9028_p3 = pnand %p9027_p2, %p9021_p13 }
0x12ca   : > { %v8776_v33 = vpop.permute.xlu0 %8775 }
0x12cb   : > { %v8778_v54 = vunpack.i.h.bf16 %v8776_v33  ;;  %v8777_v51 = vunpack.i.l.bf16 %v8776_v33 }
0x12cd   : > { %v6896_v15 = vsel %vm814_vm4, %v10187_v12, %v8778_v54  ;;  %v6895_v41 = vsel %vm814_vm4, %v10185_v16, %v8777_v51 }
0x12ce   : > { %v6908_v60 = vpack.c.bf16 %v6896_v15, %v6895_v41 }
0x12cf   : > { %v8781_v50 = vpop.permute.xlu1 %8780 }
0x12d0   : > { %v8783_v62 = vunpack.i.h.bf16 %v8781_v50  ;;  %v8782_v52 = vunpack.i.l.bf16 %v8781_v50  ;;  %8650 = vmatprep.mubr.msk.bf16.mxu1 %vm733_vm2, %v6908_v60 }
0x12d2   : > { %v6898_v58 = vsel %vm814_vm4, %v10193_v49, %v8783_v62  ;;  %v6897_v20 = vsel %vm814_vm4, %v10189_v19, %v8782_v52 }
0x12d3   : > { %v6909_v56 = vpack.c.bf16 %v6898_v58, %v6897_v20  ;;  %v8786_v17 = vpop.permute.xlu0 %8785 }
0x12d4   : > { %v8788_v38 = vunpack.i.h.bf16 %v8786_v17  ;;  %v8787_v34 = vunpack.i.l.bf16 %v8786_v17 }
0x12d5   : > { %8651 = vmatmul.mubr.msk.bf16.vlgmr.msra.gmra.mxu1 %vm733_vm2, %v6909_v56 }
0x12d6   : > { %v6900_v16 = vsel %vm814_vm4, %v10197_v31, %v8788_v38  ;;  %v6899_v12 = vsel %vm814_vm4, %v10191_v29, %v8787_v34  ;;  %v7985_v29 = vld [vmem:[%s10645_s6 + $0x1] ss:$0 sm:$0xff] }
0x12d7   : > { %v6910_v39 = vpack.c.bf16 %v6900_v16, %v6899_v12  ;;  %v8791_v59 = vpop.permute.xlu1 %8790 }
0x12d8   : > { %v8793_v28 = vunpack.i.h.bf16 %v8791_v59  ;;  %v8792_v45 = vunpack.i.l.bf16 %v8791_v59 }
0x12d9   : > { %8654 = vmatprep.mubr.msk.bf16.mxu1 %vm733_vm2, %v6910_v39 }
0x12da   : > { %v6902_v19 = vsel %vm814_vm4, %v10199_v55, %v8793_v28  ;;  %v6901_v49 = vsel %vm814_vm4, %v10195_v40, %v8792_v45 }
0x12db   : > { %v6911_v14 = vpack.c.bf16 %v6902_v19, %v6901_v49 }
0x12dd   : > { %8655 = vmatmul.mubr.msk.bf16.gmra.mxu1 %vm733_vm2, %v6911_v14 }
0x1395   : > { %v8652_v21 = vpop.f32.mrf.mxu1 }
0x1396   : > { %v6987_v46 = vadd.f32 %v8652_v21, %v7985_v29 }
0x1397   : > { %v6978_v31 = vpop.f32.mrf.mxu1 }
0x1398   : > { %v6979_v11 = vadd.f32 %v7985_v29, %v6978_v31  ;;  %v7011_v55 = vadd.f32 %v6987_v46, %v9891_v53 }
0x1399   : > { %v8653_v36 = vpop.f32.mrf.mxu1 }
0x139a   : > { %v7009_v47 = vadd.f32 %v6979_v11, %v9881_v24  ;;  %v6990_v48 = vadd.f32 %v8653_v36, %v7985_v29  ;;  %v7027_v24 = vsel %vm733_vm2, %v7011_v55, 0.0 }
0x139b   : > { %v6981_v63 = vpop.f32.mrf.mxu1 }
0x139c   : > { %v6982_v0 = vadd.f32 %v7985_v29, %v6981_v63  ;;  %v7021_v40 = vsel %vm733_vm2, %v7009_v47, 0.0  ;;  %v7012_v25 = vadd.f32 %v6990_v48, %v9893_v26 }
0x139d   : > { %v8656_v22 = vpop.f32.mrf.mxu1  ;;  %7022 = vadd.xlane.f32.xlu0 %v7021_v40  ;;  %v8813_v40 = vld [vmem:[%s10646_s7 + $0x10] sm:$0xff]  }
0x139e   : > { %v7010_v1 = vadd.f32 %v6982_v0, %v9884_v30  ;;  %v7003_v61 = vadd.f32 %v8656_v22, %v7985_v29  ;;  %v7030_v57 = vsel %vm733_vm2, %v7012_v25, 0.0  ;;  %v8812_v0 = vld [vmem:[%s10646_s7 + $0x18] sm:$0xff]   ;;  %s7765_s7 = scalar_lea.hbm %s10608_s19, %s8045_s25 }
0x139f   : > { %v6994_v2 = vpop.f32.mrf.mxu1  ;;  %8658 = vmatprep.subr.bf16.mxu0 %v8812_v0  ;;  %v8814_v22 = vld [vmem:[%s10598_s9 + $0x78] sm:$0xff]  }
0x13a0   : > { %v6995_v27 = vadd.f32 %v7985_v29, %v6994_v2  ;;  %v7024_v3 = vsel %vm733_vm2, %v7010_v1, 0.0  ;;  %v7015_v5 = vadd.f32 %v7003_v61, %v9906_v18  ;;  %8659 = vmatpush3.bf16.msra.mxu0 %v8812_v0  ;;  %8670 = vmatprep.subr.bf16.mxu1 %v8814_v22  ;;  %v8817_v2 = vld [vmem:[%s10598_s9 + $0x60] sm:$0xff]   ;;  %v8818_v61 = vld [vmem:[%s10598_s9 + $0x58] sm:$0xff]  }
0x13a1   : > { %v8657_v4 = vpop.f32.mrf.mxu1  ;;  %7025 = vadd.xlane.f32.xlu1 %v7024_v3  ;;  %7028 = vadd.xlane.f32.xlu0 %v7027_v24 }
0x13a2   : > { %v7013_v53 = vadd.f32 %v6995_v27, %v9900_v44  ;;  %v7006_v30 = vadd.f32 %v8657_v4, %v7985_v29  ;;  %v7039_v32 = vsel %vm733_vm2, %v7015_v5, 0.0  ;;  %8660 = vmatprep.subr.bf16.mxu0 %v8813_v40  ;;  %8671 = vmatpush3.bf16.msra.mxu1 %v8814_v22 }
0x13a3   : > { %v6997_v23 = vpop.f32.mrf.mxu1 }
0x13a4   : > { %v6998_v6 = vadd.f32 %v7985_v29, %v6997_v23  ;;  %v7033_v26 = vsel %vm733_vm2, %v7013_v53, 0.0  ;;  %v7016_v8 = vadd.f32 %v7006_v30, %v9908_v35  ;;  %8661 = vmatpush3.bf16.msra.mxu0 %v8813_v40 }
0x13a5   : > { %7034 = vadd.xlane.f32.xlu1 %v7033_v26  ;;  %7031 = vadd.xlane.f32.xlu0 %v7030_v57 }
0x13a6   : > { %v7014_v7 = vadd.f32 %v6998_v6, %v9902_v43  ;;  %v7042_v44 = vsel %vm733_vm2, %v7016_v8, 0.0  ;;  %8694 = vmatprep.subr.bf16.mxu0 %v9080_v37 }
0x13a8   : > { %v7036_v9 = vsel %vm733_vm2, %v7014_v7, 0.0 }
0x13a9   : > { %7040 = vadd.xlane.f32.xlu1 %v7039_v32  ;;  %7037 = vadd.xlane.f32.xlu0 %v7036_v9 }
0x13ad   : > { %7043 = vadd.xlane.f32.xlu0 %v7042_v44 }
0x1426   : > { %v7023_v18 = vpop.xlane.xlu0 %7022 }
0x1427   : > { %v7045_v10 = vmul.f32 0.03125, %v7023_v18 }
0x1429   : > { %v10316_v13 = vsub.f32 %v7009_v47, %v7045_v10 }
0x142a   : > { %v7026_v42 = vpop.xlane.xlu1 %7025  ;;  %v7029_v33 = vpop.xlane.xlu0 %7028 }
0x142b   : > { %v7046_v54 = vmul.f32 0.03125, %v7026_v42  ;;  %v7047_v51 = vmul.f32 0.03125, %v7029_v33  ;;  %v7061_v43 = vmul.f32 %v10316_v13, %v10316_v13 }
0x142d   : > { %v10320_v35 = vsub.f32 %v7010_v1, %v7046_v54  ;;  %v10322_v15 = vsub.f32 %v7011_v55, %v7047_v51  ;;  %v7069_v41 = vsel %vm733_vm2, %v7061_v43, 0.0  ;;  %v8815_v1 = vld [vmem:[%s10598_s9 + $0x70] sm:$0xff]  }
0x142e   : > { %v7035_v60 = vpop.xlane.xlu1 %7034  ;;  %7070 = vadd.xlane.f32.xlu1 %v7069_v41  ;;  %v7032_v50 = vpop.xlane.xlu0 %7031  ;;  %8672 = vmatprep.subr.bf16.mxu1 %v8815_v1 }
0x142f   : > { %v7049_v62 = vmul.f32 0.03125, %v7035_v60  ;;  %v7048_v52 = vmul.f32 0.03125, %v7032_v50  ;;  %v7062_v58 = vmul.f32 %v10320_v35, %v10320_v35  ;;  %v7063_v20 = vmul.f32 %v10322_v15, %v10322_v15  ;;  %8673 = vmatpush3.bf16.msra.mxu1 %v8815_v1 }
0x1431   : > { %v10329_v56 = vsub.f32 %v7013_v53, %v7049_v62  ;;  %v10331_v17 = vsub.f32 %v7012_v25, %v7048_v52  ;;  %v7072_v38 = vsel %vm733_vm2, %v7062_v58, 0.0  ;;  %v7075_v34 = vsel %vm733_vm2, %v7063_v20, 0.0  ;;  %v8816_v25 = vld [vmem:[%s10598_s9 + $0x68] sm:$0xff]   ;;  %v7994_v62 = vld [vmem:[%s10600_s11 + $0x1] ss:$0 sm:$0xff] }
0x1432   : > { %v7041_v16 = vpop.xlane.xlu1 %7040  ;;  %7073 = vadd.xlane.f32.xlu0 %v7072_v38  ;;  %7076 = vadd.xlane.f32.xlu1 %v7075_v34  ;;  %v7038_v12 = vpop.xlane.xlu0 %7037  ;;  %v7995_v34 = vld [vmem:[%s10601_s12 + $0x1] ss:$0 sm:$0xff] }
0x1433   : > { %v7051_v39 = vmul.f32 0.03125, %v7041_v16  ;;  %v7050_v59 = vmul.f32 0.03125, %v7038_v12  ;;  %v7065_v28 = vmul.f32 %v10329_v56, %v10329_v56  ;;  %v7064_v45 = vmul.f32 %v10331_v17, %v10331_v17  ;;  %8674 = vmatprep.subr.bf16.mxu1 %v8816_v25 }
0x1434   : > { %8675 = vmatpush3.bf16.msra.mxu1 %v8816_v25 }
0x1435   : > { %v10339_v19 = vsub.f32 %v7015_v5, %v7051_v39  ;;  %v10341_v49 = vsub.f32 %v7014_v7, %v7050_v59  ;;  %v7081_v14 = vsel %vm733_vm2, %v7065_v28, 0.0  ;;  %v7078_v21 = vsel %vm733_vm2, %v7064_v45, 0.0  ;;  %8676 = vmatprep.subr.bf16.mxu1 %v8817_v2 }
0x1436   : > { %7082 = vadd.xlane.f32.xlu1 %v7081_v14  ;;  %7079 = vadd.xlane.f32.xlu0 %v7078_v21  ;;  %v7044_v29 = vpop.xlane.xlu0 %7043 }
0x1437   : > { %v7052_v31 = vmul.f32 0.03125, %v7044_v29  ;;  %v7067_v46 = vmul.f32 %v10339_v19, %v10339_v19  ;;  %v7066_v11 = vmul.f32 %v10341_v49, %v10341_v49 }
0x1438   : > { %8677 = vmatpush3.bf16.msra.mxu1 %v8817_v2 }
0x1439   : > { %v10349_v36 = vsub.f32 %v7016_v8, %v7052_v31  ;;  %v7087_v47 = vsel %vm733_vm2, %v7067_v46, 0.0  ;;  %v7084_v48 = vsel %vm733_vm2, %v7066_v11, 0.0  ;;  %8678 = vmatprep.subr.bf16.mxu1 %v8818_v61 }
0x143a   : > { %7088 = vadd.xlane.f32.xlu1 %v7087_v47  ;;  %7085 = vadd.xlane.f32.xlu0 %v7084_v48 }
0x143b   : > { %v7068_v63 = vmul.f32 %v10349_v36, %v10349_v36 }
0x143c   : > { %8679 = vmatpush3.bf16.msra.mxu1 %v8818_v61  ;;  %v8819_v61 = vld [vmem:[%s10598_s9 + $0x50] sm:$0xff]  }
0x143d   : > { %v7090_v55 = vsel %vm733_vm2, %v7068_v63, 0.0  ;;  %8680 = vmatprep.subr.bf16.mxu1 %v8819_v61 }
0x143e   : > { %7091 = vadd.xlane.f32.xlu0 %v7090_v55 }
0x1440   : > { %8681 = vmatpush3.bf16.msra.mxu1 %v8819_v61 }
0x14b7   : > { %v7071_v27 = vpop.xlane.xlu1 %7070 }
0x14b8   : > { %v7093_v3 = vmul.f32 0.03125, %v7071_v27  ;;  %v8820_v27 = vld [vmem:[%s10598_s9 + $0x48] sm:$0xff]  }
0x14b9   : > { %8682 = vmatprep.subr.bf16.mxu1 %v8820_v27 }
0x14ba   : > { %v7101_v24 = vadd.f32 1e-05, %v7093_v3  ;;  %8683 = vmatpush3.bf16.msra.mxu1 %v8820_v27  ;;  %v8821_v3 = vld [vmem:[%s10598_s9 + $0x40] sm:$0xff]  }
0x14bb   : > { %v7077_v4 = vpop.xlane.xlu1 %7076  ;;  %v7074_v53 = vpop.xlane.xlu0 %7073  ;;  %8684 = vmatprep.subr.bf16.mxu1 %v8821_v3 }
0x14bc   : > { %8984 = vrsqrt.f32 %v7101_v24  ;;  %v7095_v23 = vmul.f32 0.03125, %v7077_v4  ;;  %v7094_v57 = vmul.f32 0.03125, %v7074_v53  ;;  %v8001_v53 = vld [vmem:[%s10647_s8 + $0x1] ss:$0 sm:$0xff]  ;;  %s7754_s8 = scalar_lea.sflag [#allocation3], %s594_s24 }
0x14be   : > { %v7103_v5 = vadd.f32 1e-05, %v7095_v23  ;;  %v7102_v30 = vadd.f32 1e-05, %v7094_v57  ;;  %8685 = vmatpush3.bf16.msra.mxu1 %v8821_v3 }
0x14bf   : > { %v7083_v6 = vpop.xlane.xlu1 %7082  ;;  %v7080_v26 = vpop.xlane.xlu0 %7079 }
0x14c0   : > { %8986 = vrsqrt.f32 %v7103_v5  ;;  %v7097_v7 = vmul.f32 0.03125, %v7083_v6  ;;  %v7096_v8 = vmul.f32 0.03125, %v7080_v26 }
0x14c1   : > { %8988 = vrsqrt.f32 %v7102_v30 }
0x14c2   : > { %v7105_v32 = vadd.f32 1e-05, %v7097_v7  ;;  %v7104_v9 = vadd.f32 1e-05, %v7096_v8 }
0x14c3   : > { %v7089_v44 = vpop.xlane.xlu1 %7088  ;;  %v7086_v18 = vpop.xlane.xlu0 %7085 }
0x14c4   : > { %8990 = vrsqrt.f32 %v7105_v32  ;;  %v7099_v10 = vmul.f32 0.03125, %v7089_v44  ;;  %v7098_v42 = vmul.f32 0.03125, %v7086_v18 }
0x14c5   : > { %8992 = vrsqrt.f32 %v7104_v9 }
0x14c6   : > { %v7107_v33 = vadd.f32 1e-05, %v7099_v10  ;;  %v7106_v54 = vadd.f32 1e-05, %v7098_v42 }
0x14c7   : > { %v7092_v51 = vpop.xlane.xlu0 %7091 }
0x14c8   : > { %8994 = vrsqrt.f32 %v7107_v33  ;;  %v7100_v43 = vmul.f32 0.03125, %v7092_v51 }
0x14c9   : > { %v8985_v41 = vpop.eup %8984  ;;  %8996 = vrsqrt.f32 %v7106_v54 }
0x14ca   : > { %v7108_v60 = vadd.f32 1e-05, %v7100_v43  ;;  %v7117_v50 = vmul.f32 %v8985_v41, %v10316_v13 }
0x14cc   : > { %8998 = vrsqrt.f32 %v7108_v60  ;;  %v7131_v20 = vmul.f32 %v7994_v62, %v7117_v50 }
0x14cd   : > { %v8987_v52 = vpop.eup %8986 }
0x14ce   : > { %v8989_v58 = vpop.eup %8988  ;;  %v7119_v38 = vmul.f32 %v8987_v52, %v10322_v15  ;;  %v10387_v13 = vadd.f32 %v7995_v34, %v7131_v20 }
0x14cf   : > { %v7118_v16 = vmul.f32 %v8989_v58, %v10320_v35 }
0x14d0   : > { %v7133_v14 = vmul.f32 %v7994_v62, %v7119_v38 }
0x14d1   : > { %v8991_v12 = vpop.eup %8990  ;;  %v7132_v39 = vmul.f32 %v7994_v62, %v7118_v16 }
0x14d2   : > { %v8993_v59 = vpop.eup %8992  ;;  %v7121_v21 = vmul.f32 %v8991_v12, %v10329_v56  ;;  %v10397_v11 = vadd.f32 %v7995_v34, %v7133_v14 }
0x14d3   : > { %v7120_v28 = vmul.f32 %v8993_v59, %v10331_v17  ;;  %v10390_v45 = vadd.f32 %v7995_v34, %v7132_v39 }
0x14d4   : > { %v7135_v48 = vmul.f32 %v7994_v62, %v7121_v21 }
0x14d5   : > { %v8995_v29 = vpop.eup %8994  ;;  %v7158_v15 = vpack.c.bf16 %v10390_v45, %v10387_v13  ;;  %v7134_v31 = vmul.f32 %v7994_v62, %v7120_v28 }
0x14d6   : > { %v8997_v46 = vpop.eup %8996  ;;  %v7123_v35 = vmul.f32 %v8995_v29, %v10339_v19  ;;  %v10406_v19 = vadd.f32 %v7995_v34, %v7135_v48 }
0x14d7   : > { %8662 = vmatprep.mubr.msk.bf16.mxu0 %vm733_vm2, %v7158_v15  ;;  %v10399_v47 = vadd.f32 %v7995_v34, %v7134_v31  ;;  %v7122_v17 = vmul.f32 %v8997_v46, %v10341_v49 }
0x14d8   : > { %v7137_v40 = vmul.f32 %v7994_v62, %v7123_v35 }
0x14d9   : > { %v8999_v63 = vpop.eup %8998  ;;  %v7159_v56 = vpack.c.bf16 %v10399_v47, %v10397_v11  ;;  %v7136_v55 = vmul.f32 %v7994_v62, %v7122_v17 }
0x14da   : > { %v7124_v0 = vmul.f32 %v8999_v63, %v10349_v36  ;;  %v10412_v49 = vadd.f32 %v7995_v34, %v7137_v40 }
0x14db   : > { %8663 = vmatmul.mubr.msk.bf16.vlgmr.msra.gmra.mxu0 %vm733_vm2, %v7159_v56  ;;  %v10408_v22 = vadd.f32 %v7995_v34, %v7136_v55 }
0x14dc   : > { %v7138_v1 = vmul.f32 %v7994_v62, %v7124_v0 }
0x14dd   : > { %v7160_v25 = vpack.c.bf16 %v10408_v22, %v10406_v19 }
0x14de   : > { %v10414_v2 = vadd.f32 %v7995_v34, %v7138_v1  ;;  %v8025_v34 = vld [vmem:[%s10599_s10 + $0x1] ss:$0 sm:$0xff] }
0x14df   : > { %8666 = vmatprep.mubr.msk.bf16.mxu0 %vm733_vm2, %v7160_v25 }
0x14e0   : > { %v7161_v36 = vpack.c.bf16 %v10414_v2, %v10412_v49 }
0x14e3   : > { %8667 = vmatmul.mubr.msk.bf16.gmra.mxu0 %vm733_vm2, %v7161_v36 }
0x14e4   : > { %8698 = vmatprep.mubr.msk.bf16.mxu0 %vm9081_vm3, %v9080_v37 }
0x159b   : > { %v8664_v24 = vpop.f32.mrf.mxu0 }
0x159c   : > { %v7237_v30 = vadd.f32 %v8664_v24, %v8001_v53 }
0x159d   : > { %v7228_v4 = vpop.f32.mrf.mxu0 }
0x159e   : > { %v7229_v57 = vadd.f32 %v8001_v53, %v7228_v4  ;;  %v7261_v44 = vmax.f32 %v7237_v30, 0.0 }
0x159f   : > { %v8665_v23 = vpop.f32.mrf.mxu0 }
0x15a0   : > { %v7240_v5 = vadd.f32 %v8665_v23, %v8001_v53  ;;  %v7259_v32 = vmax.f32 %v7229_v57, 0.0 }
0x15a1   : > { %v7231_v6 = vpop.f32.mrf.mxu0 }
0x15a2   : > { %v7232_v26 = vadd.f32 %v8001_v53, %v7231_v6  ;;  %v7262_v7 = vmax.f32 %v7240_v5, 0.0 }
0x15a3   : > { %v8668_v8 = vpop.f32.mrf.mxu0 }
0x15a4   : > { %v7260_v9 = vmax.f32 %v7232_v26, 0.0  ;;  %v7285_v42 = vpack.c.bf16 %v7262_v7, %v7261_v44  ;;  %v7253_v43 = vadd.f32 %v8668_v8, %v8001_v53 }
0x15a5   : > { %v7244_v18 = vpop.f32.mrf.mxu0 }
0x15a6   : > { %v7284_v10 = vpack.c.bf16 %v7260_v9, %v7259_v32  ;;  %v7245_v54 = vadd.f32 %v8001_v53, %v7244_v18  ;;  %v7265_v58 = vmax.f32 %v7253_v43, 0.0 }
0x15a7   : > { %v8669_v33 = vpop.f32.mrf.mxu0 }
0x15a8   : > { %v7256_v51 = vadd.f32 %v8669_v33, %v8001_v53  ;;  %8686 = vmatprep.mubr.bf16.mxu1 %v7284_v10  ;;  %v7263_v62 = vmax.f32 %v7245_v54, 0.0 }
0x15a9   : > { %v7247_v41 = vpop.f32.mrf.mxu0  ;;  %8687 = vmatmul.mubr.bf16.vlgmr.msra.gmra.mxu1 %v7285_v42 }
0x15aa   : > { %v7248_v60 = vadd.f32 %v8001_v53, %v7247_v41  ;;  %v7266_v50 = vmax.f32 %v7256_v51, 0.0 }
0x15ac   : > { %v7264_v52 = vmax.f32 %v7248_v60, 0.0  ;;  %v7287_v38 = vpack.c.bf16 %v7266_v50, %v7265_v58 }
0x15ae   : > { %v7286_v20 = vpack.c.bf16 %v7264_v52, %v7263_v62 }
0x15b0   : > { %8690 = vmatprep.mubr.bf16.mxu1 %v7286_v20 }
0x15b1   : > { %8691 = vmatmul.mubr.bf16.gmra.mxu1 %v7287_v38 }
0x1669   : > { %v8688_v16 = vpop.f32.mrf.mxu1 }
0x166a   : > { %v7387_v12 = vadd.f32 %v8688_v16, %v8025_v34 }
0x166b   : > { %v7378_v39 = vpop.f32.mrf.mxu1 }
0x166c   : > { %v7411_v59 = vadd.f32 %v7387_v12, %v10397_v11  ;;  %v7379_v28 = vadd.f32 %v8025_v34, %v7378_v39 }
0x166d   : > { %v8689_v14 = vpop.f32.mrf.mxu1 }
0x166e   : > { %v7409_v21 = vadd.f32 %v7379_v28, %v10387_v13  ;;  %v7390_v29 = vadd.f32 %v8689_v14, %v8025_v34  ;;  %v7427_v15 = vsel %vm733_vm2, %v7411_v59, 0.0 }
0x166f   : > { %7428 = vadd.xlane.f32.xlu1 %v7427_v15  ;;  %v7381_v31 = vpop.f32.mrf.mxu1 }
0x1670   : > { %v7412_v46 = vadd.f32 %v7390_v29, %v10399_v47  ;;  %v7382_v35 = vadd.f32 %v8025_v34, %v7381_v31  ;;  %v7421_v56 = vsel %vm733_vm2, %v7409_v21, 0.0  ;;  %v8822_v31 = vld [vmem:[%s10604_s15 + $0x8] sm:$0xff]  }
0x1671   : > { %v8692_v17 = vpop.f32.mrf.mxu1  ;;  %8695 = vmatpush3.bf16.msra.mxu0 %v8822_v31 }
0x1672   : > { %v7410_v48 = vadd.f32 %v7382_v35, %v10390_v45  ;;  %v7430_v63 = vsel %vm733_vm2, %v7412_v46, 0.0  ;;  %v7403_v55 = vadd.f32 %v8692_v17, %v8025_v34  ;;  %8696 = vmatprep.subr.bf16.mxu0 %v9080_v37 }
0x1673   : > { %7431 = vadd.xlane.f32.xlu0 %v7430_v63  ;;  %7422 = vadd.xlane.f32.xlu1 %v7421_v56  ;;  %v7394_v11 = vpop.f32.mrf.mxu1 }
0x1674   : > { %v7395_v13 = vadd.f32 %v8025_v34, %v7394_v11  ;;  %v7424_v1 = vsel %vm733_vm2, %v7410_v48, 0.0  ;;  %v7415_v25 = vadd.f32 %v7403_v55, %v10412_v49 }
0x1675   : > { %v8693_v0 = vpop.f32.mrf.mxu1 }
0x1676   : > { %v7413_v40 = vadd.f32 %v7395_v13, %v10406_v19  ;;  %v7406_v36 = vadd.f32 %v8693_v0, %v8025_v34  ;;  %v7439_v4 = vsel %vm733_vm2, %v7415_v25, 0.0 }
0x1677   : > { %7425 = vadd.xlane.f32.xlu0 %v7424_v1  ;;  %v7397_v47 = vpop.f32.mrf.mxu1 }
0x1678   : > { %v7398_v45 = vadd.f32 %v8025_v34, %v7397_v47  ;;  %v7433_v61 = vsel %vm733_vm2, %v7413_v40, 0.0  ;;  %v7416_v3 = vadd.f32 %v7406_v36, %v10414_v2 }
0x1679   : > { %7434 = vadd.xlane.f32.xlu1 %v7433_v61 }
0x167a   : > { %v7414_v27 = vadd.f32 %v7398_v45, %v10408_v22  ;;  %v7442_v19 = vsel %vm733_vm2, %v7416_v3, 0.0 }
0x167c   : > { %v7436_v24 = vsel %vm733_vm2, %v7414_v27, 0.0 }
0x167d   : > { %7437 = vadd.xlane.f32.xlu0 %v7436_v24  ;;  %7440 = vadd.xlane.f32.xlu1 %v7439_v4 }
0x1681   : > { %7443 = vadd.xlane.f32.xlu0 %v7442_v19 }
0x16f8   : > { %v7429_v53 = vpop.xlane.xlu1 %7428 }
0x16f9   : > { %v7447_v49 = vmul.f32 0.03125, %v7429_v53  ;;  %v10503_v53 = vld [vmem:[%s10602_s13 + $0x1] ss:$0 sm:$0xff] }
0x16fb   : > { %v10453_v23 = vsub.f32 %v7411_v59, %v7447_v49 }
0x16fc   : > { %v7423_v57 = vpop.xlane.xlu1 %7422  ;;  %v7432_v5 = vpop.xlane.xlu0 %7431 }
0x16fd   : > { %v7445_v30 = vmul.f32 0.03125, %v7423_v57  ;;  %v7448_v6 = vmul.f32 0.03125, %v7432_v5  ;;  %v7463_v22 = vmul.f32 %v10453_v23, %v10453_v23 }
0x16ff   : > { %v10457_v2 = vsub.f32 %v7409_v21, %v7445_v30  ;;  %v10459_v26 = vsub.f32 %v7412_v46, %v7448_v6  ;;  %v7475_v7 = vsel %vm733_vm2, %v7463_v22, 0.0  ;;  %v8823_v46 = vld [vmem:[%s10604_s15] sm:$0xff]  }
0x1700   : > { %7476 = vadd.xlane.f32.xlu1 %v7475_v7  ;;  %v7426_v8 = vpop.xlane.xlu0 %7425  ;;  %8697 = vmatpush3.bf16.msra.mxu0 %v8823_v46  ;;  %v10509_v30 = vld [vmem:[%s10603_s14 + $0x1] ss:$0 sm:$0xff] }
0x1701   : > { %v7446_v32 = vmul.f32 0.03125, %v7426_v8  ;;  %v7461_v9 = vmul.f32 %v10457_v2, %v10457_v2  ;;  %v7464_v44 = vmul.f32 %v10459_v26, %v10459_v26 }
0x1702   : > { %v7435_v18 = vpop.xlane.xlu1 %7434 }
0x1703   : > { %v10466_v10 = vsub.f32 %v7410_v48, %v7446_v32  ;;  %v7449_v42 = vmul.f32 0.03125, %v7435_v18  ;;  %v7469_v33 = vsel %vm733_vm2, %v7461_v9, 0.0  ;;  %v7478_v54 = vsel %vm733_vm2, %v7464_v44, 0.0 }
0x1704   : > { %7470 = vadd.xlane.f32.xlu1 %v7469_v33  ;;  %7479 = vadd.xlane.f32.xlu0 %v7478_v54 }
0x1705   : > { %v10470_v51 = vsub.f32 %v7413_v40, %v7449_v42  ;;  %v7462_v43 = vmul.f32 %v10466_v10, %v10466_v10 }
0x1706   : > { %v7441_v41 = vpop.xlane.xlu1 %7440  ;;  %v7438_v60 = vpop.xlane.xlu0 %7437 }
0x1707   : > { %v7451_v50 = vmul.f32 0.03125, %v7441_v41  ;;  %v7450_v62 = vmul.f32 0.03125, %v7438_v60  ;;  %v7472_v52 = vsel %vm733_vm2, %v7462_v43, 0.0  ;;  %v7465_v58 = vmul.f32 %v10470_v51, %v10470_v51 }
0x1708   : > { %7473 = vadd.xlane.f32.xlu0 %v7472_v52 }
0x1709   : > { %v10477_v20 = vsub.f32 %v7415_v25, %v7451_v50  ;;  %v10479_v38 = vsub.f32 %v7414_v27, %v7450_v62  ;;  %v7481_v34 = vsel %vm733_vm2, %v7465_v58, 0.0 }
0x170a   : > { %7482 = vadd.xlane.f32.xlu1 %v7481_v34  ;;  %v7444_v16 = vpop.xlane.xlu0 %7443 }
0x170b   : > { %v7452_v12 = vmul.f32 0.03125, %v7444_v16  ;;  %v7467_v39 = vmul.f32 %v10477_v20, %v10477_v20  ;;  %v7466_v59 = vmul.f32 %v10479_v38, %v10479_v38 }
0x170d   : > { %v10486_v28 = vsub.f32 %v7416_v3, %v7452_v12  ;;  %v7487_v14 = vsel %vm733_vm2, %v7467_v39, 0.0  ;;  %v7484_v21 = vsel %vm733_vm2, %v7466_v59, 0.0 }
0x170e   : > { %7488 = vadd.xlane.f32.xlu1 %v7487_v14  ;;  %7485 = vadd.xlane.f32.xlu0 %v7484_v21 }
0x170f   : > { %v7468_v29 = vmul.f32 %v10486_v28, %v10486_v28 }
0x1711   : > { %v7490_v15 = vsel %vm733_vm2, %v7468_v29, 0.0 }
0x1712   : > { %7491 = vadd.xlane.f32.xlu0 %v7490_v15 }
0x1789   : > { %v7477_v35 = vpop.xlane.xlu1 %7476 }
0x178a   : > { %v7495_v17 = vmul.f32 0.03125, %v7477_v35 }
0x178c   : > { %v7503_v48 = vadd.f32 1e-05, %v7495_v17 }
0x178d   : > { %v7471_v63 = vpop.xlane.xlu1 %7470  ;;  %v7480_v56 = vpop.xlane.xlu0 %7479 }
0x178e   : > { %9000 = vrsqrt.f32 %v7503_v48  ;;  %v7493_v11 = vmul.f32 0.03125, %v7471_v63  ;;  %v7496_v55 = vmul.f32 0.03125, %v7480_v56 }
0x1790   : > { %v7501_v13 = vadd.f32 1e-05, %v7493_v11  ;;  %v7504_v0 = vadd.f32 1e-05, %v7496_v55 }
0x1791   : > { %v7474_v40 = vpop.xlane.xlu0 %7473 }
0x1792   : > { %9002 = vrsqrt.f32 %v7501_v13  ;;  %v7494_v1 = vmul.f32 0.03125, %v7474_v40 }
0x1793   : > { %9004 = vrsqrt.f32 %v7504_v0  ;;  %v7483_v47 = vpop.xlane.xlu1 %7482 }
0x1794   : > { %v7502_v25 = vadd.f32 1e-05, %v7494_v1  ;;  %v7497_v36 = vmul.f32 0.03125, %v7483_v47 }
0x1796   : > { %9006 = vrsqrt.f32 %v7502_v25  ;;  %v7505_v37 = vadd.f32 1e-05, %v7497_v36 }
0x1797   : > { %v7489_v45 = vpop.xlane.xlu1 %7488  ;;  %v7486_v61 = vpop.xlane.xlu0 %7485 }
0x1798   : > { %9008 = vrsqrt.f32 %v7505_v37  ;;  %v7499_v27 = vmul.f32 0.03125, %v7489_v45  ;;  %v7498_v3 = vmul.f32 0.03125, %v7486_v61 }
0x179a   : > { %v7507_v24 = vadd.f32 1e-05, %v7499_v27  ;;  %v7506_v4 = vadd.f32 1e-05, %v7498_v3 }
0x179b   : > { %v9001_v19 = vpop.eup %9000  ;;  %v7492_v49 = vpop.xlane.xlu0 %7491 }
0x179c   : > { %v7519_v57 = vmul.f32 %v9001_v19, %v10453_v23  ;;  %9010 = vrsqrt.f32 %v7507_v24  ;;  %v7500_v5 = vmul.f32 0.03125, %v7492_v49 }
0x179d   : > { %9012 = vrsqrt.f32 %v7506_v4 }
0x179e   : > { %v7533_v6 = vmul.f32 %v10503_v53, %v7519_v57  ;;  %v7508_v22 = vadd.f32 1e-05, %v7500_v5 }
0x179f   : > { %v9003_v7 = vpop.eup %9002 }
0x17a0   : > { %v9005_v8 = vpop.eup %9004  ;;  %v7547_v32 = vadd.f32 %v10509_v30, %v7533_v6  ;;  %v7517_v9 = vmul.f32 %v9003_v7, %v10457_v2  ;;  %9014 = vrsqrt.f32 %v7508_v22 }
0x17a1   : > { %v7520_v23 = vmul.f32 %v9005_v8, %v10459_v26 }
0x17a2   : > { %v7567_v44 = vsel %vm733_vm2, %v7547_v32, 0.0  ;;  %v7531_v18 = vmul.f32 %v10503_v53, %v7517_v9 }
0x17a3   : > { %v9007_v42 = vpop.eup %9006  ;;  %v7568_v33 = vrot.slane %v7567_v44, 4  ;;  %v7534_v54 = vmul.f32 %v10503_v53, %v7520_v23 }
0x17a4   : > { %v7545_v43 = vadd.f32 %v10509_v30, %v7531_v18  ;;  %v7518_v41 = vmul.f32 %v9007_v42, %v10466_v10 }
0x17a5   : > { %v9009_v60 = vpop.eup %9008  ;;  %v7569_v50 = vadd.f32 %v7568_v33, %v7567_v44  ;;  %v7548_v62 = vadd.f32 %v10509_v30, %v7534_v54 }
0x17a6   : > { %v7553_v2 = vsel %vm733_vm2, %v7545_v43, 0.0  ;;  %v7532_v26 = vmul.f32 %v10503_v53, %v7518_v41  ;;  %v7521_v52 = vmul.f32 %v9009_v60, %v10470_v51 }
0x17a7   : > { %v7570_v58 = vrot.slane %v7569_v50, 2  ;;  %v7554_v34 = vrot.slane %v7553_v2, 4  ;;  %v7574_v16 = vsel %vm733_vm2, %v7548_v62, 0.0 }
0x17a8   : > { %v7575_v12 = vrot.slane %v7574_v16, 4  ;;  %v7546_v39 = vadd.f32 %v10509_v30, %v7532_v26  ;;  %v7535_v59 = vmul.f32 %v10503_v53, %v7521_v52 }
0x17a9   : > { %v9011_v10 = vpop.eup %9010  ;;  %v7571_v14 = vadd.f32 %v7570_v58, %v7569_v50  ;;  %v7555_v21 = vadd.f32 %v7554_v34, %v7553_v2 }
0x17aa   : > { %v9013_v29 = vpop.eup %9012  ;;  %v7576_v15 = vadd.f32 %v7575_v12, %v7574_v16  ;;  %v7560_v31 = vsel %vm733_vm2, %v7546_v39, 0.0  ;;  %v7549_v46 = vadd.f32 %v10509_v30, %v7535_v59  ;;  %v7523_v51 = vmul.f32 %v9011_v10, %v10477_v20 }
0x17ab   : > { %v7556_v35 = vrot.slane %v7555_v21, 2  ;;  %v7561_v17 = vrot.slane %v7560_v31, 4  ;;  %v7522_v48 = vmul.f32 %v9013_v29, %v10479_v38  ;;  %v7572_v13 = vrot.slane %v7571_v14, 1 }
0x17ac   : > { %v7577_v63 = vrot.slane %v7576_v15, 2  ;;  %v7581_v56 = vsel %vm733_vm2, %v7549_v46, 0.0  ;;  %v7537_v11 = vmul.f32 %v10503_v53, %v7523_v51 }
0x17ad   : > { %v9015_v55 = vpop.eup %9014  ;;  %v7557_v0 = vadd.f32 %v7556_v35, %v7555_v21  ;;  %v7562_v40 = vadd.f32 %v7561_v17, %v7560_v31  ;;  %v7582_v1 = vrot.slane %v7581_v56, 4  ;;  %v7536_v36 = vmul.f32 %v10503_v53, %v7522_v48 }
0x17ae   : > { %v7578_v47 = vadd.f32 %v7577_v63, %v7576_v15  ;;  %v7551_v25 = vadd.f32 %v10509_v30, %v7537_v11  ;;  %v7524_v20 = vmul.f32 %v9015_v55, %v10486_v28  ;;  %v7573_v4 = vadd.f32 %v7572_v13, %v7571_v14 }
0x17af   : > { %v7558_v37 = vrot.slane %v7557_v0, 1  ;;  %v7563_v45 = vrot.slane %v7562_v40, 2  ;;  %v7583_v38 = vadd.f32 %v7582_v1, %v7581_v56  ;;  %v7550_v3 = vadd.f32 %v10509_v30, %v7536_v36 }
0x17b0   : > { %v7579_v61 = vrot.slane %v7578_v47, 1  ;;  %v7595_v27 = vsel %vm733_vm2, %v7551_v25, 0.0  ;;  %v7538_v24 = vmul.f32 %v10503_v53, %v7524_v20  ;;  %v7612_v18 = vmul.f32 0.125, %v7573_v4 }
0x17b1   : > { %v7559_v19 = vadd.f32 %v7558_v37, %v7557_v0  ;;  %v7564_v49 = vadd.f32 %v7563_v45, %v7562_v40  ;;  %v7584_v57 = vrot.slane %v7583_v38, 2  ;;  %v7596_v5 = vrot.slane %v7595_v27, 4 }
0x17b2   : > { %v7588_v6 = vsel %vm733_vm2, %v7550_v3, 0.0  ;;  %v7552_v22 = vadd.f32 %v10509_v30, %v7538_v24  ;;  %v7580_v32 = vadd.f32 %v7579_v61, %v7578_v47  ;;  %v7624_v52 = vpack.c.bf16 %v7612_v18, %v7612_v18  ;;  %v8038_v24 = vld [vmem:[%s10605_s16] ss:$0 sm:$0xff] }
0x17b3   : > { %v7610_v28 = vmul.f32 0.125, %v7559_v19  ;;  %v7565_v7 = vrot.slane %v7564_v49, 1  ;;  %v7585_v8 = vadd.f32 %v7584_v57, %v7583_v38  ;;  %v7597_v9 = vadd.f32 %v7596_v5, %v7595_v27 }
0x17b4   : > { %v7589_v23 = vrot.slane %v7588_v6, 4  ;;  %v7602_v44 = vsel %vm733_vm2, %v7552_v22, 0.0  ;;  %v7613_v2 = vmul.f32 0.125, %v7580_v32  ;;  %v7647_v31 = vunpack.c.l.b16 %v7624_v52 }
0x17b5   : > { %v7566_v42 = vadd.f32 %v7565_v7, %v7564_v49  ;;  %v7586_v53 = vrot.slane %v7585_v8, 1  ;;  %v7603_v33 = vrot.slane %v7602_v44, 4  ;;  %v7598_v54 = vrot.slane %v7597_v9, 2 }
0x17b6   : > { %v7590_v43 = vadd.f32 %v7589_v23, %v7588_v6  ;;  %v7622_v41 = vpack.c.bf16 %v7610_v28, %v7610_v28  ;;  %v7625_v21 = vpack.c.bf16 %v7613_v2, %v7613_v2 }
0x17b7   : > { %v7611_v60 = vmul.f32 0.125, %v7566_v42  ;;  %v7587_v50 = vadd.f32 %v7586_v53, %v7585_v8  ;;  %v7604_v62 = vadd.f32 %v7603_v33, %v7602_v44  ;;  %v7599_v30 = vadd.f32 %v7598_v54, %v7597_v9  ;;  %v8042_v42 = vld [vmem:[%s10606_s17] ss:$0 sm:$0xff] }
0x17b8   : > { %v7591_v26 = vrot.slane %v7590_v43, 2  ;;  %v7645_v59 = vunpack.c.l.b16 %v7622_v41  ;;  %v7648_v11 = vunpack.c.l.b16 %v7625_v21  ;;  %v8043_v33 = vld [vmem:[%s10607_s18] ss:$0 sm:$0xff] }
0x17b9   : > { %v7623_v58 = vpack.c.bf16 %v7611_v60, %v7611_v60  ;;  %v7614_v34 = vmul.f32 0.125, %v7587_v50  ;;  %v7605_v16 = vrot.slane %v7604_v62, 2  ;;  %v7600_v12 = vrot.slane %v7599_v30, 1 }
0x17ba   : > { %v7592_v39 = vadd.f32 %v7591_v26, %v7590_v43 }
0x17bb   : > { %v7646_v10 = vunpack.c.l.b16 %v7623_v58  ;;  %v7606_v14 = vadd.f32 %v7605_v16, %v7604_v62  ;;  %v7601_v15 = vadd.f32 %v7600_v12, %v7599_v30  ;;  %v7626_v46 = vpack.c.bf16 %v7614_v34, %v7614_v34 }
0x17bc   : > { %v7593_v29 = vrot.slane %v7592_v39, 1 }
0x17bd   : > { %v7607_v51 = vrot.slane %v7606_v14, 1  ;;  %v7654_v35 = vsel %vm7653_vm5, %v7646_v10, %v7645_v59  ;;  %v7616_v48 = vmul.f32 0.125, %v7601_v15  ;;  %v7649_v0 = vunpack.c.l.b16 %v7626_v46 }
0x17be   : > { %v7594_v17 = vadd.f32 %v7593_v29, %v7592_v39  ;;  %v7656_v56 = vsel %vm7655_vm6, %v7647_v31, %v7654_v35 }
0x17bf   : > { %v7608_v63 = vadd.f32 %v7607_v51, %v7606_v14  ;;  %v7628_v13 = vpack.c.bf16 %v7616_v48, %v7616_v48  ;;  %v7658_v47 = vsel %vm7657_vm7, %v7648_v11, %v7656_v56 }
0x17c0   : > { %v7615_v55 = vmul.f32 0.125, %v7594_v17  ;;  %v7660_v45 = vsel %vm7659_vm8, %v7649_v0, %v7658_v47 }
0x17c1   : > { %v7617_v40 = vmul.f32 0.125, %v7608_v63  ;;  %v7651_v36 = vunpack.c.l.b16 %v7628_v13 }
0x17c2   : > { %v7627_v1 = vpack.c.bf16 %v7615_v55, %v7615_v55 }
0x17c3   : > { %v7629_v25 = vpack.c.bf16 %v7617_v40, %v7617_v40 }
0x17c4   : > { %v7650_v20 = vunpack.c.l.b16 %v7627_v1 }
0x17c5   : > { %v7652_v37 = vunpack.c.l.b16 %v7629_v25 }
0x17c6   : > { %v7662_v38 = vsel %vm7661_vm9, %v7650_v20, %v7660_v45 }
0x17c7   : > { %v7664_v61 = vsel %vm7663_vm10, %v7651_v36, %v7662_v38 }
0x17c8   : > { %v7666_v27 = vsel %vm7665_vm11, %v7652_v37, %v7664_v61 }
0x17c9   : > { %v7667_v3 = vpack.c.b16 %v7666_v27, %v7666_v27 }
0x17cb   : > { %8699 = vmatmul.mubr.msk.bf16.vlgmr.msra.gmra.mxu0 %vm733_vm2, %v7667_v3 }
0x188b   : > { %v7717_v4 = vpop.f32.mrf.mxu0 }
0x188c   : > { %v7718_v19 = vadd.f32 %v8038_v24, %v7717_v4 }
0x188d   : > { %v8700_v49 = vpop.f32.mrf.mxu0 }
0x188e   : > { %v7725_v57 = vsel %vm733_vm2, %v7718_v19, 0.0 }
0x188f   : > { %7726 = vadd.xlane.f32.xlu1 %v7725_v57  ;;  %v7720_v5 = vpop.f32.mrf.mxu0 }
0x1891   : > { %v8701_v6 = vpop.f32.mrf.mxu0 }
0x1918   : > { %v7727_v22 = vpop.xlane.xlu1 %7726 }
0x1919   : > { %v7728_v28 = vmul.f32 0.03125, %v7727_v22 }
0x191b   : > { %v7729_v7 = vsub.f32 %v7718_v19, %v7728_v28 }
0x191d   : > { %v7730_v8 = vmul.f32 %v7729_v7, %v7729_v7 }
0x191f   : > { %v7731_v32 = vsel %vm733_vm2, %v7730_v8, 0.0 }
0x1920   : > { %7732 = vadd.xlane.f32.xlu0 %v7731_v32 }
0x19a9   : > { %v7733_v9 = vpop.xlane.xlu0 %7732 }
0x19aa   : > { %v7734_v23 = vmul.f32 0.03125, %v7733_v9 }
0x19ac   : > { %v7735_v44 = vadd.f32 1e-05, %v7734_v23 }
0x19ae   : > { %9016 = vrsqrt.f32 %v7735_v44 }
0x19bb   : > { %v9017_v18 = vpop.eup %9016 }
0x19bc   : > { %v7737_v53 = vmul.f32 %v9017_v18, %v7729_v7 }
0x19be   : > { %v7744_v54 = vmul.f32 %v8042_v42, %v7737_v53 }
0x19c0   : > { %v7751_v43 = vadd.f32 %v8043_v33, %v7744_v54 }
0x19c2   : > { %7752 = vst.msk [vmem:[%s596_s28] sm:$0xff] %vm733_vm2, %v7751_v43 }
0x19c3   : > { %9031 = shalt.err (!%p9028_p3)
}
0x19c4   : > { %s9032_s5 = scalar_lea.hbm %s7765_s7, 128  ;;  %s9036_s20 = scalar_lea.hbm %s10608_s19, 256 }
0x19c5   : > { %p9033_p4 = scmp.ne.s32.totalorder %s7765_s7, %s9032_s5  ;;  %p9037_p9 = scmp.lt.s32.totalorder %s7765_s7, %s10608_s19 }
0x19c6   : > { %p9038_p10 = scmp.lt.s32.totalorder %s9036_s20, %s9032_s5 }
0x19c7   : > { %p9034_p7 = pnand %p9033_p4, %p9227_p5 }
0x19c8   : > { %p9039_p11 = por %p9038_p10, %p9037_p9 }
0x19c9   : > { %p9035_p8 = pneg %p9034_p7 }
0x19cb   : > { %p9040_p12 = pnand %p9039_p11, %p9035_p8 }
0x19cd   : > { %9043 = shalt.err (!%p9040_p12)
}
0x19ce   : > { %8707 = dma.vmem_to_hbm [thread:$0]  (%p9227_p5), %s7768_s4, 128, %s7765_s7, %s7754_s8  }
0x19cf PF: > { %p8713_p13 = scmp.ge.s32.totalorder %s9078_s21, 2  ;;  %s7779_s28 = sand.u32 1, %s9066_s0  }
0x19d0   : > { %s7780_s22 = scalar_lea.sflag [#allocation3], %s7779_s28 }
0x19d1   : > { %p8710_p0 = pnand %p8713_p13, %p9231_p6 }
0x19d3   : > { %p8711_p1 = pneg %p8710_p0 }
0x19d5   : > { %9061 = dma.done.wait (%p8711_p1), %s7780_s22, 128  }
0x19d6   : > { %9063 = vsyncadd (%p8711_p1), %s7780_s22, 4294967168  ;;  %s10654_s21 = sld [smem:[#allocation6_spill]]  ;;  %s10657_s0 = smov %s9070_s30 }
0x19d7   : > { %s10655_s23 = sld [smem:[#allocation5_spill]] }
0x19d8   : > { %s10656_s20 = sld [smem:[#allocation7_spill]] }
0x19dc   : > { %p29_p2 = scmp.ge.s32.totalorder %s10654_s21, 4  }
0x19dd   : > { %s10658_s30 = smov %s10655_s23 }
0x19de   :  { %31 = sbr.rel (!%p29_p2) target bundleno = 13 (0xd), region = 143 }
0x19e3   :  { %7785 = vsyncpa [#allocation3], 1 }
0x19e4   :  { %7787 = vsyncpa [#allocation3 + $0x1], 1 }

</bundles_post_ra>
